<compile_context>
chip_gen: v7x
topology: tpu7x:2x2x1
jax: 0.10.0
libtpu: 0.0.40
codegen_flags: <defaults>
</compile_context>

<pallas_src>
import functools
import math

import jax
import jax.numpy as jnp
from jax.experimental import pallas as pl
from jax.experimental.pallas import tpu as pltpu


# ---------------------------------------------------------------------------
# Kernel: one (Bt, T) block of rows per grid step, full enc_num-layer stack
# (shared weights) computed in-kernel.  x arrives flattened to (Bt*T, D).
# ---------------------------------------------------------------------------
def _encoder_kernel(x_ref,
                    wqkv_ref, bqkv_ref,
                    wo_ref, bo_ref,
                    w1_ref, b1_ref, w2_ref, b2_ref,
                    o_ref,
                    *, n_head, enc_num, batch_tile, seq_len, mha_size):
    Bt, T = batch_tile, seq_len
    R = Bt * T
    D = x_ref.shape[-1]
    mha = mha_size
    ffn = w1_ref.shape[-1]
    dh = mha // n_head

    # ----- hoisted weight reads (already bf16; shared by every layer) -----
    wqkv = wqkv_ref[...]                       # (D, 3*mha), Q slab pre-scaled
    wo = wo_ref[...]                           # (mha, D)
    w1 = w1_ref[...]                           # (D, ffn)
    w2 = w2_ref[...]                           # (ffn, D)
    # Per-head slices of the output projection (static sublane slices, read
    # once): lets us skip the lane-dim concat of head outputs entirely.
    wo_h = [wo[hh * dh:(hh + 1) * dh, :] for hh in range(n_head)]

    # ----- hoisted bias broadcasts (f32, added to f32 accumulators) -----
    bqkv = jnp.broadcast_to(bqkv_ref[...], (R, 3 * mha))
    bo = jnp.broadcast_to(bo_ref[...], (R, D))
    b1 = jnp.broadcast_to(b1_ref[...], (R, ffn))
    b2 = jnp.broadcast_to(b2_ref[...], (R, D))

    h = x_ref[...]                   # (R, D) f32; rows = Bt batch elems x T steps

    # enc_num is small & static -> unrolled; the SAME weights are used each
    # layer, matching the PyTorch [module] * enc_num sharing.
    for _ in range(enc_num):
        hb = h.astype(jnp.bfloat16)

        # ----- fused Q/K/V projection (bf16 in, f32 accumulate) -----
        # 1/sqrt(dh) is already folded into the Q slab of wqkv / bqkv.
        qkv = jnp.dot(hb, wqkv, preferred_element_type=jnp.float32) + bqkv
        # (R, 3*mha) -> (Bt, T, 3*mha): last dim unchanged, T % 8 == 0.
        qkv3 = qkv.reshape(Bt, T, 3 * mha)

        # ----- attention, batched over Bt inside each (static) head -----
        mha_out = None
        for hi in range(n_head):
            q_sl = slice(hi * dh, (hi + 1) * dh)
            k_sl = slice(mha + hi * dh, mha + (hi + 1) * dh)
            v_sl = slice(2 * mha + hi * dh, 2 * mha + (hi + 1) * dh)
            qh = qkv3[:, :, q_sl].astype(jnp.bfloat16)        # (Bt, T, dh)
            kh = qkv3[:, :, k_sl].astype(jnp.bfloat16)
            vh = qkv3[:, :, v_sl].astype(jnp.bfloat16)
            # contract last dims directly — no materialized transpose
            s = jnp.einsum('bqd,bkd->bqk', qh, kh,
                           preferred_element_type=jnp.float32)     # (Bt, T, T)
            s = s - jnp.max(s, axis=-1, keepdims=True)
            p = jnp.exp(s)
            p = p * pl.reciprocal(jnp.sum(p, axis=-1, keepdims=True), approx=True)
            oh = jnp.einsum('bqk,bkd->bqd', p.astype(jnp.bfloat16), vh,
                            preferred_element_type=jnp.float32)    # (Bt, T, dh)
            # output projection, accumulated per head (== concat @ wo)
            contrib = jnp.dot(oh.reshape(R, dh).astype(jnp.bfloat16), wo_h[hi],
                              preferred_element_type=jnp.float32)  # (R, D)
            mha_out = contrib if mha_out is None else mha_out + contrib

        h = h + mha_out + bo                              # residual (f32)

        # ----- position-wise FFN (single shared module) -----
        f = jnp.dot(h.astype(jnp.bfloat16), w1,
                    preferred_element_type=jnp.float32) + b1
        f = jnp.maximum(f, 0.0)
        f = jnp.dot(f.astype(jnp.bfloat16), w2,
                    preferred_element_type=jnp.float32) + b2
        h = h + f                                         # residual (f32)

    o_ref[...] = h


# ---------------------------------------------------------------------------
# Wrapper
# ---------------------------------------------------------------------------
def self_attn_encoder(x, params, *, n_head, enc_num, batch_tile=None):
    """x: (B, T, D) float32 -> (B, T, D) float32."""
    B, T, D = x.shape
    mha = params["wq"].shape[1]
    ffn = params["w1"].shape[1]
    assert mha % n_head == 0
    dh = mha // n_head
    if batch_tile is None:
        batch_tile = B
    assert B % batch_tile == 0, "batch must be divisible by batch_tile"
    assert T % 8 == 0, "sequence length must be a multiple of 8 (sublane tiling)"

    scale = 1.0 / math.sqrt(dh)

    # Fuse Q/K/V weights and biases (softmax scale folded into the Q slab);
    # matmul operands in bf16, f32 accumulation happens in-kernel.
    wqkv = jnp.concatenate(
        [params["wq"] * scale, params["wk"], params["wv"]], axis=1
    ).astype(jnp.bfloat16)                                     # (D, 3*mha)
    bqkv = jnp.concatenate(
        [params["bq"] * scale, params["bk"], params["bv"]], axis=1
    ).astype(jnp.float32)                                      # (1, 3*mha)

    weights = [
        wqkv, bqkv,
        params["wo"].astype(jnp.bfloat16), params["bo"].astype(jnp.float32),
        params["w1"].astype(jnp.bfloat16), params["b1"].astype(jnp.float32),
        params["w2"].astype(jnp.bfloat16), params["b2"].astype(jnp.float32),
    ]

    # Flatten (B, T, D) -> (B*T, D): the kernel works on 2D row blocks of
    # batch_tile * T rows; attention reshapes back per batch element inside.
    x2 = x.reshape(B * T, D).astype(jnp.float32)
    rows_per_step = batch_tile * T

    x_spec = pl.BlockSpec((rows_per_step, D), lambda i: (i, 0))
    out_spec = pl.BlockSpec((rows_per_step, D), lambda i: (i, 0))
    w_specs = [pl.BlockSpec(w.shape, lambda i: (0, 0)) for w in weights]

    macs_per_bt_layer = (3 * T * D * mha      # fused Q/K/V projection
                         + 2 * T * T * mha    # scores + PV (summed over heads)
                         + T * mha * D        # output projection
                         + 2 * T * D * ffn)   # FFN
    cost = pl.CostEstimate(
        flops=2 * macs_per_bt_layer * enc_num * B,
        transcendentals=enc_num * B * n_head * T * T,
        bytes_accessed=2 * x2.size * 4
        + sum(int(w.size) * w.dtype.itemsize for w in weights),
    )

    kernel = functools.partial(_encoder_kernel, n_head=n_head, enc_num=enc_num,
                               batch_tile=batch_tile, seq_len=T, mha_size=mha)

    out2 = pl.pallas_call(
        kernel,
        out_shape=jax.ShapeDtypeStruct((B * T, D), jnp.float32),
        grid_spec=pltpu.PrefetchScalarGridSpec(
            num_scalar_prefetch=0,
            grid=(B // batch_tile,),
            in_specs=[x_spec] + w_specs,
            out_specs=out_spec,
        ),
        compiler_params=pltpu.CompilerParams(
            dimension_semantics=("parallel",),
            vmem_limit_bytes=64 * 1024 * 1024,
        ),
        cost_estimate=cost,
    )(x2, *weights)

    return out2.reshape(B, T, D)


# ---------------------------------------------------------------------------
# Pure-JAX f32 reference (same math) for a correctness check.
# ---------------------------------------------------------------------------
def _reference(x, p, *, n_head, enc_num):
    B, T, D = x.shape
    dh = p["wq"].shape[1] // n_head
    scale = 1.0 / jnp.sqrt(jnp.float32(dh))
    h = x
    for _ in range(enc_num):
        q = h @ p["wq"] + p["bq"]
        k = h @ p["wk"] + p["bk"]
        v = h @ p["wv"] + p["bv"]
        qh = q.reshape(B, T, n_head, dh).transpose(0, 2, 1, 3)
        kh = k.reshape(B, T, n_head, dh).transpose(0, 2, 1, 3)
        vh = v.reshape(B, T, n_head, dh).transpose(0, 2, 1, 3)
        s = jnp.einsum("bhqd,bhkd->bhqk", qh, kh) * scale
        pr = jax.nn.softmax(s, axis=-1)
        a = jnp.einsum("bhqk,bhkd->bhqd", pr, vh).transpose(0, 2, 1, 3)
        a = a.reshape(B, T, -1)
        h = h + (a @ p["wo"] + p["bo"])
        f = jnp.maximum(h @ p["w1"] + p["b1"], 0.0)
        h = h + (f @ p["w2"] + p["b2"])
    return h


def init_params(key, input_size, mha_size, ffn_size):
    ks = jax.random.split(key, 6)
    sc = 0.05
    return {
        "wq": sc * jax.random.normal(ks[0], (input_size, mha_size), jnp.float32),
        "bq": jnp.zeros((1, mha_size), jnp.float32),
        "wk": sc * jax.random.normal(ks[1], (input_size, mha_size), jnp.float32),
        "bk": jnp.zeros((1, mha_size), jnp.float32),
        "wv": sc * jax.random.normal(ks[2], (input_size, mha_size), jnp.float32),
        "bv": jnp.zeros((1, mha_size), jnp.float32),
        "wo": sc * jax.random.normal(ks[3], (mha_size, input_size), jnp.float32),
        "bo": jnp.zeros((1, input_size), jnp.float32),
        "w1": sc * jax.random.normal(ks[4], (input_size, ffn_size), jnp.float32),
        "b1": jnp.zeros((1, ffn_size), jnp.float32),
        "w2": sc * jax.random.normal(ks[5], (ffn_size, input_size), jnp.float32),
        "b2": jnp.zeros((1, input_size), jnp.float32),
    }


if __name__ == "__main__":
    # Small shapes consistent with the module's (B, T, input_size) input.
    B, T = 8, 16
    input_size, mha_size, ffn_size = 32, 64, 64
    n_head, enc_num = 4, 2
    batch_tile = 4          # 2 parallel grid steps, 64 rows of work each

    key = jax.random.PRNGKey(0)
    kx, kp = jax.random.split(key)
    x = jax.random.normal(kx, (B, T, input_size), jnp.float32)
    params = init_params(kp, input_size, mha_size, ffn_size)

    out = self_attn_encoder(x, params, n_head=n_head, enc_num=enc_num,
                            batch_tile=batch_tile)
    out = jax.block_until_ready(out)

    ref = _reference(x, params, n_head=n_head, enc_num=enc_num)
    assert out.shape == (B, T, input_size)
    err = float(jnp.max(jnp.abs(out - ref)))
    # bf16 matmul operands (f32 accumulation) + approx reciprocal -> loose tol
    assert err < 1e-1, f"mismatch vs pure-JAX reference: max abs err = {err}"

    print("KERNEL_OK")
</pallas_src>

<mosaic_0001>
module attributes {stable_mosaic.version = 11 : i64} {
  func.func @_encoder_kernel(%arg0: i32, %arg1: memref<64x32xf32, #tpu.memory_space<vmem>>, %arg2: memref<32x192xbf16, #tpu.memory_space<vmem>>, %arg3: memref<1x192xf32, #tpu.memory_space<vmem>>, %arg4: memref<64x32xbf16, #tpu.memory_space<vmem>>, %arg5: memref<1x32xf32, #tpu.memory_space<vmem>>, %arg6: memref<32x64xbf16, #tpu.memory_space<vmem>>, %arg7: memref<1x64xf32, #tpu.memory_space<vmem>>, %arg8: memref<64x32xbf16, #tpu.memory_space<vmem>>, %arg9: memref<1x32xf32, #tpu.memory_space<vmem>>, %arg10: memref<64x32xf32, #tpu.memory_space<vmem>>) attributes {dimension_semantics = [#tpu.dimension_semantics<parallel>], iteration_bounds = array<i64: 2>, scalar_prefetch = 0 : i64, scratch_operands = 0 : i64, tpu.core_type = #tpu.core_type<tc>, window_params = [{transform_indices = @transform_0, window_bounds = array<i64: 64, 32>}, {pipeline_mode = #tpu.pipeline_mode<synchronous>, transform_indices = @transform_1, window_bounds = array<i64: 32, 192>}, {pipeline_mode = #tpu.pipeline_mode<synchronous>, transform_indices = @transform_2, window_bounds = array<i64: 1, 192>}, {pipeline_mode = #tpu.pipeline_mode<synchronous>, transform_indices = @transform_3, window_bounds = array<i64: 64, 32>}, {pipeline_mode = #tpu.pipeline_mode<synchronous>, transform_indices = @transform_4, window_bounds = array<i64: 1, 32>}, {pipeline_mode = #tpu.pipeline_mode<synchronous>, transform_indices = @transform_5, window_bounds = array<i64: 32, 64>}, {pipeline_mode = #tpu.pipeline_mode<synchronous>, transform_indices = @transform_6, window_bounds = array<i64: 1, 64>}, {pipeline_mode = #tpu.pipeline_mode<synchronous>, transform_indices = @transform_7, window_bounds = array<i64: 64, 32>}, {pipeline_mode = #tpu.pipeline_mode<synchronous>, transform_indices = @transform_8, window_bounds = array<i64: 1, 32>}, {transform_indices = @transform_9, window_bounds = array<i64: 64, 32>}]} {
    %c0 = arith.constant 0 : index
    %c0_0 = arith.constant 0 : index
    %0 = vector.load %arg2[%c0, %c0_0] : memref<32x192xbf16, #tpu.memory_space<vmem>>, vector<32x192xbf16>
    %c0_1 = arith.constant 0 : index
    %c0_2 = arith.constant 0 : index
    %1 = vector.load %arg4[%c0_1, %c0_2] : memref<64x32xbf16, #tpu.memory_space<vmem>>, vector<64x32xbf16>
    %c0_3 = arith.constant 0 : index
    %c0_4 = arith.constant 0 : index
    %2 = vector.load %arg6[%c0_3, %c0_4] : memref<32x64xbf16, #tpu.memory_space<vmem>>, vector<32x64xbf16>
    %c0_5 = arith.constant 0 : index
    %c0_6 = arith.constant 0 : index
    %3 = vector.load %arg8[%c0_5, %c0_6] : memref<64x32xbf16, #tpu.memory_space<vmem>>, vector<64x32xbf16>
    %4 = vector.extract_strided_slice %1 {offsets = [0, 0], sizes = [16, 32], strides = [1, 1]} : vector<64x32xbf16> to vector<16x32xbf16>
    %5 = vector.extract_strided_slice %1 {offsets = [16, 0], sizes = [16, 32], strides = [1, 1]} : vector<64x32xbf16> to vector<16x32xbf16>
    %6 = vector.extract_strided_slice %1 {offsets = [32, 0], sizes = [16, 32], strides = [1, 1]} : vector<64x32xbf16> to vector<16x32xbf16>
    %7 = vector.extract_strided_slice %1 {offsets = [48, 0], sizes = [16, 32], strides = [1, 1]} : vector<64x32xbf16> to vector<16x32xbf16>
    %c0_7 = arith.constant 0 : index
    %c0_8 = arith.constant 0 : index
    %8 = vector.load %arg3[%c0_7, %c0_8] : memref<1x192xf32, #tpu.memory_space<vmem>>, vector<1x192xf32>
    %9 = vector.shape_cast %8 : vector<1x192xf32> to vector<1x192xf32>
    %10 = vector.broadcast %9 : vector<1x192xf32> to vector<64x192xf32>
    %c0_9 = arith.constant 0 : index
    %c0_10 = arith.constant 0 : index
    %11 = vector.load %arg5[%c0_9, %c0_10] : memref<1x32xf32, #tpu.memory_space<vmem>>, vector<1x32xf32>
    %12 = vector.shape_cast %11 : vector<1x32xf32> to vector<1x32xf32>
    %13 = vector.broadcast %12 : vector<1x32xf32> to vector<64x32xf32>
    %c0_11 = arith.constant 0 : index
    %c0_12 = arith.constant 0 : index
    %14 = vector.load %arg7[%c0_11, %c0_12] : memref<1x64xf32, #tpu.memory_space<vmem>>, vector<1x64xf32>
    %15 = vector.shape_cast %14 : vector<1x64xf32> to vector<1x64xf32>
    %16 = vector.broadcast %15 : vector<1x64xf32> to vector<64x64xf32>
    %c0_13 = arith.constant 0 : index
    %c0_14 = arith.constant 0 : index
    %17 = vector.load %arg9[%c0_13, %c0_14] : memref<1x32xf32, #tpu.memory_space<vmem>>, vector<1x32xf32>
    %18 = vector.shape_cast %17 : vector<1x32xf32> to vector<1x32xf32>
    %19 = vector.broadcast %18 : vector<1x32xf32> to vector<64x32xf32>
    %c0_15 = arith.constant 0 : index
    %c0_16 = arith.constant 0 : index
    %20 = vector.load %arg1[%c0_15, %c0_16] : memref<64x32xf32, #tpu.memory_space<vmem>>, vector<64x32xf32>
    %21 = arith.truncf %20 : vector<64x32xf32> to vector<64x32xbf16>
    %cst = arith.constant dense<0.000000e+00> : vector<64x192xf32>
    %22 = tpu.matmul %21, %0, %cst {dimension_numbers = #tpu.dot_dimension_numbers<[1], [0], [0], [1], [0, 0, 1, 1], [], []>} : vector<64x32xbf16>, vector<32x192xbf16>, vector<64x192xf32> -> vector<64x192xf32>
    %23 = arith.addf %22, %10 : vector<64x192xf32>
    %24 = vector.shape_cast %23 : vector<64x192xf32> to vector<4x16x192xf32>
    %25 = vector.extract_strided_slice %24 {offsets = [0, 0, 0], sizes = [4, 16, 16], strides = [1, 1, 1]} : vector<4x16x192xf32> to vector<4x16x16xf32>
    %26 = arith.truncf %25 : vector<4x16x16xf32> to vector<4x16x16xbf16>
    %27 = vector.extract_strided_slice %24 {offsets = [0, 0, 64], sizes = [4, 16, 16], strides = [1, 1, 1]} : vector<4x16x192xf32> to vector<4x16x16xf32>
    %28 = arith.truncf %27 : vector<4x16x16xf32> to vector<4x16x16xbf16>
    %29 = vector.extract_strided_slice %24 {offsets = [0, 0, 128], sizes = [4, 16, 16], strides = [1, 1, 1]} : vector<4x16x192xf32> to vector<4x16x16xf32>
    %30 = arith.truncf %29 : vector<4x16x16xf32> to vector<4x16x16xbf16>
    "tpu.trace_start"() <{level = 10 : i32, message = "bqd,bkd->bqk"}> : () -> ()
    %cst_17 = arith.constant dense<0.000000e+00> : vector<4x16x16xf32>
    %31 = tpu.matmul %26, %28, %cst_17 {dimension_numbers = #tpu.dot_dimension_numbers<[2], [2], [1], [1], [0, 0, 0, 1, 1, 1], [0], [0]>} : vector<4x16x16xbf16>, vector<4x16x16xbf16>, vector<4x16x16xf32> -> vector<4x16x16xf32>
    "tpu.trace_stop"() : () -> ()
    %cst_18 = arith.constant dense<0xFF800000> : vector<4x16xf32>
    %32 = vector.multi_reduction <maximumf>, %31, %cst_18 [2] : vector<4x16x16xf32> to vector<4x16xf32>
    %33 = vector.shape_cast %32 : vector<4x16xf32> to vector<4x16x1xf32>
    %34 = vector.broadcast %33 : vector<4x16x1xf32> to vector<4x16x16xf32>
    %35 = arith.subf %31, %34 : vector<4x16x16xf32>
    %36 = math.exp %35 : vector<4x16x16xf32>
    %cst_19 = arith.constant dense<0.000000e+00> : vector<4x16xf32>
    %37 = vector.multi_reduction <add>, %36, %cst_19 [2] : vector<4x16x16xf32> to vector<4x16xf32>
    %38 = vector.shape_cast %37 : vector<4x16xf32> to vector<4x16x1xf32>
    %39 = tpu.reciprocal %38 {approx = true} : vector<4x16x1xf32> -> vector<4x16x1xf32>
    %40 = vector.broadcast %39 : vector<4x16x1xf32> to vector<4x16x16xf32>
    %41 = arith.mulf %36, %40 : vector<4x16x16xf32>
    %42 = arith.truncf %41 : vector<4x16x16xf32> to vector<4x16x16xbf16>
    "tpu.trace_start"() <{level = 10 : i32, message = "bqk,bkd->bqd"}> : () -> ()
    %cst_20 = arith.constant dense<0.000000e+00> : vector<4x16x16xf32>
    %43 = tpu.matmul %42, %30, %cst_20 {dimension_numbers = #tpu.dot_dimension_numbers<[2], [1], [1], [2], [0, 0, 0, 1, 1, 2], [0], [0]>} : vector<4x16x16xbf16>, vector<4x16x16xbf16>, vector<4x16x16xf32> -> vector<4x16x16xf32>
    "tpu.trace_stop"() : () -> ()
    %44 = vector.shape_cast %43 : vector<4x16x16xf32> to vector<64x16xf32>
    %45 = arith.truncf %44 : vector<64x16xf32> to vector<64x16xbf16>
    %cst_21 = arith.constant dense<0.000000e+00> : vector<64x32xf32>
    %46 = tpu.matmul %45, %4, %cst_21 {dimension_numbers = #tpu.dot_dimension_numbers<[1], [0], [0], [1], [0, 0, 1, 1], [], []>} : vector<64x16xbf16>, vector<16x32xbf16>, vector<64x32xf32> -> vector<64x32xf32>
    %47 = vector.extract_strided_slice %24 {offsets = [0, 0, 16], sizes = [4, 16, 16], strides = [1, 1, 1]} : vector<4x16x192xf32> to vector<4x16x16xf32>
    %48 = arith.truncf %47 : vector<4x16x16xf32> to vector<4x16x16xbf16>
    %49 = vector.extract_strided_slice %24 {offsets = [0, 0, 80], sizes = [4, 16, 16], strides = [1, 1, 1]} : vector<4x16x192xf32> to vector<4x16x16xf32>
    %50 = arith.truncf %49 : vector<4x16x16xf32> to vector<4x16x16xbf16>
    %51 = vector.extract_strided_slice %24 {offsets = [0, 0, 144], sizes = [4, 16, 16], strides = [1, 1, 1]} : vector<4x16x192xf32> to vector<4x16x16xf32>
    %52 = arith.truncf %51 : vector<4x16x16xf32> to vector<4x16x16xbf16>
    "tpu.trace_start"() <{level = 10 : i32, message = "bqd,bkd->bqk"}> : () -> ()
    %cst_22 = arith.constant dense<0.000000e+00> : vector<4x16x16xf32>
    %53 = tpu.matmul %48, %50, %cst_22 {dimension_numbers = #tpu.dot_dimension_numbers<[2], [2], [1], [1], [0, 0, 0, 1, 1, 1], [0], [0]>} : vector<4x16x16xbf16>, vector<4x16x16xbf16>, vector<4x16x16xf32> -> vector<4x16x16xf32>
    "tpu.trace_stop"() : () -> ()
    %cst_23 = arith.constant dense<0xFF800000> : vector<4x16xf32>
    %54 = vector.multi_reduction <maximumf>, %53, %cst_23 [2] : vector<4x16x16xf32> to vector<4x16xf32>
    %55 = vector.shape_cast %54 : vector<4x16xf32> to vector<4x16x1xf32>
    %56 = vector.broadcast %55 : vector<4x16x1xf32> to vector<4x16x16xf32>
    %57 = arith.subf %53, %56 : vector<4x16x16xf32>
    %58 = math.exp %57 : vector<4x16x16xf32>
    %cst_24 = arith.constant dense<0.000000e+00> : vector<4x16xf32>
    %59 = vector.multi_reduction <add>, %58, %cst_24 [2] : vector<4x16x16xf32> to vector<4x16xf32>
    %60 = vector.shape_cast %59 : vector<4x16xf32> to vector<4x16x1xf32>
    %61 = tpu.reciprocal %60 {approx = true} : vector<4x16x1xf32> -> vector<4x16x1xf32>
    %62 = vector.broadcast %61 : vector<4x16x1xf32> to vector<4x16x16xf32>
    %63 = arith.mulf %58, %62 : vector<4x16x16xf32>
    %64 = arith.truncf %63 : vector<4x16x16xf32> to vector<4x16x16xbf16>
    "tpu.trace_start"() <{level = 10 : i32, message = "bqk,bkd->bqd"}> : () -> ()
    %cst_25 = arith.constant dense<0.000000e+00> : vector<4x16x16xf32>
    %65 = tpu.matmul %64, %52, %cst_25 {dimension_numbers = #tpu.dot_dimension_numbers<[2], [1], [1], [2], [0, 0, 0, 1, 1, 2], [0], [0]>} : vector<4x16x16xbf16>, vector<4x16x16xbf16>, vector<4x16x16xf32> -> vector<4x16x16xf32>
    "tpu.trace_stop"() : () -> ()
    %66 = vector.shape_cast %65 : vector<4x16x16xf32> to vector<64x16xf32>
    %67 = arith.truncf %66 : vector<64x16xf32> to vector<64x16xbf16>
    %cst_26 = arith.constant dense<0.000000e+00> : vector<64x32xf32>
    %68 = tpu.matmul %67, %5, %cst_26 {dimension_numbers = #tpu.dot_dimension_numbers<[1], [0], [0], [1], [0, 0, 1, 1], [], []>} : vector<64x16xbf16>, vector<16x32xbf16>, vector<64x32xf32> -> vector<64x32xf32>
    %69 = arith.addf %46, %68 : vector<64x32xf32>
    %70 = vector.extract_strided_slice %24 {offsets = [0, 0, 32], sizes = [4, 16, 16], strides = [1, 1, 1]} : vector<4x16x192xf32> to vector<4x16x16xf32>
    %71 = arith.truncf %70 : vector<4x16x16xf32> to vector<4x16x16xbf16>
    %72 = vector.extract_strided_slice %24 {offsets = [0, 0, 96], sizes = [4, 16, 16], strides = [1, 1, 1]} : vector<4x16x192xf32> to vector<4x16x16xf32>
    %73 = arith.truncf %72 : vector<4x16x16xf32> to vector<4x16x16xbf16>
    %74 = vector.extract_strided_slice %24 {offsets = [0, 0, 160], sizes = [4, 16, 16], strides = [1, 1, 1]} : vector<4x16x192xf32> to vector<4x16x16xf32>
    %75 = arith.truncf %74 : vector<4x16x16xf32> to vector<4x16x16xbf16>
    "tpu.trace_start"() <{level = 10 : i32, message = "bqd,bkd->bqk"}> : () -> ()
    %cst_27 = arith.constant dense<0.000000e+00> : vector<4x16x16xf32>
    %76 = tpu.matmul %71, %73, %cst_27 {dimension_numbers = #tpu.dot_dimension_numbers<[2], [2], [1], [1], [0, 0, 0, 1, 1, 1], [0], [0]>} : vector<4x16x16xbf16>, vector<4x16x16xbf16>, vector<4x16x16xf32> -> vector<4x16x16xf32>
    "tpu.trace_stop"() : () -> ()
    %cst_28 = arith.constant dense<0xFF800000> : vector<4x16xf32>
    %77 = vector.multi_reduction <maximumf>, %76, %cst_28 [2] : vector<4x16x16xf32> to vector<4x16xf32>
    %78 = vector.shape_cast %77 : vector<4x16xf32> to vector<4x16x1xf32>
    %79 = vector.broadcast %78 : vector<4x16x1xf32> to vector<4x16x16xf32>
    %80 = arith.subf %76, %79 : vector<4x16x16xf32>
    %81 = math.exp %80 : vector<4x16x16xf32>
    %cst_29 = arith.constant dense<0.000000e+00> : vector<4x16xf32>
    %82 = vector.multi_reduction <add>, %81, %cst_29 [2] : vector<4x16x16xf32> to vector<4x16xf32>
    %83 = vector.shape_cast %82 : vector<4x16xf32> to vector<4x16x1xf32>
    %84 = tpu.reciprocal %83 {approx = true} : vector<4x16x1xf32> -> vector<4x16x1xf32>
    %85 = vector.broadcast %84 : vector<4x16x1xf32> to vector<4x16x16xf32>
    %86 = arith.mulf %81, %85 : vector<4x16x16xf32>
    %87 = arith.truncf %86 : vector<4x16x16xf32> to vector<4x16x16xbf16>
    "tpu.trace_start"() <{level = 10 : i32, message = "bqk,bkd->bqd"}> : () -> ()
    %cst_30 = arith.constant dense<0.000000e+00> : vector<4x16x16xf32>
    %88 = tpu.matmul %87, %75, %cst_30 {dimension_numbers = #tpu.dot_dimension_numbers<[2], [1], [1], [2], [0, 0, 0, 1, 1, 2], [0], [0]>} : vector<4x16x16xbf16>, vector<4x16x16xbf16>, vector<4x16x16xf32> -> vector<4x16x16xf32>
    "tpu.trace_stop"() : () -> ()
    %89 = vector.shape_cast %88 : vector<4x16x16xf32> to vector<64x16xf32>
    %90 = arith.truncf %89 : vector<64x16xf32> to vector<64x16xbf16>
    %cst_31 = arith.constant dense<0.000000e+00> : vector<64x32xf32>
    %91 = tpu.matmul %90, %6, %cst_31 {dimension_numbers = #tpu.dot_dimension_numbers<[1], [0], [0], [1], [0, 0, 1, 1], [], []>} : vector<64x16xbf16>, vector<16x32xbf16>, vector<64x32xf32> -> vector<64x32xf32>
    %92 = arith.addf %69, %91 : vector<64x32xf32>
    %93 = vector.extract_strided_slice %24 {offsets = [0, 0, 48], sizes = [4, 16, 16], strides = [1, 1, 1]} : vector<4x16x192xf32> to vector<4x16x16xf32>
    %94 = arith.truncf %93 : vector<4x16x16xf32> to vector<4x16x16xbf16>
    %95 = vector.extract_strided_slice %24 {offsets = [0, 0, 112], sizes = [4, 16, 16], strides = [1, 1, 1]} : vector<4x16x192xf32> to vector<4x16x16xf32>
    %96 = arith.truncf %95 : vector<4x16x16xf32> to vector<4x16x16xbf16>
    %97 = vector.extract_strided_slice %24 {offsets = [0, 0, 176], sizes = [4, 16, 16], strides = [1, 1, 1]} : vector<4x16x192xf32> to vector<4x16x16xf32>
    %98 = arith.truncf %97 : vector<4x16x16xf32> to vector<4x16x16xbf16>
    "tpu.trace_start"() <{level = 10 : i32, message = "bqd,bkd->bqk"}> : () -> ()
    %cst_32 = arith.constant dense<0.000000e+00> : vector<4x16x16xf32>
    %99 = tpu.matmul %94, %96, %cst_32 {dimension_numbers = #tpu.dot_dimension_numbers<[2], [2], [1], [1], [0, 0, 0, 1, 1, 1], [0], [0]>} : vector<4x16x16xbf16>, vector<4x16x16xbf16>, vector<4x16x16xf32> -> vector<4x16x16xf32>
    "tpu.trace_stop"() : () -> ()
    %cst_33 = arith.constant dense<0xFF800000> : vector<4x16xf32>
    %100 = vector.multi_reduction <maximumf>, %99, %cst_33 [2] : vector<4x16x16xf32> to vector<4x16xf32>
    %101 = vector.shape_cast %100 : vector<4x16xf32> to vector<4x16x1xf32>
    %102 = vector.broadcast %101 : vector<4x16x1xf32> to vector<4x16x16xf32>
    %103 = arith.subf %99, %102 : vector<4x16x16xf32>
    %104 = math.exp %103 : vector<4x16x16xf32>
    %cst_34 = arith.constant dense<0.000000e+00> : vector<4x16xf32>
    %105 = vector.multi_reduction <add>, %104, %cst_34 [2] : vector<4x16x16xf32> to vector<4x16xf32>
    %106 = vector.shape_cast %105 : vector<4x16xf32> to vector<4x16x1xf32>
    %107 = tpu.reciprocal %106 {approx = true} : vector<4x16x1xf32> -> vector<4x16x1xf32>
    %108 = vector.broadcast %107 : vector<4x16x1xf32> to vector<4x16x16xf32>
    %109 = arith.mulf %104, %108 : vector<4x16x16xf32>
    %110 = arith.truncf %109 : vector<4x16x16xf32> to vector<4x16x16xbf16>
    "tpu.trace_start"() <{level = 10 : i32, message = "bqk,bkd->bqd"}> : () -> ()
    %cst_35 = arith.constant dense<0.000000e+00> : vector<4x16x16xf32>
    %111 = tpu.matmul %110, %98, %cst_35 {dimension_numbers = #tpu.dot_dimension_numbers<[2], [1], [1], [2], [0, 0, 0, 1, 1, 2], [0], [0]>} : vector<4x16x16xbf16>, vector<4x16x16xbf16>, vector<4x16x16xf32> -> vector<4x16x16xf32>
    "tpu.trace_stop"() : () -> ()
    %112 = vector.shape_cast %111 : vector<4x16x16xf32> to vector<64x16xf32>
    %113 = arith.truncf %112 : vector<64x16xf32> to vector<64x16xbf16>
    %cst_36 = arith.constant dense<0.000000e+00> : vector<64x32xf32>
    %114 = tpu.matmul %113, %7, %cst_36 {dimension_numbers = #tpu.dot_dimension_numbers<[1], [0], [0], [1], [0, 0, 1, 1], [], []>} : vector<64x16xbf16>, vector<16x32xbf16>, vector<64x32xf32> -> vector<64x32xf32>
    %115 = arith.addf %92, %114 : vector<64x32xf32>
    %116 = arith.addf %20, %115 : vector<64x32xf32>
    %117 = arith.addf %116, %13 : vector<64x32xf32>
    %118 = arith.truncf %117 : vector<64x32xf32> to vector<64x32xbf16>
    %cst_37 = arith.constant dense<0.000000e+00> : vector<64x64xf32>
    %119 = tpu.matmul %118, %2, %cst_37 {dimension_numbers = #tpu.dot_dimension_numbers<[1], [0], [0], [1], [0, 0, 1, 1], [], []>} : vector<64x32xbf16>, vector<32x64xbf16>, vector<64x64xf32> -> vector<64x64xf32>
    %120 = arith.addf %119, %16 : vector<64x64xf32>
    %cst_38 = arith.constant 0.000000e+00 : f32
    %121 = vector.broadcast %cst_38 : f32 to vector<64x64xf32>
    %122 = arith.maximumf %120, %121 : vector<64x64xf32>
    %123 = arith.truncf %122 : vector<64x64xf32> to vector<64x64xbf16>
    %cst_39 = arith.constant dense<0.000000e+00> : vector<64x32xf32>
    %124 = tpu.matmul %123, %3, %cst_39 {dimension_numbers = #tpu.dot_dimension_numbers<[1], [0], [0], [1], [0, 0, 1, 1], [], []>} : vector<64x64xbf16>, vector<64x32xbf16>, vector<64x32xf32> -> vector<64x32xf32>
    %125 = arith.addf %124, %19 : vector<64x32xf32>
    %126 = arith.addf %117, %125 : vector<64x32xf32>
    %127 = arith.truncf %126 : vector<64x32xf32> to vector<64x32xbf16>
    %cst_40 = arith.constant dense<0.000000e+00> : vector<64x192xf32>
    %128 = tpu.matmul %127, %0, %cst_40 {dimension_numbers = #tpu.dot_dimension_numbers<[1], [0], [0], [1], [0, 0, 1, 1], [], []>} : vector<64x32xbf16>, vector<32x192xbf16>, vector<64x192xf32> -> vector<64x192xf32>
    %129 = arith.addf %128, %10 : vector<64x192xf32>
    %130 = vector.shape_cast %129 : vector<64x192xf32> to vector<4x16x192xf32>
    %131 = vector.extract_strided_slice %130 {offsets = [0, 0, 0], sizes = [4, 16, 16], strides = [1, 1, 1]} : vector<4x16x192xf32> to vector<4x16x16xf32>
    %132 = arith.truncf %131 : vector<4x16x16xf32> to vector<4x16x16xbf16>
    %133 = vector.extract_strided_slice %130 {offsets = [0, 0, 64], sizes = [4, 16, 16], strides = [1, 1, 1]} : vector<4x16x192xf32> to vector<4x16x16xf32>
    %134 = arith.truncf %133 : vector<4x16x16xf32> to vector<4x16x16xbf16>
    %135 = vector.extract_strided_slice %130 {offsets = [0, 0, 128], sizes = [4, 16, 16], strides = [1, 1, 1]} : vector<4x16x192xf32> to vector<4x16x16xf32>
    %136 = arith.truncf %135 : vector<4x16x16xf32> to vector<4x16x16xbf16>
    "tpu.trace_start"() <{level = 10 : i32, message = "bqd,bkd->bqk"}> : () -> ()
    %cst_41 = arith.constant dense<0.000000e+00> : vector<4x16x16xf32>
    %137 = tpu.matmul %132, %134, %cst_41 {dimension_numbers = #tpu.dot_dimension_numbers<[2], [2], [1], [1], [0, 0, 0, 1, 1, 1], [0], [0]>} : vector<4x16x16xbf16>, vector<4x16x16xbf16>, vector<4x16x16xf32> -> vector<4x16x16xf32>
    "tpu.trace_stop"() : () -> ()
    %cst_42 = arith.constant dense<0xFF800000> : vector<4x16xf32>
    %138 = vector.multi_reduction <maximumf>, %137, %cst_42 [2] : vector<4x16x16xf32> to vector<4x16xf32>
    %139 = vector.shape_cast %138 : vector<4x16xf32> to vector<4x16x1xf32>
    %140 = vector.broadcast %139 : vector<4x16x1xf32> to vector<4x16x16xf32>
    %141 = arith.subf %137, %140 : vector<4x16x16xf32>
    %142 = math.exp %141 : vector<4x16x16xf32>
    %cst_43 = arith.constant dense<0.000000e+00> : vector<4x16xf32>
    %143 = vector.multi_reduction <add>, %142, %cst_43 [2] : vector<4x16x16xf32> to vector<4x16xf32>
    %144 = vector.shape_cast %143 : vector<4x16xf32> to vector<4x16x1xf32>
    %145 = tpu.reciprocal %144 {approx = true} : vector<4x16x1xf32> -> vector<4x16x1xf32>
    %146 = vector.broadcast %145 : vector<4x16x1xf32> to vector<4x16x16xf32>
    %147 = arith.mulf %142, %146 : vector<4x16x16xf32>
    %148 = arith.truncf %147 : vector<4x16x16xf32> to vector<4x16x16xbf16>
    "tpu.trace_start"() <{level = 10 : i32, message = "bqk,bkd->bqd"}> : () -> ()
    %cst_44 = arith.constant dense<0.000000e+00> : vector<4x16x16xf32>
    %149 = tpu.matmul %148, %136, %cst_44 {dimension_numbers = #tpu.dot_dimension_numbers<[2], [1], [1], [2], [0, 0, 0, 1, 1, 2], [0], [0]>} : vector<4x16x16xbf16>, vector<4x16x16xbf16>, vector<4x16x16xf32> -> vector<4x16x16xf32>
    "tpu.trace_stop"() : () -> ()
    %150 = vector.shape_cast %149 : vector<4x16x16xf32> to vector<64x16xf32>
    %151 = arith.truncf %150 : vector<64x16xf32> to vector<64x16xbf16>
    %cst_45 = arith.constant dense<0.000000e+00> : vector<64x32xf32>
    %152 = tpu.matmul %151, %4, %cst_45 {dimension_numbers = #tpu.dot_dimension_numbers<[1], [0], [0], [1], [0, 0, 1, 1], [], []>} : vector<64x16xbf16>, vector<16x32xbf16>, vector<64x32xf32> -> vector<64x32xf32>
    %153 = vector.extract_strided_slice %130 {offsets = [0, 0, 16], sizes = [4, 16, 16], strides = [1, 1, 1]} : vector<4x16x192xf32> to vector<4x16x16xf32>
    %154 = arith.truncf %153 : vector<4x16x16xf32> to vector<4x16x16xbf16>
    %155 = vector.extract_strided_slice %130 {offsets = [0, 0, 80], sizes = [4, 16, 16], strides = [1, 1, 1]} : vector<4x16x192xf32> to vector<4x16x16xf32>
    %156 = arith.truncf %155 : vector<4x16x16xf32> to vector<4x16x16xbf16>
    %157 = vector.extract_strided_slice %130 {offsets = [0, 0, 144], sizes = [4, 16, 16], strides = [1, 1, 1]} : vector<4x16x192xf32> to vector<4x16x16xf32>
    %158 = arith.truncf %157 : vector<4x16x16xf32> to vector<4x16x16xbf16>
    "tpu.trace_start"() <{level = 10 : i32, message = "bqd,bkd->bqk"}> : () -> ()
    %cst_46 = arith.constant dense<0.000000e+00> : vector<4x16x16xf32>
    %159 = tpu.matmul %154, %156, %cst_46 {dimension_numbers = #tpu.dot_dimension_numbers<[2], [2], [1], [1], [0, 0, 0, 1, 1, 1], [0], [0]>} : vector<4x16x16xbf16>, vector<4x16x16xbf16>, vector<4x16x16xf32> -> vector<4x16x16xf32>
    "tpu.trace_stop"() : () -> ()
    %cst_47 = arith.constant dense<0xFF800000> : vector<4x16xf32>
    %160 = vector.multi_reduction <maximumf>, %159, %cst_47 [2] : vector<4x16x16xf32> to vector<4x16xf32>
    %161 = vector.shape_cast %160 : vector<4x16xf32> to vector<4x16x1xf32>
    %162 = vector.broadcast %161 : vector<4x16x1xf32> to vector<4x16x16xf32>
    %163 = arith.subf %159, %162 : vector<4x16x16xf32>
    %164 = math.exp %163 : vector<4x16x16xf32>
    %cst_48 = arith.constant dense<0.000000e+00> : vector<4x16xf32>
    %165 = vector.multi_reduction <add>, %164, %cst_48 [2] : vector<4x16x16xf32> to vector<4x16xf32>
    %166 = vector.shape_cast %165 : vector<4x16xf32> to vector<4x16x1xf32>
    %167 = tpu.reciprocal %166 {approx = true} : vector<4x16x1xf32> -> vector<4x16x1xf32>
    %168 = vector.broadcast %167 : vector<4x16x1xf32> to vector<4x16x16xf32>
    %169 = arith.mulf %164, %168 : vector<4x16x16xf32>
    %170 = arith.truncf %169 : vector<4x16x16xf32> to vector<4x16x16xbf16>
    "tpu.trace_start"() <{level = 10 : i32, message = "bqk,bkd->bqd"}> : () -> ()
    %cst_49 = arith.constant dense<0.000000e+00> : vector<4x16x16xf32>
    %171 = tpu.matmul %170, %158, %cst_49 {dimension_numbers = #tpu.dot_dimension_numbers<[2], [1], [1], [2], [0, 0, 0, 1, 1, 2], [0], [0]>} : vector<4x16x16xbf16>, vector<4x16x16xbf16>, vector<4x16x16xf32> -> vector<4x16x16xf32>
    "tpu.trace_stop"() : () -> ()
    %172 = vector.shape_cast %171 : vector<4x16x16xf32> to vector<64x16xf32>
    %173 = arith.truncf %172 : vector<64x16xf32> to vector<64x16xbf16>
    %cst_50 = arith.constant dense<0.000000e+00> : vector<64x32xf32>
    %174 = tpu.matmul %173, %5, %cst_50 {dimension_numbers = #tpu.dot_dimension_numbers<[1], [0], [0], [1], [0, 0, 1, 1], [], []>} : vector<64x16xbf16>, vector<16x32xbf16>, vector<64x32xf32> -> vector<64x32xf32>
    %175 = arith.addf %152, %174 : vector<64x32xf32>
    %176 = vector.extract_strided_slice %130 {offsets = [0, 0, 32], sizes = [4, 16, 16], strides = [1, 1, 1]} : vector<4x16x192xf32> to vector<4x16x16xf32>
    %177 = arith.truncf %176 : vector<4x16x16xf32> to vector<4x16x16xbf16>
    %178 = vector.extract_strided_slice %130 {offsets = [0, 0, 96], sizes = [4, 16, 16], strides = [1, 1, 1]} : vector<4x16x192xf32> to vector<4x16x16xf32>
    %179 = arith.truncf %178 : vector<4x16x16xf32> to vector<4x16x16xbf16>
    %180 = vector.extract_strided_slice %130 {offsets = [0, 0, 160], sizes = [4, 16, 16], strides = [1, 1, 1]} : vector<4x16x192xf32> to vector<4x16x16xf32>
    %181 = arith.truncf %180 : vector<4x16x16xf32> to vector<4x16x16xbf16>
    "tpu.trace_start"() <{level = 10 : i32, message = "bqd,bkd->bqk"}> : () -> ()
    %cst_51 = arith.constant dense<0.000000e+00> : vector<4x16x16xf32>
    %182 = tpu.matmul %177, %179, %cst_51 {dimension_numbers = #tpu.dot_dimension_numbers<[2], [2], [1], [1], [0, 0, 0, 1, 1, 1], [0], [0]>} : vector<4x16x16xbf16>, vector<4x16x16xbf16>, vector<4x16x16xf32> -> vector<4x16x16xf32>
    "tpu.trace_stop"() : () -> ()
    %cst_52 = arith.constant dense<0xFF800000> : vector<4x16xf32>
    %183 = vector.multi_reduction <maximumf>, %182, %cst_52 [2] : vector<4x16x16xf32> to vector<4x16xf32>
    %184 = vector.shape_cast %183 : vector<4x16xf32> to vector<4x16x1xf32>
    %185 = vector.broadcast %184 : vector<4x16x1xf32> to vector<4x16x16xf32>
    %186 = arith.subf %182, %185 : vector<4x16x16xf32>
    %187 = math.exp %186 : vector<4x16x16xf32>
    %cst_53 = arith.constant dense<0.000000e+00> : vector<4x16xf32>
    %188 = vector.multi_reduction <add>, %187, %cst_53 [2] : vector<4x16x16xf32> to vector<4x16xf32>
    %189 = vector.shape_cast %188 : vector<4x16xf32> to vector<4x16x1xf32>
    %190 = tpu.reciprocal %189 {approx = true} : vector<4x16x1xf32> -> vector<4x16x1xf32>
    %191 = vector.broadcast %190 : vector<4x16x1xf32> to vector<4x16x16xf32>
    %192 = arith.mulf %187, %191 : vector<4x16x16xf32>
    %193 = arith.truncf %192 : vector<4x16x16xf32> to vector<4x16x16xbf16>
    "tpu.trace_start"() <{level = 10 : i32, message = "bqk,bkd->bqd"}> : () -> ()
    %cst_54 = arith.constant dense<0.000000e+00> : vector<4x16x16xf32>
    %194 = tpu.matmul %193, %181, %cst_54 {dimension_numbers = #tpu.dot_dimension_numbers<[2], [1], [1], [2], [0, 0, 0, 1, 1, 2], [0], [0]>} : vector<4x16x16xbf16>, vector<4x16x16xbf16>, vector<4x16x16xf32> -> vector<4x16x16xf32>
    "tpu.trace_stop"() : () -> ()
    %195 = vector.shape_cast %194 : vector<4x16x16xf32> to vector<64x16xf32>
    %196 = arith.truncf %195 : vector<64x16xf32> to vector<64x16xbf16>
    %cst_55 = arith.constant dense<0.000000e+00> : vector<64x32xf32>
    %197 = tpu.matmul %196, %6, %cst_55 {dimension_numbers = #tpu.dot_dimension_numbers<[1], [0], [0], [1], [0, 0, 1, 1], [], []>} : vector<64x16xbf16>, vector<16x32xbf16>, vector<64x32xf32> -> vector<64x32xf32>
    %198 = arith.addf %175, %197 : vector<64x32xf32>
    %199 = vector.extract_strided_slice %130 {offsets = [0, 0, 48], sizes = [4, 16, 16], strides = [1, 1, 1]} : vector<4x16x192xf32> to vector<4x16x16xf32>
    %200 = arith.truncf %199 : vector<4x16x16xf32> to vector<4x16x16xbf16>
    %201 = vector.extract_strided_slice %130 {offsets = [0, 0, 112], sizes = [4, 16, 16], strides = [1, 1, 1]} : vector<4x16x192xf32> to vector<4x16x16xf32>
    %202 = arith.truncf %201 : vector<4x16x16xf32> to vector<4x16x16xbf16>
    %203 = vector.extract_strided_slice %130 {offsets = [0, 0, 176], sizes = [4, 16, 16], strides = [1, 1, 1]} : vector<4x16x192xf32> to vector<4x16x16xf32>
    %204 = arith.truncf %203 : vector<4x16x16xf32> to vector<4x16x16xbf16>
    "tpu.trace_start"() <{level = 10 : i32, message = "bqd,bkd->bqk"}> : () -> ()
    %cst_56 = arith.constant dense<0.000000e+00> : vector<4x16x16xf32>
    %205 = tpu.matmul %200, %202, %cst_56 {dimension_numbers = #tpu.dot_dimension_numbers<[2], [2], [1], [1], [0, 0, 0, 1, 1, 1], [0], [0]>} : vector<4x16x16xbf16>, vector<4x16x16xbf16>, vector<4x16x16xf32> -> vector<4x16x16xf32>
    "tpu.trace_stop"() : () -> ()
    %cst_57 = arith.constant dense<0xFF800000> : vector<4x16xf32>
    %206 = vector.multi_reduction <maximumf>, %205, %cst_57 [2] : vector<4x16x16xf32> to vector<4x16xf32>
    %207 = vector.shape_cast %206 : vector<4x16xf32> to vector<4x16x1xf32>
    %208 = vector.broadcast %207 : vector<4x16x1xf32> to vector<4x16x16xf32>
    %209 = arith.subf %205, %208 : vector<4x16x16xf32>
    %210 = math.exp %209 : vector<4x16x16xf32>
    %cst_58 = arith.constant dense<0.000000e+00> : vector<4x16xf32>
    %211 = vector.multi_reduction <add>, %210, %cst_58 [2] : vector<4x16x16xf32> to vector<4x16xf32>
    %212 = vector.shape_cast %211 : vector<4x16xf32> to vector<4x16x1xf32>
    %213 = tpu.reciprocal %212 {approx = true} : vector<4x16x1xf32> -> vector<4x16x1xf32>
    %214 = vector.broadcast %213 : vector<4x16x1xf32> to vector<4x16x16xf32>
    %215 = arith.mulf %210, %214 : vector<4x16x16xf32>
    %216 = arith.truncf %215 : vector<4x16x16xf32> to vector<4x16x16xbf16>
    "tpu.trace_start"() <{level = 10 : i32, message = "bqk,bkd->bqd"}> : () -> ()
    %cst_59 = arith.constant dense<0.000000e+00> : vector<4x16x16xf32>
    %217 = tpu.matmul %216, %204, %cst_59 {dimension_numbers = #tpu.dot_dimension_numbers<[2], [1], [1], [2], [0, 0, 0, 1, 1, 2], [0], [0]>} : vector<4x16x16xbf16>, vector<4x16x16xbf16>, vector<4x16x16xf32> -> vector<4x16x16xf32>
    "tpu.trace_stop"() : () -> ()
    %218 = vector.shape_cast %217 : vector<4x16x16xf32> to vector<64x16xf32>
    %219 = arith.truncf %218 : vector<64x16xf32> to vector<64x16xbf16>
    %cst_60 = arith.constant dense<0.000000e+00> : vector<64x32xf32>
    %220 = tpu.matmul %219, %7, %cst_60 {dimension_numbers = #tpu.dot_dimension_numbers<[1], [0], [0], [1], [0, 0, 1, 1], [], []>} : vector<64x16xbf16>, vector<16x32xbf16>, vector<64x32xf32> -> vector<64x32xf32>
    %221 = arith.addf %198, %220 : vector<64x32xf32>
    %222 = arith.addf %126, %221 : vector<64x32xf32>
    %223 = arith.addf %222, %13 : vector<64x32xf32>
    %224 = arith.truncf %223 : vector<64x32xf32> to vector<64x32xbf16>
    %cst_61 = arith.constant dense<0.000000e+00> : vector<64x64xf32>
    %225 = tpu.matmul %224, %2, %cst_61 {dimension_numbers = #tpu.dot_dimension_numbers<[1], [0], [0], [1], [0, 0, 1, 1], [], []>} : vector<64x32xbf16>, vector<32x64xbf16>, vector<64x64xf32> -> vector<64x64xf32>
    %226 = arith.addf %225, %16 : vector<64x64xf32>
    %cst_62 = arith.constant 0.000000e+00 : f32
    %227 = vector.broadcast %cst_62 : f32 to vector<64x64xf32>
    %228 = arith.maximumf %226, %227 : vector<64x64xf32>
    %229 = arith.truncf %228 : vector<64x64xf32> to vector<64x64xbf16>
    %cst_63 = arith.constant dense<0.000000e+00> : vector<64x32xf32>
    %230 = tpu.matmul %229, %3, %cst_63 {dimension_numbers = #tpu.dot_dimension_numbers<[1], [0], [0], [1], [0, 0, 1, 1], [], []>} : vector<64x64xbf16>, vector<64x32xbf16>, vector<64x32xf32> -> vector<64x32xf32>
    %231 = arith.addf %230, %19 : vector<64x32xf32>
    %232 = arith.addf %223, %231 : vector<64x32xf32>
    %c0_64 = arith.constant 0 : index
    %c0_65 = arith.constant 0 : index
    %233 = vector.load %arg10[%c0_64, %c0_65] : memref<64x32xf32, #tpu.memory_space<vmem>>, vector<64x32xf32>
    tpu.vector_store %arg10[%c0_64, %c0_65], %232 {strides = array<i32>} : memref<64x32xf32, #tpu.memory_space<vmem>>, vector<64x32xf32>,
    return
  }
  func.func @transform_0(%arg0: i32) -> (i32, i32) {
    %c0_i32 = arith.constant 0 : i32
    %c0_i32_0 = arith.constant 0 : i32
    return %arg0, %c0_i32 : i32, i32
  }
  func.func @transform_1(%arg0: i32) -> (i32, i32) {
    %c0_i32 = arith.constant 0 : i32
    %c0_i32_0 = arith.constant 0 : i32
    %c0_i32_1 = arith.constant 0 : i32
    return %c0_i32, %c0_i32_0 : i32, i32
  }
  func.func @transform_2(%arg0: i32) -> (i32, i32) {
    %c0_i32 = arith.constant 0 : i32
    %c0_i32_0 = arith.constant 0 : i32
    %c0_i32_1 = arith.constant 0 : i32
    return %c0_i32, %c0_i32_0 : i32, i32
  }
  func.func @transform_3(%arg0: i32) -> (i32, i32) {
    %c0_i32 = arith.constant 0 : i32
    %c0_i32_0 = arith.constant 0 : i32
    %c0_i32_1 = arith.constant 0 : i32
    return %c0_i32, %c0_i32_0 : i32, i32
  }
  func.func @transform_4(%arg0: i32) -> (i32, i32) {
    %c0_i32 = arith.constant 0 : i32
    %c0_i32_0 = arith.constant 0 : i32
    %c0_i32_1 = arith.constant 0 : i32
    return %c0_i32, %c0_i32_0 : i32, i32
  }
  func.func @transform_5(%arg0: i32) -> (i32, i32) {
    %c0_i32 = arith.constant 0 : i32
    %c0_i32_0 = arith.constant 0 : i32
    %c0_i32_1 = arith.constant 0 : i32
    return %c0_i32, %c0_i32_0 : i32, i32
  }
  func.func @transform_6(%arg0: i32) -> (i32, i32) {
    %c0_i32 = arith.constant 0 : i32
    %c0_i32_0 = arith.constant 0 : i32
    %c0_i32_1 = arith.constant 0 : i32
    return %c0_i32, %c0_i32_0 : i32, i32
  }
  func.func @transform_7(%arg0: i32) -> (i32, i32) {
    %c0_i32 = arith.constant 0 : i32
    %c0_i32_0 = arith.constant 0 : i32
    %c0_i32_1 = arith.constant 0 : i32
    return %c0_i32, %c0_i32_0 : i32, i32
  }
  func.func @transform_8(%arg0: i32) -> (i32, i32) {
    %c0_i32 = arith.constant 0 : i32
    %c0_i32_0 = arith.constant 0 : i32
    %c0_i32_1 = arith.constant 0 : i32
    return %c0_i32, %c0_i32_0 : i32, i32
  }
  func.func @transform_9(%arg0: i32) -> (i32, i32) {
    %c0_i32 = arith.constant 0 : i32
    %c0_i32_0 = arith.constant 0 : i32
    return %arg0, %c0_i32 : i32, i32
  }
}

</mosaic_0001>

<bundles_post_ra>
// kernel: tpu_custom_call.1
= control target key start
LH: loop header
LB: loop body
LE: loop exit
PB: predicated region body
PF: predicated region fallthrough
CT: control target
= control target key end

     0   :  { %s9164_s0 = inlined_call_operand.hbm [shape: f32[128,32], index: 0, kind: input, shape index: {}]   ;;  %s9165_s1 = inlined_call_operand.hbm [shape: bf16[32,192], index: 1, kind: input, shape index: {}]   ;;  %s9166_s2 = inlined_call_operand.hbm [shape: f32[1,192], index: 2, kind: input, shape index: {}]   ;;  %s9167_s3 = inlined_call_operand.hbm [shape: bf16[64,32], index: 3, kind: input, shape index: {}]   ;;  %s9168_s4 = inlined_call_operand.hbm [shape: f32[1,32], index: 4, kind: input, shape index: {}]   ;;  %s9169_s5 = inlined_call_operand.hbm [shape: bf16[32,64], index: 5, kind: input, shape index: {}]   ;;  %s9170_s6 = inlined_call_operand.hbm [shape: f32[1,64], index: 6, kind: input, shape index: {}]   ;;  %s9171_s7 = inlined_call_operand.hbm [shape: bf16[64,32], index: 7, kind: input, shape index: {}]   ;;  %s9172_s8 = inlined_call_operand.hbm [shape: f32[1,32], index: 8, kind: input, shape index: {}]   ;;  %s9173_s9 = inlined_call_operand.hbm [shape: f32[128,32], index: 9, kind: output, shape index: {}]  }
   0x1   :  { %9180 = sst [smem:[#allocation24_spill]] %s9165_s1 }
   0x2   :  { %9181 = sst [smem:[#allocation25_spill]] %s9173_s9 }
   0x3   :  { %14 = vsyncpa [#allocation3], 0 }
   0x4   :  { %16 = vsyncpa [#allocation3 + $0x1], 0 }
   0x5   :  { %17 = vsyncpa [#allocation6], 0 }
   0x6   :  { %18 = vsyncpa [#allocation9], 0 }
   0x7   :  { %19 = vsyncpa [#allocation12], 0 }
   0x8   :  { %20 = vsyncpa [#allocation15], 0 }
   0x9   :  { %21 = vsyncpa [#allocation4], 0 }
   0xa   :  { %23 = vsyncpa [#allocation4 + $0x1], 0  ;;  %s7682_s30 = smov 0   ;;  %s7684_s10 = smov 0  }
   0xb   :  { %s7686_s11 = smov 0   ;;  %s7688_s12 = smov 0  }
   0xc LB: > { %s7606_s13 = smov [#allocation5]   ;;  %s7703_s15 = sadd.s32 4294967295, %s7604_s12   ;;  %s7604_s12 = sphi %s7688_s12, %s9210_s12   ;;  %s7600_s11 = sphi %s7686_s11, %s9209_s11   ;;  %s7596_s10 = sphi %s7684_s10, %s9208_s10   ;;  %s7592_s30 = sphi %s7682_s30, %s9207_s30  }
   0xd   : > { %s266_s14 = sshll.u32 %s7606_s13, 4  ;;  %p5892_p0 = scmp.ge.s32.totalorder %s7604_s12, 1  ;;  %s7708_s14 = int_to_ptr.vmem [resolvable:$true] %s266_s14 }
   0xe   : > { %p9176_p1 = scmp.eq.s32.totalorder %s7703_s15, 0  ;;  %p254_p2 = scmp.lt.s32.totalorder %s7604_s12, 3 }
   0xf   : > { %s7607_s17 = smov [#allocation8]   ;;  %s7608_s20 = smov [#allocation11]  }
  0x10   : > { %p7710_p3 = pnand %p5892_p0, %p254_p2  ;;  %s290_s18 = sshll.u32 %s7607_s17, 4  ;;  %s7723_s18 = int_to_ptr.vmem [resolvable:$true] %s290_s18 }
  0x11   : > { %s7725_s21 = sshll.u32 %s7608_s20, 4  ;;  %s9184_s1 = sld [smem:[#allocation24_spill]]  ;;  %s315_s21 = int_to_ptr.vmem [resolvable:$true] %s7725_s21 }
  0x12   : > { %s9182_s16 = scalar_select %p7710_p3, 1, 0 }
  0x13   : > { %p6864_p5 = pneg %p7710_p3 }
  0x15   : > { %p7719_p6 = pnand %p6864_p5, %p9176_p1 }
  0x17   : > { %s7268_s24 = scalar_lea.hbm %s9184_s1, 512  ;;  %p7735_p8 = pneg %p7719_p6 }
  0x18   : > { %p7269_p7 = scmp.ne.s32.totalorder %s9184_s1, %s7268_s24  ;;  %p7275_p11 = scmp.lt.u32.totalorder %s7268_s24, %s9184_s1 }
  0x1a   : > { %p7271_p9 = pnand %p7735_p8, %p7269_p7 }
  0x1c   : > { %p7272_p10 = pneg %p7271_p9 }
  0x1e   : > { %p7277_p12 = pnand %p7275_p11, %p7272_p10 }
  0x20   : > { %7280 = shalt.err (!%p7277_p12)
}
  0x21   : > { %s7281_s13 = scalar_lea.vmem %s7708_s14, 512  ;;  %p7289_p5 = scmp.lt.s32.totalorder %s7708_s14, %s7708_s14 }
  0x22   : > { %p7282_p13 = scmp.ne.s32.totalorder %s7708_s14, %s7281_s13  ;;  %p7290_p4 = scmp.lt.s32.totalorder %s7281_s13, %s7281_s13 }
  0x24   : > { %p7284_p0 = pnand %p7282_p13, %p7735_p8  ;;  %p7291_p7 = por %p7290_p4, %p7289_p5 }
  0x26   : > { %p7285_p2 = pneg %p7284_p0 }
  0x28   : > { %p7292_p9 = pnand %p7291_p7, %p7285_p2 }
  0x2a   : > { %7295 = shalt.err (!%p7292_p9)
}
  0x2b   : > { %s9175_s17 = smov 128   ;;  %s9178_s20 = smov 8  }
  0x2c   : > { %6867 = dma.hbm_to_vmem [thread:$0]  (!%p7719_p6), %s9184_s1, 512, %s7708_s14, [#allocation6], %s9175_s17, %s9175_s17, %s9178_s20  }
  0x2d   : > { %s7296_s26 = scalar_lea.hbm %s9167_s3, 512 }
  0x2e   : > { %p7297_p4 = scmp.ne.s32.totalorder %s9167_s3, %s7296_s26  ;;  %p7303_p12 = scmp.lt.u32.totalorder %s7296_s26, %s9167_s3 }
  0x30   : > { %p7299_p10 = pnand %p7297_p4, %p7735_p8 }
  0x32   : > { %p7300_p11 = pneg %p7299_p10 }
  0x34   : > { %p7305_p13 = pnand %p7303_p12, %p7300_p11 }
  0x36   : > { %7308 = shalt.err (!%p7305_p13)
}
  0x37   : > { %s7309_s14 = scalar_lea.vmem %s7723_s18, 512  ;;  %p7317_p7 = scmp.lt.s32.totalorder %s7723_s18, %s7723_s18 }
  0x38   : > { %p7310_p0 = scmp.ne.s32.totalorder %s7723_s18, %s7309_s14  ;;  %p7318_p9 = scmp.lt.s32.totalorder %s7309_s14, %s7309_s14 }
  0x3a   : > { %p7312_p2 = pnand %p7310_p0, %p7735_p8  ;;  %p7319_p4 = por %p7318_p9, %p7317_p7 }
  0x3c   : > { %p7313_p5 = pneg %p7312_p2 }
  0x3e   : > { %p7320_p10 = pnand %p7319_p4, %p7313_p5 }
  0x40   : > { %7323 = shalt.err (!%p7320_p10)
}
  0x41   : > { %s7611_s22 = smov 64   ;;  %s7612_s9 = smov 4  }
  0x42   : > { %6873 = dma.hbm_to_vmem [thread:$0]  (!%p7719_p6), %s9167_s3, 512, %s7723_s18, [#allocation9], %s7611_s22, %s7611_s22, %s7612_s9  }
  0x43   : > { %s7324_s28 = scalar_lea.hbm %s9169_s5, 256 }
  0x44   : > { %p7325_p11 = scmp.ne.s32.totalorder %s9169_s5, %s7324_s28  ;;  %p7331_p0 = scmp.lt.u32.totalorder %s7324_s28, %s9169_s5 }
  0x46   : > { %p7327_p12 = pnand %p7325_p11, %p7735_p8 }
  0x48   : > { %p7328_p13 = pneg %p7327_p12 }
  0x4a   : > { %p7333_p2 = pnand %p7331_p0, %p7328_p13 }
  0x4c   : > { %7336 = shalt.err (!%p7333_p2)
}
  0x4d   : > { %s7337_s23 = scalar_lea.vmem %s315_s21, 256  ;;  %p7345_p4 = scmp.lt.s32.totalorder %s315_s21, %s315_s21 }
  0x4e   : > { %p7338_p5 = scmp.ne.s32.totalorder %s315_s21, %s7337_s23  ;;  %p7346_p10 = scmp.lt.s32.totalorder %s7337_s23, %s7337_s23 }
  0x50   : > { %p7340_p7 = pnand %p7338_p5, %p7735_p8  ;;  %p7347_p1 = por %p7346_p10, %p7345_p4 }
  0x52   : > { %p7341_p9 = pneg %p7340_p7 }
  0x54   : > { %p7348_p3 = pnand %p7347_p1, %p7341_p9 }
  0x56   : > { %7351 = shalt.err (!%p7348_p3)
}
  0x57   : > { %6879 = dma.hbm_to_vmem [thread:$0]  (!%p7719_p6), %s9169_s5, 256, %s315_s21, [#allocation12], %s7611_s22, %s7611_s22, %s7612_s9  }
  0x58   : > { %s7613_s24 = smov [#allocation14]   ;;  %s7614_s26 = smov [#allocation7]  }
  0x59   : > { %s338_s25 = sshll.u32 %s7613_s24, 4  ;;  %s280_s28 = sshll.u32 %s7614_s26, 4  ;;  %s339_s25 = int_to_ptr.vmem [resolvable:$true] %s338_s25  ;;  %s281_s28 = int_to_ptr.vmem [resolvable:$true] %s280_s28 }
  0x5a   : > { %s7352_s14 = scalar_lea.hbm %s9171_s7, 512 }
  0x5b   : > { %p7353_p1 = scmp.ne.s32.totalorder %s9171_s7, %s7352_s14  ;;  %p7359_p12 = scmp.lt.u32.totalorder %s7352_s14, %s9171_s7 }
  0x5d   : > { %p7355_p3 = pnand %p7353_p1, %p7735_p8 }
  0x5f   : > { %p7356_p11 = pneg %p7355_p3 }
  0x61   : > { %p7361_p13 = pnand %p7359_p12, %p7356_p11 }
  0x63   : > { %7364 = shalt.err (!%p7361_p13)
}
  0x64   : > { %s7365_s21 = scalar_lea.vmem %s339_s25, 512  ;;  %p7373_p7 = scmp.lt.s32.totalorder %s339_s25, %s339_s25 }
  0x65   : > { %p7366_p0 = scmp.ne.s32.totalorder %s339_s25, %s7365_s21  ;;  %p7374_p9 = scmp.lt.s32.totalorder %s7365_s21, %s7365_s21 }
  0x67   : > { %p7368_p2 = pnand %p7366_p0, %p7735_p8  ;;  %p7375_p4 = por %p7374_p9, %p7373_p7 }
  0x69   : > { %p7369_p5 = pneg %p7368_p2 }
  0x6b   : > { %p7376_p10 = pnand %p7375_p4, %p7369_p5 }
  0x6d   : > { %7379 = shalt.err (!%p7376_p10)
}
  0x6e   : > { %6885 = dma.hbm_to_vmem [thread:$0]  (!%p7719_p6), %s9171_s7, 512, %s339_s25, [#allocation15], %s7611_s22, %s7611_s22, %s7612_s9  }
  0x6f   : > { %s7380_s26 = scalar_lea.hbm %s9166_s2, 32 }
  0x70   : > { %p7381_p1 = scmp.ne.s32.totalorder %s9166_s2, %s7380_s26  ;;  %p7387_p12 = scmp.lt.u32.totalorder %s7380_s26, %s9166_s2 }
  0x72   : > { %p7383_p3 = pnand %p7381_p1, %p7735_p8 }
  0x74   : > { %p7384_p11 = pneg %p7383_p3 }
  0x76   : > { %p7389_p13 = pnand %p7387_p12, %p7384_p11 }
  0x78   : > { %7392 = shalt.err (!%p7389_p13)
}
  0x79   : > { %s7393_s18 = scalar_lea.vmem %s281_s28, 32  ;;  %p7401_p7 = scmp.lt.s32.totalorder %s281_s28, %s281_s28 }
  0x7a   : > { %p7394_p0 = scmp.ne.s32.totalorder %s281_s28, %s7393_s18  ;;  %p7402_p9 = scmp.lt.s32.totalorder %s7393_s18, %s7393_s18 }
  0x7c   : > { %p7396_p2 = pnand %p7394_p0, %p7735_p8  ;;  %p7403_p4 = por %p7402_p9, %p7401_p7 }
  0x7e   : > { %p7397_p5 = pneg %p7396_p2 }
  0x80   : > { %p7404_p10 = pnand %p7403_p4, %p7397_p5 }
  0x82   : > { %7407 = shalt.err (!%p7404_p10)
}
  0x83   : > { %6870 = dma.hbm_to_vmem [thread:$0]  (!%p7719_p6), %s9166_s2, 32, %s281_s28, [#allocation6]  }
  0x84   : > { %s7615_s25 = smov [#allocation10]   ;;  %s7616_s1 = smov [#allocation13]  }
  0x85   : > { %s304_s21 = sshll.u32 %s7615_s25, 4  ;;  %s328_s20 = sshll.u32 %s7616_s1, 4  ;;  %s305_s21 = int_to_ptr.vmem [resolvable:$true] %s304_s21  ;;  %s329_s20 = int_to_ptr.vmem [resolvable:$true] %s328_s20 }
  0x86   : > { %s7408_s26 = scalar_lea.hbm %s9168_s4, 16 }
  0x87   : > { %p7409_p1 = scmp.ne.s32.totalorder %s9168_s4, %s7408_s26  ;;  %p7415_p12 = scmp.lt.u32.totalorder %s7408_s26, %s9168_s4 }
  0x89   : > { %p7411_p3 = pnand %p7409_p1, %p7735_p8 }
  0x8b   : > { %p7412_p11 = pneg %p7411_p3 }
  0x8d   : > { %p7417_p13 = pnand %p7415_p12, %p7412_p11 }
  0x8f   : > { %7420 = shalt.err (!%p7417_p13)
}
  0x90   : > { %s7421_s28 = scalar_lea.vmem %s305_s21, 16  ;;  %s7428_s18 = scalar_lea.vmem %s305_s21, 32 }
  0x91   : > { %p7422_p0 = scmp.ne.s32.totalorder %s305_s21, %s7421_s28  ;;  %p7429_p7 = scmp.lt.s32.totalorder %s305_s21, %s305_s21 }
  0x92   : > { %p7430_p9 = scmp.lt.s32.totalorder %s7428_s18, %s7421_s28 }
  0x93   : > { %p7424_p2 = pnand %p7422_p0, %p7735_p8 }
  0x94   : > { %p7431_p4 = por %p7430_p9, %p7429_p7 }
  0x95   : > { %p7425_p5 = pneg %p7424_p2 }
  0x97   : > { %p7432_p10 = pnand %p7431_p4, %p7425_p5 }
  0x99   : > { %7435 = shalt.err (!%p7432_p10)
}
  0x9a   : > { %6876 = dma.hbm_to_vmem [thread:$0]  (!%p7719_p6), %s9168_s4, 16, %s305_s21, [#allocation9]  }
  0x9b   : > { %s7436_s17 = scalar_lea.hbm %s9170_s6, 16 }
  0x9c   : > { %p7437_p1 = scmp.ne.s32.totalorder %s9170_s6, %s7436_s17  ;;  %p7443_p12 = scmp.lt.u32.totalorder %s7436_s17, %s9170_s6 }
  0x9e   : > { %p7439_p3 = pnand %p7437_p1, %p7735_p8 }
  0xa0   : > { %p7440_p11 = pneg %p7439_p3 }
  0xa2   : > { %p7445_p13 = pnand %p7443_p12, %p7440_p11 }
  0xa4   : > { %7448 = shalt.err (!%p7445_p13)
}
  0xa5   : > { %s7449_s14 = scalar_lea.vmem %s329_s20, 16  ;;  %s7456_s21 = scalar_lea.vmem %s329_s20, 32 }
  0xa6   : > { %p7450_p0 = scmp.ne.s32.totalorder %s329_s20, %s7449_s14  ;;  %p7457_p7 = scmp.lt.s32.totalorder %s329_s20, %s329_s20 }
  0xa7   : > { %p7458_p9 = scmp.lt.s32.totalorder %s7456_s21, %s7449_s14 }
  0xa8   : > { %p7452_p2 = pnand %p7450_p0, %p7735_p8 }
  0xa9   : > { %p7459_p4 = por %p7458_p9, %p7457_p7 }
  0xaa   : > { %p7453_p5 = pneg %p7452_p2 }
  0xac   : > { %p7460_p10 = pnand %p7459_p4, %p7453_p5 }
  0xae   : > { %7463 = shalt.err (!%p7460_p10)
}
  0xaf   : > { %6882 = dma.hbm_to_vmem [thread:$0]  (!%p7719_p6), %s9170_s6, 16, %s329_s20, [#allocation12]  }
  0xb0   : > { %s7617_s18 = smov [#allocation16]   ;;  %s7464_s1 = scalar_lea.hbm %s9172_s8, 16 }
  0xb1   : > { %s352_s22 = sshll.u32 %s7617_s18, 4  ;;  %p7465_p1 = scmp.ne.s32.totalorder %s9172_s8, %s7464_s1  ;;  %s353_s22 = int_to_ptr.vmem [resolvable:$true] %s352_s22 }
  0xb2   : > { %p7471_p12 = scmp.lt.u32.totalorder %s7464_s1, %s9172_s8 }
  0xb3   : > { %p7467_p3 = pnand %p7465_p1, %p7735_p8 }
  0xb5   : > { %p7468_p11 = pneg %p7467_p3 }
  0xb7   : > { %p7473_p13 = pnand %p7471_p12, %p7468_p11 }
  0xb9   : > { %7476 = shalt.err (!%p7473_p13)
}
  0xba   : > { %s7477_s20 = scalar_lea.vmem %s353_s22, 16  ;;  %s7484_s13 = scalar_lea.vmem %s353_s22, 32 }
  0xbb   : > { %p7478_p0 = scmp.ne.s32.totalorder %s353_s22, %s7477_s20  ;;  %p7485_p7 = scmp.lt.s32.totalorder %s353_s22, %s353_s22 }
  0xbc   : > { %p7486_p9 = scmp.lt.s32.totalorder %s7484_s13, %s7477_s20 }
  0xbd   : > { %p7480_p2 = pnand %p7478_p0, %p7735_p8 }
  0xbe   : > { %p7487_p4 = por %p7486_p9, %p7485_p7 }
  0xbf   : > { %p7481_p5 = pneg %p7480_p2 }
  0xc1   : > { %p7488_p10 = pnand %p7487_p4, %p7481_p5 }
  0xc3   : > { %7491 = shalt.err (!%p7488_p10)
}
  0xc4   : > { %6888 = dma.hbm_to_vmem [thread:$0]  (!%p7719_p6), %s9172_s8, 16, %s353_s22, [#allocation15]  }
  0xc5   : > { %s5891_s27 = sadd.s32 4294967294, %s7604_s12   ;;  %s7902_s19 = sadd.s32 1, %s7604_s12  }
  0xc6   : > { %s33_s23 = ssub.s32 %s7604_s12, %s7902_s19  ;;  %s36_s28 = sadd.s32 1, %s7600_s11 }
  0xc7   : > { %p34_p8 = scmp.eq.s32.totalorder %s33_s23, 0  ;;  %p43_p1 = scmp.ne.s32.totalorder %s7600_s11, %s7596_s10 }
  0xc8   : > { %p44_p3 = scmp.eq.s32.totalorder %s7604_s12, 0  ;;  %p49_p11 = scmp.ne.s32.totalorder %s7596_s10, %s7592_s30 }
  0xc9   : > { %s7913_s18 = scalar_select %p34_p8, %s7600_s11, %s36_s28  }
  0xca   : > { %p7915_p12 = por %p44_p3, %p43_p1  ;;  %p9187_p13 = scmp.eq.s32.totalorder %s7703_s15, 0 }
  0xcb   : > { %p241_p0 = scmp.eq.s32.totalorder %s7703_s15, 1  ;;  %p247_p2 = scmp.eq.s32.totalorder %s5891_s27, 1 }
  0xcc   : > { %p7921_p6 = por %p9187_p13, %p49_p11  ;;  %p6905_p5 = scmp.lt.s32.totalorder %s7604_s12, 2 }
  0xcd   : > { %s363_s25 = sand.u32 1, %s7600_s11   ;;  %p7928_p7 = por %p241_p0, %p43_p1 }
  0xce   : > { %p7932_p9 = por %p247_p2, %p49_p11  ;;  %s5902_s24 = sshll.u32 %s363_s25, 6 }
  0xcf   : > { %s9189_s1 = scalar_select %p7928_p7, 1, 0 }
  0xd0   : > { %s9190_s17 = scalar_select %p7932_p9, 1, 0 }
  0xd1   : > { %s6058_s26 = sshll.u32 %s7604_s12, 10  ;;  %s367_s14 = scalar_lea.vmem [#allocation2], %s5902_s24 }
  0xd2   : > { %s7940_s13 = scalar_lea.hbm %s9164_s0, %s6058_s26  ;;  %s374_s21 = sshll.u32 %s367_s14, 4  ;;  %s7942_s21 = int_to_ptr.vmem [resolvable:$true] %s374_s21 }
  0xd3   : > { %p7946_p4 = pnand %p6905_p5, %p7915_p12  ;;  %s7950_s23 = scalar_lea.sflag [#allocation3], %s363_s25 }
  0xd4   : > { %s7492_s28 = scalar_lea.hbm %s7940_s13, 1024  ;;  %s7497_s9 = scalar_lea.hbm %s9164_s0, 2048 }
  0xd5   : > { %p7493_p10 = scmp.ne.s32.totalorder %s7940_s13, %s7492_s28  ;;  %p7494_p8 = pneg %p7946_p4 }
  0xd6   : > { %p7498_p11 = scmp.lt.u32.totalorder %s7940_s13, %s9164_s0  ;;  %p7499_p12 = scmp.lt.u32.totalorder %s7497_s9, %s7492_s28 }
  0xd7   : > { %p7495_p1 = pnand %p7494_p8, %p7493_p10  ;;  %p7501_p0 = scmp.lt.u32.totalorder %s7492_s28, %s7940_s13 }
  0xd8   : > { %p7500_p13 = por %p7499_p12, %p7498_p11 }
  0xd9   : > { %p7496_p3 = pneg %p7495_p1 }
  0xda   : > { %p7502_p2 = por %p7501_p0, %p7500_p13 }
  0xdc   : > { %p7503_p5 = pnand %p7502_p2, %p7496_p3 }
  0xde   : > { %7506 = shalt.err (!%p7503_p5)
}
  0xdf   : > { %s7507_s25 = scalar_lea.vmem %s7942_s21, 1024  ;;  %s7618_s14 = smov [#allocation2]  }
  0xe0   : > { %p7508_p10 = scmp.ne.s32.totalorder %s7942_s21, %s7507_s25  ;;  %s7512_s24 = sshll.u32 %s7618_s14, 4  ;;  %s7513_s24 = int_to_ptr.vmem [resolvable:$false] %s7512_s24 }
  0xe1   : > { %s7514_s26 = scalar_lea.vmem %s7513_s24, 2048  ;;  %p7515_p7 = scmp.lt.s32.totalorder %s7942_s21, %s7513_s24 }
  0xe2   : > { %p7510_p1 = pnand %p7508_p10, %p7494_p8  ;;  %p7516_p11 = scmp.lt.s32.totalorder %s7514_s26, %s7507_s25 }
  0xe4   : > { %p7511_p9 = pneg %p7510_p1  ;;  %p7517_p12 = por %p7516_p11, %p7515_p7 }
  0xe6   : > { %p7518_p13 = pnand %p7517_p12, %p7511_p9 }
  0xe8   : > { %7521 = shalt.err (!%p7518_p13)
}
  0xe9   : > { %s9192_s28 = smov 8   ;;  %s9193_s9 = smov 128  }
  0xea   : > { %6892 = dma.hbm_to_vmem [thread:$0]  (!%p7946_p4), %s7940_s13, 1024, %s7942_s21, %s7950_s23, %s9193_s9, %s9193_s9, %s9192_s28  }
  0xeb   : > { %p9194_p8 = scmp.ne.s32.totalorder %s9182_s16, 0 }
  0xec   : > { %s7984_s29 = sand.u32 (!%p9194_p8), 1, %s7596_s10  }
  0xed   : > { %386 = sbr.rel (%p9194_p8) target bundleno = 7661 (0x1ded), region = 56  ;;  %s5906_s20 = sshll.u32 (!%p9194_p8), %s7984_s29, 6 }
  0xee   : > { %s389_s25 = scalar_lea.sflag (!%p9194_p8), [#allocation3], %s7984_s29  ;;  %s7990_s27 = scalar_lea.vmem (!%p9194_p8), [#allocation2], %s5906_s20 }
  0xf4   : > { %7567 = dma.done.wait (%p7921_p6), %s389_s25, 1024  }
  0xf5   : > { %7569 = vsyncadd (%p7921_p6), %s389_s25, 4294966272  ;;  %p9195_p7 = scmp.eq.s32.totalorder %s7703_s15, 0 }
  0xf7   : > { %7571 = dma.done.wait (%p9195_p7), [#allocation6], 544   ;;  %p9196_p9 = pmov %p9195_p7 }
  0xf8   : > { %p9197_p4 = pmov %p9195_p7 }
  0xf9   : > { %7573 = vsyncadd (%p9196_p9), [#allocation6], 4294966752 }
  0xfa   : > { %7575 = dma.done.wait (%p9197_p4), [#allocation9], 528   ;;  %p9198_p3 = pmov %p9197_p4 }
  0xfc   : > { %7577 = vsyncadd (%p9198_p3), [#allocation9], 4294966768  ;;  %p9199_p0 = pmov %p9198_p3 }
  0xfe   : > { %7579 = dma.done.wait (%p9199_p0), [#allocation12], 272   ;;  %p9200_p2 = pmov %p9199_p0 }
  0xff   : > { %p9201_p6 = pmov %p9199_p0 }
 0x100   : > { %7581 = vsyncadd (%p9200_p2), [#allocation12], 4294967024 }
 0x101   : > { %7583 = dma.done.wait (%p9201_p6), [#allocation15], 528   ;;  %p9202_p5 = pmov %p9199_p0 }
 0x102   : > { %v7619_v0 = vmov 0   ;;  %v6971_v1 = vld [vmem:[#allocation5 + $0x4] ss:$8 sps:$4 sm:$0xff]   ;;  %v6973_v2 = vld [vmem:[#allocation5] ss:$8 sps:$4 sm:$0xff]   ;;  %v525_v7 = vld [vmem:[%s7990_s27 + $0x30] sm:$0xff]  ;;  %v488_v18 = vlaneseq }
 0x103   : > { %7585 = vsyncadd (%p9202_p5), [#allocation15], 4294966768  ;;  %596 = vmatprep.mubr.bf16.mxu0 %v7619_v0  ;;  %626 = vmatprep.mubr.bf16.mxu1 %v7619_v0  ;;  %v6974_v3 = vld [vmem:[#allocation5 + $0x14] ss:$8 sps:$4 sm:$0xff]   ;;  %v6976_v4 = vld [vmem:[#allocation5 + $0x10] ss:$8 sps:$4 sm:$0xff]  }
 0x104   : > { %564 = vmatprep.subr.bf16.mxu0 %v6971_v1  ;;  %6776 = vmatprep.subr.bf16.mxu1 %v6971_v1  ;;  %v519_v5 = vld [vmem:[%s7990_s27] sm:$0xff]  ;;  %v520_v6 = vld [vmem:[%s7990_s27 + $0x8] sm:$0xff]  ;;  %vm551_vm0 = vcmask 261120   ;;  %v526_v8 = vld [vmem:[%s7990_s27 + $0x38] sm:$0xff]  ;;  %v7620_v17 = vmov 0.0   ;;  %v489_v19 = vshrl.u32 %v488_v18, 7 }
 0x105   : > { %565 = vmatpush1.bf16.msra.mxu0 %v6973_v2  ;;  %6778 = vmatpush1.bf16.msra.mxu1 %v6973_v2  ;;  %v527_v9 = vpack.c.bf16 %v520_v6, %v519_v5  ;;  %v530_v10 = vpack.c.bf16 %v526_v8, %v525_v7  ;;  %v521_v11 = vld [vmem:[%s7990_s27 + $0x10] sm:$0xff]  ;;  %v522_v12 = vld [vmem:[%s7990_s27 + $0x18] sm:$0xff]  ;;  %v523_v14 = vld [vmem:[%s7990_s27 + $0x20] sm:$0xff]  ;;  %vm7621_vm1 = vmmov 0   ;;  %s7622_s16 = smov 64   ;;  %vm648_vm2 = vcmask 130048  }
 0x106   : > { %566 = vmatprep.subr.bf16.mxu0 %v6974_v3  ;;  %6777 = vmatprep.subr.bf16.mxu1 %v6974_v3  ;;  %v528_v13 = vpack.c.bf16 %v522_v12, %v521_v11  ;;  %v524_v15 = vld [vmem:[%s7990_s27 + $0x28] sm:$0xff]  ;;  %v490_v20 = vsub.s32 0, %v489_v19  ;;  %v486_v21 = vld [vmem:[#allocation7] sm:$0x3]  ;;  %v494_v22 = vsub.s32 1, %v489_v19  ;;  %s7623_s22 = smov 48  }
 0x107   : > { %v529_v16 = vpack.c.bf16 %v524_v15, %v523_v14  ;;  %s7624_s13 = smov 112   ;;  %s7625_s21 = smov 32   ;;  %vm3079_vm3 = vcmask 523264  }
 0x108   : > { %v8034_v23 = vrot.slane %v486_v21, %v490_v20  ;;  %v8036_v25 = vrot.slane %v486_v21, %v494_v22  ;;  %s7626_s23 = smov 96   ;;  %s7627_s14 = smov 80  }
 0x109   : > { %567 = vmatpush1.bf16.msra.mxu0 %v6976_v4  ;;  %6779 = vmatpush1.bf16.msra.mxu1 %v6976_v4  ;;  %s7628_s24 = smov 16   ;;  %s458_s26 = scalar_lea.vmem [#allocation17], %s5906_s20 }
 0x10a   : > { %6280 = vmatprep.subr.bf16.mxu0 %v7620_v17  ;;  %6256 = vmatprep.subr.bf16.mxu1 %v7620_v17  ;;  %s6059_s28 = sshll.u32 %s7703_s15, 10  ;;  %s5742_s9 = sshll.u32 %s458_s26, 4  ;;  %s9116_s9 = int_to_ptr.vmem [resolvable:$true] %s5742_s9 }
 0x10b   : > { %s5729_s15 = scalar_lea.sflag [#allocation4], %s7984_s29  ;;  %p9204_p1 = scmp.ne.s32.totalorder %s9189_s1, 0 }
 0x10c   : > { %5923 = vmatmul.mubr.msk.bf16.vlgmr.msra.gmra.mrb[0].mxu0 %vm551_vm0, %v527_v9  ;;  %5926 = vmatmul.mubr.msk.bf16.vlgmr.msra.gmra.mrb[0].mxu1 %vm551_vm0, %v530_v10 }
 0x10d   : > { %606 = vmatprep.mubr.bf16.mxu0 %v7619_v0  ;;  %6258 = vmatprep.mubr.msk.bf16.mxu1 %vm7621_vm1, %v7620_v17 }
 0x114   : > { %5924 = vmatmul.mubr.msk.bf16.gmra.mrb[4].mxu0 %vm551_vm0, %v528_v13 }
 0x115   : > { %616 = vmatprep.mubr.bf16.mxu0 %v7619_v0 }
 0x11c   : > { %5925 = vmatmul.mubr.msk.bf16.gmra.mrb[8].mxu0 %vm551_vm0, %v529_v16 }
 0x11d   : > { %6282 = vmatprep.mubr.msk.bf16.mxu0 %vm7621_vm1, %v7620_v17 }
 0x1df   : > { %v598_v24 = vpop.f32.mrb[0].mxu0  ;;  %v628_v26 = vpop.f32.mrb[0].mxu1 }
 0x1e0   : > { %v600_v27 = vpop.f32.mrb[1].mxu0  ;;  %v629_v28 = vadd.f32 %v628_v26, %v8034_v23  ;;  %v630_v29 = vpop.f32.mrb[1].mxu1  ;;  %v599_v33 = vadd.f32 %v598_v24, %v8034_v23 }
 0x1e1   : > { %v602_v30 = vpop.f32.mrb[2].mxu0  ;;  %v631_v31 = vadd.f32 %v630_v29, %v8036_v25  ;;  %v632_v32 = vpop.f32.mrb[2].mxu1  ;;  %v601_v38 = vadd.f32 %v600_v27, %v8036_v25 }
 0x1e2   : > { %v603_v34 = vadd.f32 %v602_v30, %v8034_v23  ;;  %v604_v35 = vpop.f32.mrb[3].mxu0  ;;  %v633_v36 = vadd.f32 %v632_v32, %v8034_v23  ;;  %v634_v37 = vpop.f32.mrb[3].mxu1 }
 0x1e3   : > { %v605_v39 = vadd.f32 %v604_v35, %v8036_v25  ;;  %v635_v40 = vadd.f32 %v634_v37, %v8036_v25 }
 0x1e4   : > { %v8046_v41 = vpack.c.bf16 %v603_v34, %v599_v33  ;;  %v8048_v42 = vpack.c.bf16 %v633_v36, %v629_v28 }
 0x1e5   : > { %v8050_v43 = vpack.c.bf16 %v605_v39, %v601_v38  ;;  %v8052_v44 = vpack.c.bf16 %v635_v40, %v631_v31 }
 0x1e6   : > { %646 = vrot.lane.b32.xlu0 %v8046_v41, %s7622_s16 }
 0x1e7   : > { %v608_v45 = vpop.f32.mrb[4].mxu0  ;;  %6281 = vmatpush3.bf16.msra.mxu0 %v8050_v43 }
 0x1e8   : > { %v610_v46 = vpop.f32.mrb[5].mxu0  ;;  %6292 = vmatprep.subr.bf16.mxu0 %v7620_v17  ;;  %v609_v48 = vadd.f32 %v608_v45, %v8034_v23 }
 0x1e9   : > { %v612_v47 = vpop.f32.mrb[6].mxu0  ;;  %v611_v51 = vadd.f32 %v610_v46, %v8036_v25 }
 0x1ea   : > { %v613_v49 = vadd.f32 %v612_v47, %v8034_v23  ;;  %v614_v50 = vpop.f32.mrb[7].mxu0 }
 0x1eb   : > { %v615_v52 = vadd.f32 %v614_v50, %v8036_v25 }
 0x1ec   : > { %v8062_v53 = vpack.c.bf16 %v613_v49, %v609_v48 }
 0x1ed   : > { %v8064_v54 = vpack.c.bf16 %v615_v52, %v611_v51 }
 0x1ee   : > { %697 = vrot.lane.b32.xlu0 %v8062_v53, %s7622_s16 }
 0x1ef   : > { %v618_v55 = vpop.f32.mrb[8].mxu0 }
 0x1f0   : > { %v620_v56 = vpop.f32.mrb[9].mxu0  ;;  %v619_v58 = vadd.f32 %v618_v55, %v8034_v23 }
 0x1f1   : > { %v622_v57 = vpop.f32.mrb[10].mxu0  ;;  %v621_v61 = vadd.f32 %v620_v56, %v8036_v25 }
 0x1f2   : > { %v623_v59 = vadd.f32 %v622_v57, %v8034_v23  ;;  %v624_v60 = vpop.f32.mrb[11].mxu0 }
 0x1f3   : > { %v625_v62 = vadd.f32 %v624_v60, %v8036_v25 }
 0x1f4   : > { %v8072_v63 = vpack.c.bf16 %v623_v59, %v619_v58 }
 0x1f5   : > { %v8074_v1 = vpack.c.bf16 %v625_v62, %v621_v61 }
 0x1f6   : > { %747 = vrot.lane.b32.xlu1 %v8072_v63, %s7622_s16 }
 0x1fa   : > { %797 = vrot.lane.b32.xlu1 %v8048_v42, %s7622_s16 }
 0x258   : > { %v647_v2 = vpop.permute.xlu0 %646 }
 0x259   : > { %v653_v3 = vsel %vm648_vm2, %v647_v2, 0 }
 0x25a   : > { %6257 = vmatpush3.bf16.xpose.msra.mxu1 %v653_v3 }
 0x25b   : > { %6262 = vmatprep.subr.bf16.mxu1 %v7620_v17 }
 0x260   : > { %v698_v4 = vpop.permute.xlu0 %697 }
 0x261   : > { %v703_v5 = vsel %vm648_vm2, %v698_v4, 0  ;;  %6259 = vmatmul.mubr.msk.bf16.vlgmr.msra.gmra.mrb[4].mxu1 %vm648_vm2, %v8046_v41 }
 0x262   : > { %6263 = vmatpush3.bf16.xpose.msra.mxu1 %v703_v5  ;;  %6264 = vmatprep.mubr.msk.bf16.mxu1 %vm7621_vm1, %v7620_v17 }
 0x263   : > { %6268 = vmatprep.subr.bf16.mxu1 %v7620_v17 }
 0x268   : > { %v748_v6 = vpop.permute.xlu1 %747 }
 0x269   : > { %v753_v7 = vsel %vm648_vm2, %v748_v6, 0  ;;  %6265 = vmatmul.mubr.msk.bf16.vlgmr.msra.gmra.mrb[8].mxu1 %vm648_vm2, %v8062_v53 }
 0x26a   : > { %6269 = vmatpush3.bf16.xpose.msra.mxu1 %v753_v7  ;;  %6270 = vmatprep.mubr.msk.bf16.mxu1 %vm7621_vm1, %v7620_v17 }
 0x26b   : > { %6274 = vmatprep.subr.bf16.mxu1 %v7620_v17 }
 0x26c   : > { %v798_v8 = vpop.permute.xlu1 %797 }
 0x26d   : > { %v803_v9 = vsel %vm648_vm2, %v798_v8, 0 }
 0x271   : > { %6271 = vmatmul.mubr.msk.bf16.vlgmr.msra.gmra.mrb[12].mxu1 %vm648_vm2, %v8072_v63 }
 0x272   : > { %6275 = vmatpush3.bf16.xpose.msra.mxu1 %v803_v9  ;;  %6276 = vmatprep.mubr.msk.bf16.mxu1 %vm7621_vm1, %v7620_v17 }
 0x273   : > { %6286 = vmatprep.subr.bf16.mxu1 %v7620_v17 }
 0x279   : > { %6277 = vmatmul.mubr.msk.bf16.vlgmr.msra.gmra.mrb[16].mxu1 %vm648_vm2, %v8048_v42 }
 0x27a   : > { %6287 = vmatpush3.bf16.msra.mxu1 %v8064_v54  ;;  %6288 = vmatprep.mubr.msk.bf16.mxu1 %vm7621_vm1, %v7620_v17 }
 0x27b   : > { %6298 = vmatprep.subr.bf16.mxu1 %v7620_v17 }
 0x334   : > { %v8106_v10 = vpop.f32.mrb[4].mxu1 }
 0x335   : > { %v6260_v11 = vpop.f32.mrb[5].mxu1  ;;  %v846_v59 = vsel %vm648_vm2, %v8106_v10, -inf }
 0x336   : > { %v8108_v12 = vpop.f32.mrb[6].mxu1 }
 0x337   : > { %v6261_v13 = vpop.f32.mrb[7].mxu1  ;;  %v849_v60 = vsel %vm648_vm2, %v8108_v12, -inf }
 0x33c   : > { %v739_v14 = vpop.f32.mrb[8].mxu1 }
 0x33d   : > { %v6266_v15 = vpop.f32.mrb[9].mxu1  ;;  %v852_v16 = vsel %vm648_vm2, %v739_v14, -inf }
 0x33e   : > { %853 = vmax.xlane.f32.xlu0 %v852_v16  ;;  %v742_v18 = vpop.f32.mrb[10].mxu1 }
 0x33f   : > { %v6267_v19 = vpop.f32.mrb[11].mxu1  ;;  %v855_v20 = vsel %vm648_vm2, %v742_v18, -inf }
 0x340   : > { %856 = vmax.xlane.f32.xlu1 %v855_v20 }
 0x344   : > { %v8112_v21 = vpop.f32.mrb[12].mxu1 }
 0x345   : > { %v6272_v22 = vpop.f32.mrb[13].mxu1  ;;  %v858_v61 = vsel %vm648_vm2, %v8112_v21, -inf }
 0x346   : > { %v8114_v24 = vpop.f32.mrb[14].mxu1 }
 0x347   : > { %v6273_v26 = vpop.f32.mrb[15].mxu1  ;;  %v861_v62 = vsel %vm648_vm2, %v8114_v24, -inf }
 0x34c   : > { %v839_v27 = vpop.f32.mrb[16].mxu1 }
 0x34d   : > { %v6278_v28 = vpop.f32.mrb[17].mxu1  ;;  %v864_v29 = vsel %vm648_vm2, %v839_v27, -inf }
 0x34e   : > { %865 = vmax.xlane.f32.xlu0 %v864_v29  ;;  %v842_v30 = vpop.f32.mrb[18].mxu1 }
 0x34f   : > { %v6279_v31 = vpop.f32.mrb[19].mxu1  ;;  %v867_v32 = vsel %vm648_vm2, %v842_v30, -inf }
 0x352   : > { %868 = vmax.xlane.f32.xlu0 %v867_v32 }
 0x3cb   : > { %v854_v33 = vpop.xlane.xlu0 %853 }
 0x3cc   : > { %v872_v34 = vsub.f32 %v739_v14, %v854_v33 }
 0x3cd   : > { %v857_v35 = vpop.xlane.xlu1 %856 }
 0x3ce   : > { %v882_v36 = vmul.f32 1.442695, %v872_v34  ;;  %v873_v37 = vsub.f32 %v742_v18, %v857_v35 }
 0x3d0   : > { %6987 = vpow2.f32 %v882_v36  ;;  %v884_v38 = vmul.f32 1.442695, %v873_v37 }
 0x3d2   : > { %6989 = vpow2.f32 %v884_v38 }
 0x3da   : > { %v6988_v39 = vpop.eup %6987 }
 0x3db   : > { %v866_v40 = vpop.xlane.xlu0 %865  ;;  %v900_v45 = vsel %vm648_vm2, %v6988_v39, 0.0 }
 0x3dc   : > { %v6990_v46 = vpop.eup %6989  ;;  %v876_v47 = vsub.f32 %v839_v27, %v866_v40  ;;  %901 = vadd.xlane.f32.xlu1 %v900_v45 }
 0x3dd   : > { %v903_v48 = vsel %vm648_vm2, %v6990_v46, 0.0 }
 0x3de   : > { %v890_v49 = vmul.f32 1.442695, %v876_v47  ;;  %904 = vadd.xlane.f32.xlu0 %v903_v48 }
 0x3df   : > { %v869_v50 = vpop.xlane.xlu0 %868 }
 0x3e0   : > { %6991 = vpow2.f32 %v890_v49  ;;  %v877_v51 = vsub.f32 %v842_v30, %v869_v50 }
 0x3e2   : > { %v892_v52 = vmul.f32 1.442695, %v877_v51 }
 0x3e4   : > { %6993 = vpow2.f32 %v892_v52 }
 0x3ea   : > { %v6992_v55 = vpop.eup %6991 }
 0x3eb   : > { %v912_v56 = vsel %vm648_vm2, %v6992_v55, 0.0 }
 0x3ec   : > { %913 = vadd.xlane.f32.xlu1 %v912_v56 }
 0x3ee   : > { %v6994_v57 = vpop.eup %6993 }
 0x3ef   : > { %v915_v58 = vsel %vm648_vm2, %v6994_v57, 0.0 }
 0x3f0   : > { %916 = vadd.xlane.f32.xlu0 %v915_v58 }
 0x3fd   : > { %1171 = vrot.lane.b32.xlu1 %v8062_v53, %s7623_s22 }
 0x401   : > { %1273 = vrot.lane.b32.xlu1 %v8048_v42, %s7623_s22 }
 0x405   : > { %1271 = vrot.lane.b32.xlu1 %v8048_v42, %s7624_s13 }
 0x406   : > { %1169 = vrot.lane.b32.xlu0 %v8062_v53, %s7624_s13 }
 0x425   : > { %847 = vmax.xlane.f32.xlu0 %v846_v59 }
 0x429   : > { %850 = vmax.xlane.f32.xlu1 %v849_v60  ;;  %859 = vmax.xlane.f32.xlu0 %v858_v61 }
 0x42d   : > { %862 = vmax.xlane.f32.xlu0 %v861_v62 }
 0x469   : > { %v902_v2 = vpop.xlane.xlu1 %901 }
 0x46a   : > { %6995 = vrcp.f32 %v902_v2 }
 0x46b   : > { %v905_v3 = vpop.xlane.xlu0 %904 }
 0x46c   : > { %6997 = vrcp.f32 %v905_v3 }
 0x474   : > { %v6996_v4 = vpop.eup %6995 }
 0x475   : > { %v928_v6 = vmul.f32 %v6996_v4, %v6988_v39 }
 0x476   : > { %v6998_v5 = vpop.eup %6997 }
 0x477   : > { %v929_v7 = vmul.f32 %v6998_v5, %v6990_v46 }
 0x479   : > { %v914_v8 = vpop.xlane.xlu1 %913  ;;  %v935_v9 = vpack.c.bf16 %v929_v7, %v928_v6 }
 0x47a   : > { %6999 = vrcp.f32 %v914_v8 }
 0x47b   : > { %6289 = vmatmul.mubr.msk.bf16.vlgmr.msra.gmra.mrb[20].mxu1 %vm648_vm2, %v935_v9 }
 0x47c   : > { %6299 = vmatpush3.bf16.msra.mxu1 %v8052_v44  ;;  %6300 = vmatprep.mubr.msk.bf16.mxu1 %vm7621_vm1, %v7620_v17 }
 0x47d   : > { %v917_v11 = vpop.xlane.xlu0 %916  ;;  %6310 = vmatprep.subr.bf16.mxu1 %v7620_v17  ;;  %v1172_v18 = vpop.permute.xlu1 %1171 }
 0x47e   : > { %7001 = vrcp.f32 %v917_v11  ;;  %v1177_v20 = vsel %vm648_vm2, %v1172_v18, 0 }
 0x481   : > { %v1274_v22 = vpop.permute.xlu1 %1273  ;;  %v1170_v26 = vpop.permute.xlu0 %1169 }
 0x482   : > { %v1279_v27 = vsel %vm648_vm2, %v1274_v22, 0 }
 0x484   : > { %v7000_v13 = vpop.eup %6999 }
 0x485   : > { %v932_v15 = vmul.f32 %v7000_v13, %v6992_v55  ;;  %v1272_v28 = vpop.permute.xlu1 %1271 }
 0x488   : > { %v7002_v14 = vpop.eup %7001 }
 0x489   : > { %v933_v16 = vmul.f32 %v7002_v14, %v6994_v57 }
 0x48b   : > { %v937_v19 = vpack.c.bf16 %v933_v16, %v932_v15 }
 0x48d   : > { %6301 = vmatmul.mubr.msk.bf16.vlgmr.msra.gmra.mrb[24].mxu1 %vm648_vm2, %v937_v19 }
 0x48e   : > { %6311 = vmatpush3.bf16.xpose.msra.mxu1 %v1177_v20  ;;  %6312 = vmatprep.mubr.msk.bf16.mxu1 %vm7621_vm1, %v7620_v17 }
 0x48f   : > { %6322 = vmatprep.subr.bf16.mxu1 %v7620_v17 }
 0x495   : > { %6313 = vmatmul.mubr.msk.bf16.vlgmr.msra.gmra.mrb[28].mxu1 %vm648_vm2, %v1170_v26 }
 0x496   : > { %6323 = vmatpush3.bf16.xpose.msra.mxu1 %v1279_v27  ;;  %6324 = vmatprep.mubr.msk.bf16.mxu1 %vm7621_vm1, %v7620_v17 }
 0x497   : > { %6334 = vmatprep.subr.bf16.mxu1 %v7620_v17 }
 0x49d   : > { %6325 = vmatmul.mubr.msk.bf16.vlgmr.msra.gmra.mrb[32].mxu1 %vm648_vm2, %v1272_v28 }
 0x49e   : > { %6336 = vmatprep.mubr.msk.bf16.mxu1 %vm7621_vm1, %v7620_v17 }
 0x4b2   : > { %v848_v29 = vpop.xlane.xlu0 %847 }
 0x4b3   : > { %v870_v30 = vsub.f32 %v8106_v10, %v848_v29 }
 0x4b5   : > { %v878_v31 = vmul.f32 1.442695, %v870_v30 }
 0x4b6   : > { %v851_v32 = vpop.xlane.xlu1 %850  ;;  %v860_v33 = vpop.xlane.xlu0 %859 }
 0x4b7   : > { %7003 = vpow2.f32 %v878_v31  ;;  %v871_v34 = vsub.f32 %v8108_v12, %v851_v32  ;;  %v874_v35 = vsub.f32 %v8112_v21, %v860_v33 }
 0x4b9   : > { %v880_v36 = vmul.f32 1.442695, %v871_v34  ;;  %v886_v37 = vmul.f32 1.442695, %v874_v35 }
 0x4ba   : > { %v863_v38 = vpop.xlane.xlu0 %862 }
 0x4bb   : > { %7005 = vpow2.f32 %v880_v36  ;;  %v875_v39 = vsub.f32 %v8114_v24, %v863_v38 }
 0x4bc   : > { %7007 = vpow2.f32 %v886_v37 }
 0x4bd   : > { %v888_v40 = vmul.f32 1.442695, %v875_v39 }
 0x4bf   : > { %7009 = vpow2.f32 %v888_v40 }
 0x4c1   : > { %v7004_v45 = vpop.eup %7003 }
 0x4c2   : > { %v894_v10 = vsel %vm648_vm2, %v7004_v45, 0.0 }
 0x4c3   : > { %895 = vadd.xlane.f32.xlu1 %v894_v10 }
 0x4c5   : > { %v7006_v46 = vpop.eup %7005 }
 0x4c6   : > { %v7008_v47 = vpop.eup %7007  ;;  %v897_v48 = vsel %vm648_vm2, %v7006_v46, 0.0 }
 0x4c7   : > { %898 = vadd.xlane.f32.xlu0 %v897_v48  ;;  %v906_v12 = vsel %vm648_vm2, %v7008_v47, 0.0 }
 0x4c8   : > { %907 = vadd.xlane.f32.xlu1 %v906_v12 }
 0x4c9   : > { %v7010_v21 = vpop.eup %7009 }
 0x4ca   : > { %v909_v49 = vsel %vm648_vm2, %v7010_v21, 0.0 }
 0x4cb   : > { %910 = vadd.xlane.f32.xlu0 %v909_v49 }
 0x4d9   : > { %1120 = vrot.lane.b32.xlu1 %v8046_v41, %s7623_s22 }
 0x4dd   : > { %1222 = vrot.lane.b32.xlu1 %v8072_v63, %s7623_s22 }
 0x4e1   : > { %1220 = vrot.lane.b32.xlu1 %v8072_v63, %s7624_s13  ;;  %1118 = vrot.lane.b32.xlu0 %v8046_v41, %s7624_s13 }
 0x54e   : > { %v8172_v24 = vpop.f32.mrb[20].mxu1 }
 0x54f   : > { %v6290_v50 = vpop.f32.mrb[21].mxu1 }
 0x550   : > { %v896_v51 = vpop.xlane.xlu1 %895  ;;  %v8174_v52 = vpop.f32.mrb[22].mxu1 }
 0x551   : > { %v1115_v55 = vpack.c.bf16 %v8174_v52, %v8172_v24  ;;  %v6291_v56 = vpop.f32.mrb[23].mxu1  ;;  %7011 = vrcp.f32 %v896_v51 }
 0x554   : > { %v899_v57 = vpop.xlane.xlu0 %898 }
 0x555   : > { %7013 = vrcp.f32 %v899_v57  ;;  %v908_v58 = vpop.xlane.xlu1 %907 }
 0x558   : > { %v911_v59 = vpop.xlane.xlu0 %910 }
 0x559   : > { %7015 = vrcp.f32 %v911_v59  ;;  %v1121_v19 = vpop.permute.xlu1 %1120 }
 0x55a   : > { %7017 = vrcp.f32 %v908_v58  ;;  %v1126_v28 = vsel %vm648_vm2, %v1121_v19, 0 }
 0x55b   : > { %v7012_v60 = vpop.eup %7011 }
 0x55c   : > { %v926_v62 = vmul.f32 %v7012_v60, %v7004_v45  ;;  %v1119_v35 = vpop.permute.xlu0 %1118 }
 0x55d   : > { %v1223_v32 = vpop.permute.xlu1 %1222 }
 0x55e   : > { %v1228_v36 = vsel %vm648_vm2, %v1223_v32, 0 }
 0x55f   : > { %v7014_v61 = vpop.eup %7013 }
 0x560   : > { %v927_v2 = vmul.f32 %v7014_v61, %v7006_v46  ;;  %v8178_v3 = vpop.f32.mrb[24].mxu1 }
 0x561   : > { %v6302_v4 = vpop.f32.mrb[25].mxu1  ;;  %v1221_v38 = vpop.permute.xlu1 %1220 }
 0x562   : > { %v934_v5 = vpack.c.bf16 %v927_v2, %v926_v62  ;;  %v8180_v6 = vpop.f32.mrb[26].mxu1 }
 0x563   : > { %v7016_v7 = vpop.eup %7015  ;;  %v1117_v8 = vpack.c.bf16 %v8180_v6, %v8178_v3  ;;  %v6303_v9 = vpop.f32.mrb[27].mxu1 }
 0x564   : > { %6283 = vmatmul.mubr.msk.bf16.vlgmr.msra.gmra.mrb[12].mxu0 %vm648_vm2, %v934_v5  ;;  %v7018_v11 = vpop.eup %7017  ;;  %v931_v13 = vmul.f32 %v7016_v7, %v7010_v21 }
 0x565   : > { %6293 = vmatpush3.bf16.msra.mxu0 %v8074_v1  ;;  %6294 = vmatprep.mubr.msk.bf16.mxu0 %vm7621_vm1, %v7620_v17  ;;  %v930_v14 = vmul.f32 %v7018_v11, %v7008_v47 }
 0x566   : > { %6304 = vmatprep.subr.bf16.mxu0 %v7620_v17 }
 0x567   : > { %v936_v22 = vpack.c.bf16 %v931_v13, %v930_v14 }
 0x568   : > { %v1213_v15 = vpop.f32.mrb[28].mxu1 }
 0x569   : > { %v6314_v16 = vpop.f32.mrb[29].mxu1  ;;  %v1328_v18 = vsel %vm648_vm2, %v1213_v15, -inf }
 0x56a   : > { %1329 = vmax.xlane.f32.xlu0 %v1328_v18  ;;  %v1216_v20 = vpop.f32.mrb[30].mxu1 }
 0x56b   : > { %v6315_v26 = vpop.f32.mrb[31].mxu1  ;;  %v1331_v27 = vsel %vm648_vm2, %v1216_v20, -inf }
 0x56c   : > { %6295 = vmatmul.mubr.msk.bf16.vlgmr.msra.gmra.mrb[16].mxu0 %vm648_vm2, %v936_v22  ;;  %1332 = vmax.xlane.f32.xlu1 %v1331_v27 }
 0x56d   : > { %6306 = vmatprep.mubr.msk.bf16.mxu0 %vm7621_vm1, %v7620_v17 }
 0x56e   : > { %6305 = vmatpush3.bf16.xpose.msra.mxu0 %v1126_v28 }
 0x56f   : > { %6316 = vmatprep.subr.bf16.mxu0 %v7620_v17 }
 0x570   : > { %v1315_v29 = vpop.f32.mrb[32].mxu1 }
 0x571   : > { %v6326_v30 = vpop.f32.mrb[33].mxu1  ;;  %v1340_v31 = vsel %vm648_vm2, %v1315_v29, -inf }
 0x572   : > { %1341 = vmax.xlane.f32.xlu0 %v1340_v31  ;;  %v1318_v33 = vpop.f32.mrb[34].mxu1 }
 0x573   : > { %v6327_v34 = vpop.f32.mrb[35].mxu1  ;;  %v1343_v37 = vsel %vm648_vm2, %v1318_v33, -inf }
 0x575   : > { %6307 = vmatmul.mubr.msk.bf16.vlgmr.msra.gmra.mrb[20].mxu0 %vm648_vm2, %v1119_v35 }
 0x576   : > { %6317 = vmatpush3.bf16.xpose.msra.mxu0 %v1228_v36  ;;  %1344 = vmax.xlane.f32.xlu0 %v1343_v37 }
 0x577   : > { %6318 = vmatprep.mubr.msk.bf16.mxu0 %vm7621_vm1, %v7620_v17  ;;  %6328 = vmatprep.subr.bf16.mxu0 %v7620_v17 }
 0x57d   : > { %6319 = vmatmul.mubr.msk.bf16.vlgmr.msra.gmra.mrb[24].mxu0 %vm648_vm2, %v1221_v38  ;;  %1463 = vrot.lane.b32.xlu1 %v8064_v54, %s7624_s13 }
 0x57e   : > { %6330 = vmatprep.mubr.msk.bf16.mxu0 %vm7621_vm1, %v7620_v17 }
 0x5f7   : > { %v1330_v39 = vpop.xlane.xlu0 %1329 }
 0x5f8   : > { %v1348_v40 = vsub.f32 %v1213_v15, %v1330_v39 }
 0x5f9   : > { %v1333_v45 = vpop.xlane.xlu1 %1332 }
 0x5fa   : > { %v1358_v10 = vmul.f32 1.442695, %v1348_v40  ;;  %v1349_v46 = vsub.f32 %v1216_v20, %v1333_v45 }
 0x5fc   : > { %7019 = vpow2.f32 %v1358_v10  ;;  %v1360_v47 = vmul.f32 1.442695, %v1349_v46 }
 0x5fd   : > { %v1464_v48 = vpop.permute.xlu1 %1463 }
 0x5fe   : > { %7021 = vpow2.f32 %v1360_v47  ;;  %6335 = vmatpush3.bf16.msra.mxu1 %v1464_v48 }
 0x5ff   : > { %v1342_v12 = vpop.xlane.xlu0 %1341  ;;  %6346 = vmatprep.subr.bf16.mxu1 %v7620_v17 }
 0x600   : > { %v1352_v21 = vsub.f32 %v1315_v29, %v1342_v12 }
 0x602   : > { %v1366_v49 = vmul.f32 1.442695, %v1352_v21 }
 0x603   : > { %v1345_v50 = vpop.xlane.xlu0 %1344 }
 0x604   : > { %7023 = vpow2.f32 %v1366_v49  ;;  %v1353_v51 = vsub.f32 %v1318_v33, %v1345_v50 }
 0x606   : > { %v7020_v56 = vpop.eup %7019  ;;  %v1368_v57 = vmul.f32 1.442695, %v1353_v51 }
 0x607   : > { %v1376_v58 = vsel %vm648_vm2, %v7020_v56, 0.0 }
 0x608   : > { %v7022_v59 = vpop.eup %7021  ;;  %7025 = vpow2.f32 %v1368_v57  ;;  %1377 = vadd.xlane.f32.xlu1 %v1376_v58 }
 0x609   : > { %v1379_v60 = vsel %vm648_vm2, %v7022_v59, 0.0 }
 0x60a   : > { %1380 = vadd.xlane.f32.xlu0 %v1379_v60 }
 0x60e   : > { %v8211_v61 = vpop.eup %7023 }
 0x60f   : > { %v1388_v62 = vsel %vm648_vm2, %v8211_v61, 0.0 }
 0x610   : > { %1389 = vadd.xlane.f32.xlu1 %v1388_v62 }
 0x612   : > { %v7026_v2 = vpop.eup %7025 }
 0x613   : > { %v1391_v4 = vsel %vm648_vm2, %v7026_v2, 0.0 }
 0x614   : > { %1392 = vadd.xlane.f32.xlu0 %v1391_v4 }
 0x621   : > { %1778 = vrot.lane.b32.xlu1 %v8046_v41, %s7625_s21 }
 0x625   : > { %1776 = vrot.lane.b32.xlu1 %v8046_v41, %s7626_s23 }
 0x629   : > { %1827 = vrot.lane.b32.xlu1 %v8062_v53, %s7626_s23 }
 0x62a   : > { %1559 = vrot.lane.b32.xlu0 %v8052_v44, %s7624_s13 }
 0x62d   : > { %1878 = vrot.lane.b32.xlu1 %v8072_v63, %s7626_s23 }
 0x62e   : > { %1829 = vrot.lane.b32.xlu0 %v8062_v53, %s7625_s21 }
 0x631   : > { %1929 = vrot.lane.b32.xlu1 %v8048_v42, %s7626_s23 }
 0x632   : > { %1880 = vrot.lane.b32.xlu0 %v8072_v63, %s7625_s21 }
 0x636   : > { %1931 = vrot.lane.b32.xlu0 %v8048_v42, %s7625_s21 }
 0x637   : > { %v8234_v5 = vpop.f32.mrb[12].mxu0 }
 0x638   : > { %v6284_v7 = vpop.f32.mrb[13].mxu0 }
 0x639   : > { %v8236_v9 = vpop.f32.mrb[14].mxu0 }
 0x63a   : > { %v1114_v11 = vpack.c.bf16 %v8236_v9, %v8234_v5  ;;  %v6285_v13 = vpop.f32.mrb[15].mxu0 }
 0x63f   : > { %v8240_v14 = vpop.f32.mrb[16].mxu0 }
 0x640   : > { %v6296_v15 = vpop.f32.mrb[17].mxu0 }
 0x641   : > { %v8242_v16 = vpop.f32.mrb[18].mxu0 }
 0x642   : > { %v1116_v18 = vpack.c.bf16 %v8242_v16, %v8240_v14  ;;  %v6297_v19 = vpop.f32.mrb[19].mxu0 }
 0x648   : > { %v8246_v20 = vpop.f32.mrb[20].mxu0 }
 0x649   : > { %v6308_v22 = vpop.f32.mrb[21].mxu0  ;;  %v1322_v33 = vsel %vm648_vm2, %v8246_v20, -inf }
 0x64a   : > { %v8248_v26 = vpop.f32.mrb[22].mxu0 }
 0x64b   : > { %v6309_v27 = vpop.f32.mrb[23].mxu0  ;;  %v1325_v32 = vsel %vm648_vm2, %v8248_v26, -inf }
 0x650   : > { %v8250_v28 = vpop.f32.mrb[24].mxu0 }
 0x651   : > { %v6320_v29 = vpop.f32.mrb[25].mxu0  ;;  %v1334_v34 = vsel %vm648_vm2, %v8250_v28, -inf }
 0x652   : > { %v8252_v30 = vpop.f32.mrb[26].mxu0 }
 0x653   : > { %v6321_v31 = vpop.f32.mrb[27].mxu0  ;;  %v1337_v35 = vsel %vm648_vm2, %v8252_v30, -inf }
 0x655   : > { %1326 = vmax.xlane.f32.xlu1 %v1325_v32  ;;  %1323 = vmax.xlane.f32.xlu0 %v1322_v33 }
 0x659   : > { %1335 = vmax.xlane.f32.xlu0 %v1334_v34 }
 0x65d   : > { %1338 = vmax.xlane.f32.xlu0 %v1337_v35 }
 0x695   : > { %v1378_v36 = vpop.xlane.xlu1 %1377 }
 0x696   : > { %7027 = vrcp.f32 %v1378_v36 }
 0x697   : > { %v1381_v37 = vpop.xlane.xlu0 %1380 }
 0x698   : > { %7029 = vrcp.f32 %v1381_v37 }
 0x69d   : > { %v1390_v38 = vpop.xlane.xlu1 %1389 }
 0x69e   : > { %7031 = vrcp.f32 %v1390_v38 }
 0x6a0   : > { %v7028_v39 = vpop.eup %7027 }
 0x6a1   : > { %v1393_v40 = vpop.xlane.xlu0 %1392  ;;  %v1404_v10 = vmul.f32 %v7028_v39, %v7020_v56  ;;  %v1779_v51 = vpop.permute.xlu1 %1778 }
 0x6a2   : > { %v7030_v45 = vpop.eup %7029  ;;  %7033 = vrcp.f32 %v1393_v40  ;;  %v1784_v56 = vsel %vm648_vm2, %v1779_v51, 0 }
 0x6a3   : > { %v1405_v46 = vmul.f32 %v7030_v45, %v7022_v59 }
 0x6a5   : > { %v1560_v47 = vpop.permute.xlu0 %1559  ;;  %v1411_v48 = vpack.c.bf16 %v1405_v46, %v1404_v10  ;;  %v1777_v59 = vpop.permute.xlu1 %1776 }
 0x6a7   : > { %6337 = vmatmul.mubr.msk.bf16.vlgmr.msra.gmra.mrb[36].mxu1 %vm648_vm2, %v1411_v48 }
 0x6a8   : > { %6347 = vmatpush3.bf16.msra.mxu1 %v1560_v47  ;;  %6348 = vmatprep.mubr.msk.bf16.mxu1 %vm7621_vm1, %v7620_v17  ;;  %v7032_v12 = vpop.eup %7031 }
 0x6a9   : > { %6372 = vmatprep.subr.bf16.mxu1 %v7620_v17  ;;  %v1408_v49 = vmul.f32 %v7032_v12, %v8211_v61  ;;  %v1830_v58 = vpop.permute.xlu0 %1829  ;;  %v1828_v62 = vpop.permute.xlu1 %1827 }
 0x6aa   : > { %v1835_v60 = vsel %vm648_vm2, %v1830_v58, 0 }
 0x6ac   : > { %v7034_v21 = vpop.eup %7033 }
 0x6ad   : > { %v1409_v50 = vmul.f32 %v7034_v21, %v7026_v2  ;;  %v1881_v61 = vpop.permute.xlu0 %1880  ;;  %v1879_v7 = vpop.permute.xlu1 %1878 }
 0x6ae   : > { %v1886_v2 = vsel %vm648_vm2, %v1881_v61, 0 }
 0x6af   : > { %v1413_v57 = vpack.c.bf16 %v1409_v50, %v1408_v49 }
 0x6b1   : > { %6349 = vmatmul.mubr.msk.bf16.vlgmr.msra.gmra.mrb[40].mxu1 %vm648_vm2, %v1413_v57  ;;  %v1932_v4 = vpop.permute.xlu0 %1931  ;;  %v1930_v15 = vpop.permute.xlu1 %1929 }
 0x6b2   : > { %6373 = vmatpush3.bf16.xpose.msra.mxu1 %v1784_v56  ;;  %6374 = vmatprep.mubr.msk.bf16.mxu1 %vm7621_vm1, %v7620_v17  ;;  %v1937_v13 = vsel %vm648_vm2, %v1932_v4, 0 }
 0x6b3   : > { %6378 = vmatprep.subr.bf16.mxu1 %v7620_v17 }
 0x6b9   : > { %6375 = vmatmul.mubr.msk.bf16.vlgmr.msra.gmra.mrb[44].mxu1 %vm648_vm2, %v1777_v59 }
 0x6ba   : > { %6379 = vmatpush3.bf16.xpose.msra.mxu1 %v1835_v60  ;;  %6380 = vmatprep.mubr.msk.bf16.mxu1 %vm7621_vm1, %v7620_v17 }
 0x6bb   : > { %6384 = vmatprep.subr.bf16.mxu1 %v7620_v17 }
 0x6c1   : > { %6381 = vmatmul.mubr.msk.bf16.vlgmr.msra.gmra.mrb[48].mxu1 %vm648_vm2, %v1828_v62 }
 0x6c2   : > { %6385 = vmatpush3.bf16.xpose.msra.mxu1 %v1886_v2  ;;  %6386 = vmatprep.mubr.msk.bf16.mxu1 %vm7621_vm1, %v7620_v17 }
 0x6c3   : > { %6390 = vmatprep.subr.bf16.mxu1 %v7620_v17 }
 0x6c9   : > { %6387 = vmatmul.mubr.msk.bf16.vlgmr.msra.gmra.mrb[52].mxu1 %vm648_vm2, %v1879_v7 }
 0x6ca   : > { %6391 = vmatpush3.bf16.xpose.msra.mxu1 %v1937_v13  ;;  %6392 = vmatprep.mubr.msk.bf16.mxu1 %vm7621_vm1, %v7620_v17 }
 0x6cb   : > { %6402 = vmatprep.subr.bf16.mxu1 %v7620_v17 }
 0x6d1   : > { %6393 = vmatmul.mubr.msk.bf16.vlgmr.msra.gmra.mrb[56].mxu1 %vm648_vm2, %v1930_v15 }
 0x6d2   : > { %6404 = vmatprep.mubr.msk.bf16.mxu1 %vm7621_vm1, %v7620_v17 }
 0x6e2   : > { %v1327_v19 = vpop.xlane.xlu1 %1326  ;;  %v1324_v22 = vpop.xlane.xlu0 %1323 }
 0x6e3   : > { %v1347_v27 = vsub.f32 %v8248_v26, %v1327_v19  ;;  %v1346_v29 = vsub.f32 %v8246_v20, %v1324_v22 }
 0x6e5   : > { %v1356_v31 = vmul.f32 1.442695, %v1347_v27  ;;  %v1354_v32 = vmul.f32 1.442695, %v1346_v29 }
 0x6e6   : > { %v1336_v33 = vpop.xlane.xlu0 %1335 }
 0x6e7   : > { %7035 = vpow2.f32 %v1356_v31  ;;  %v1350_v34 = vsub.f32 %v8250_v28, %v1336_v33 }
 0x6e8   : > { %7037 = vpow2.f32 %v1354_v32 }
 0x6e9   : > { %v1362_v35 = vmul.f32 1.442695, %v1350_v34 }
 0x6ea   : > { %v1339_v36 = vpop.xlane.xlu0 %1338 }
 0x6eb   : > { %7039 = vpow2.f32 %v1362_v35  ;;  %v1351_v37 = vsub.f32 %v8252_v30, %v1339_v36 }
 0x6ed   : > { %v1364_v38 = vmul.f32 1.442695, %v1351_v37 }
 0x6ef   : > { %7041 = vpow2.f32 %v1364_v38 }
 0x6f1   : > { %v7036_v39 = vpop.eup %7035 }
 0x6f2   : > { %v7038_v40 = vpop.eup %7037  ;;  %v1373_v26 = vsel %vm648_vm2, %v7036_v39, 0.0 }
 0x6f3   : > { %1374 = vadd.xlane.f32.xlu0 %v1373_v26  ;;  %v1370_v20 = vsel %vm648_vm2, %v7038_v40, 0.0 }
 0x6f4   : > { %1371 = vadd.xlane.f32.xlu1 %v1370_v20 }
 0x6f5   : > { %v7040_v45 = vpop.eup %7039 }
 0x6f6   : > { %v1382_v10 = vsel %vm648_vm2, %v7040_v45, 0.0 }
 0x6f8   : > { %1383 = vadd.xlane.f32.xlu1 %v1382_v10 }
 0x6f9   : > { %v7042_v28 = vpop.eup %7041 }
 0x6fa   : > { %v1385_v46 = vsel %vm648_vm2, %v7042_v28, 0.0 }
 0x6fb   : > { %1386 = vadd.xlane.f32.xlu0 %v1385_v46 }
 0x709   : > { %1415 = vrot.lane.b32.xlu1 %v8050_v43, %s7624_s13 }
 0x711   : > { %1511 = vrot.lane.b32.xlu0 %v8074_v1, %s7624_s13 }
 0x77a   : > { %v8302_v30 = vpop.f32.mrb[36].mxu1 }
 0x77b   : > { %v6338_v47 = vpop.f32.mrb[37].mxu1 }
 0x77c   : > { %v8304_v48 = vpop.f32.mrb[38].mxu1 }
 0x77d   : > { %v1607_v12 = vpack.c.bf16 %v8304_v48, %v8302_v30  ;;  %v6339_v21 = vpop.f32.mrb[39].mxu1 }
 0x780   : > { %v1375_v49 = vpop.xlane.xlu0 %1374 }
 0x781   : > { %v1372_v50 = vpop.xlane.xlu1 %1371  ;;  %7043 = vrcp.f32 %v1375_v49 }
 0x782   : > { %7045 = vrcp.f32 %v1372_v50 }
 0x784   : > { %v8308_v51 = vpop.f32.mrb[40].mxu1 }
 0x785   : > { %v1384_v57 = vpop.xlane.xlu1 %1383  ;;  %v6350_v56 = vpop.f32.mrb[41].mxu1 }
 0x786   : > { %v8310_v58 = vpop.f32.mrb[42].mxu1  ;;  %7047 = vrcp.f32 %v1384_v57 }
 0x787   : > { %v1609_v59 = vpack.c.bf16 %v8310_v58, %v8308_v51  ;;  %v6351_v60 = vpop.f32.mrb[43].mxu1 }
 0x788   : > { %v1387_v61 = vpop.xlane.xlu0 %1386 }
 0x789   : > { %v1416_v62 = vpop.permute.xlu1 %1415  ;;  %7049 = vrcp.f32 %v1387_v61 }
 0x78a   : > { %6329 = vmatpush3.bf16.msra.mxu0 %v1416_v62 }
 0x78b   : > { %v7044_v2 = vpop.eup %7043  ;;  %6340 = vmatprep.subr.bf16.mxu0 %v7620_v17 }
 0x78c   : > { %v7046_v4 = vpop.eup %7045  ;;  %v1403_v7 = vmul.f32 %v7044_v2, %v7036_v39  ;;  %v1820_v13 = vpop.f32.mrb[44].mxu1 }
 0x78d   : > { %v1402_v15 = vmul.f32 %v7046_v4, %v7038_v40  ;;  %v6376_v19 = vpop.f32.mrb[45].mxu1  ;;  %v1980_v22 = vsel %vm648_vm2, %v1820_v13, -inf  ;;  %v1512_v34 = vpop.permute.xlu0 %1511  ;;  %v6977_v4 = vld [vmem:[#allocation8 + $0x8] sm:$0xff]  }
 0x78e   : > { %1981 = vmax.xlane.f32.xlu1 %v1980_v22  ;;  %v1823_v27 = vpop.f32.mrb[46].mxu1 }
 0x78f   : > { %v6377_v29 = vpop.f32.mrb[47].mxu1  ;;  %v1410_v31 = vpack.c.bf16 %v1403_v7, %v1402_v15  ;;  %v1983_v32 = vsel %vm648_vm2, %v1823_v27, -inf  ;;  %v8329_v7 = vld [vmem:[#allocation8] sm:$0xff]  }
 0x790   : > { %1984 = vmax.xlane.f32.xlu0 %v1983_v32  ;;  %v7048_v33 = vpop.eup %7047 }
 0x791   : > { %6331 = vmatmul.mubr.msk.bf16.vlgmr.msra.gmra.mrb[28].mxu0 %vm648_vm2, %v1410_v31  ;;  %v1406_v36 = vmul.f32 %v7048_v33, %v7040_v45 }
 0x792   : > { %6341 = vmatpush3.bf16.msra.mxu0 %v1512_v34  ;;  %6342 = vmatprep.mubr.msk.bf16.mxu0 %vm7621_vm1, %v7620_v17 }
 0x793   : > { %v7050_v35 = vpop.eup %7049  ;;  %6352 = vmatprep.subr.bf16.mxu0 %v6977_v4 }
 0x794   : > { %v1407_v37 = vmul.f32 %v7050_v35, %v7042_v28  ;;  %v1871_v38 = vpop.f32.mrb[48].mxu1 }
 0x795   : > { %v6382_v39 = vpop.f32.mrb[49].mxu1  ;;  %v1986_v40 = vsel %vm648_vm2, %v1871_v38, -inf }
 0x796   : > { %1987 = vmax.xlane.f32.xlu1 %v1986_v40  ;;  %v1874_v26 = vpop.f32.mrb[50].mxu1  ;;  %v1412_v20 = vpack.c.bf16 %v1407_v37, %v1406_v36 }
 0x797   : > { %v6383_v10 = vpop.f32.mrb[51].mxu1  ;;  %v1989_v46 = vsel %vm648_vm2, %v1874_v26, -inf }
 0x798   : > { %1990 = vmax.xlane.f32.xlu0 %v1989_v46 }
 0x799   : > { %6343 = vmatmul.mubr.msk.bf16.vlgmr.msra.gmra.mrb[32].mxu0 %vm648_vm2, %v1412_v20 }
 0x79a   : > { %6353 = vmatpush3.bf16.msra.mxu0 %v6977_v4 }
 0x79b   : > { %6362 = vmatprep.subr.bf16.mxu0 %v8329_v7 }
 0x79c   : > { %v1922_v47 = vpop.f32.mrb[52].mxu1 }
 0x79d   : > { %v6388_v21 = vpop.f32.mrb[53].mxu1  ;;  %v1992_v49 = vsel %vm648_vm2, %v1922_v47, -inf }
 0x79e   : > { %1993 = vmax.xlane.f32.xlu1 %v1992_v49  ;;  %v1925_v45 = vpop.f32.mrb[54].mxu1 }
 0x79f   : > { %v6389_v28 = vpop.f32.mrb[55].mxu1  ;;  %v1995_v50 = vsel %vm648_vm2, %v1925_v45, -inf }
 0x7a0   : > { %1996 = vmax.xlane.f32.xlu0 %v1995_v50 }
 0x7a4   : > { %v1973_v57 = vpop.f32.mrb[56].mxu1 }
 0x7a5   : > { %v6394_v56 = vpop.f32.mrb[57].mxu1  ;;  %v1998_v60 = vsel %vm648_vm2, %v1973_v57, -inf }
 0x7a6   : > { %1999 = vmax.xlane.f32.xlu1 %v1998_v60  ;;  %v1976_v61 = vpop.f32.mrb[58].mxu1 }
 0x7a7   : > { %v6395_v62 = vpop.f32.mrb[59].mxu1  ;;  %v2001_v2 = vsel %vm648_vm2, %v1976_v61, -inf }
 0x7a8   : > { %2002 = vmax.xlane.f32.xlu0 %v2001_v2 }
 0x7b7   : > { %2072 = vrot.lane.b32.xlu1 %v8050_v43, %s7626_s23 }
 0x81b   : > { %v1982_v15 = vpop.xlane.xlu1 %1981 }
 0x81c   : > { %v2004_v19 = vsub.f32 %v1820_v13, %v1982_v15 }
 0x81d   : > { %v1985_v22 = vpop.xlane.xlu0 %1984 }
 0x81e   : > { %v2012_v29 = vmul.f32 1.442695, %v2004_v19  ;;  %v2005_v31 = vsub.f32 %v1823_v27, %v1985_v22 }
 0x820   : > { %7051 = vpow2.f32 %v2012_v29  ;;  %v2014_v32 = vmul.f32 1.442695, %v2005_v31 }
 0x822   : > { %7053 = vpow2.f32 %v2014_v32 }
 0x823   : > { %v1988_v33 = vpop.xlane.xlu1 %1987 }
 0x824   : > { %v2006_v34 = vsub.f32 %v1871_v38, %v1988_v33 }
 0x825   : > { %v1991_v35 = vpop.xlane.xlu0 %1990 }
 0x826   : > { %v2016_v36 = vmul.f32 1.442695, %v2006_v34  ;;  %v2007_v37 = vsub.f32 %v1874_v26, %v1991_v35 }
 0x828   : > { %7055 = vpow2.f32 %v2016_v36  ;;  %v2018_v39 = vmul.f32 1.442695, %v2007_v37 }
 0x82a   : > { %v8332_v40 = vpop.eup %7051  ;;  %7057 = vpow2.f32 %v2018_v39 }
 0x82b   : > { %v1994_v20 = vpop.xlane.xlu1 %1993  ;;  %v2028_v13 = vsel %vm648_vm2, %v8332_v40, 0.0 }
 0x82c   : > { %v8336_v10 = vpop.eup %7053  ;;  %v2008_v27 = vsub.f32 %v1922_v47, %v1994_v20  ;;  %2029 = vadd.xlane.f32.xlu1 %v2028_v13 }
 0x82d   : > { %v1997_v46 = vpop.xlane.xlu0 %1996  ;;  %v2031_v38 = vsel %vm648_vm2, %v8336_v10, 0.0 }
 0x82e   : > { %v2020_v21 = vmul.f32 1.442695, %v2008_v27  ;;  %v2009_v49 = vsub.f32 %v1925_v45, %v1997_v46  ;;  %2032 = vadd.xlane.f32.xlu0 %v2031_v38 }
 0x830   : > { %7059 = vpow2.f32 %v2020_v21  ;;  %v2022_v26 = vmul.f32 1.442695, %v2009_v49 }
 0x832   : > { %v8340_v28 = vpop.eup %7055  ;;  %7061 = vpow2.f32 %v2022_v26 }
 0x833   : > { %v2000_v50 = vpop.xlane.xlu1 %1999  ;;  %v2034_v56 = vsel %vm648_vm2, %v8340_v28, 0.0 }
 0x834   : > { %v8344_v60 = vpop.eup %7057  ;;  %v2010_v47 = vsub.f32 %v1973_v57, %v2000_v50  ;;  %2035 = vadd.xlane.f32.xlu1 %v2034_v56 }
 0x835   : > { %v2003_v62 = vpop.xlane.xlu0 %2002  ;;  %v2037_v2 = vsel %vm648_vm2, %v8344_v60, 0.0 }
 0x836   : > { %v2024_v4 = vmul.f32 1.442695, %v2010_v47  ;;  %v2011_v45 = vsub.f32 %v1976_v61, %v2003_v62  ;;  %2038 = vadd.xlane.f32.xlu0 %v2037_v2 }
 0x838   : > { %7063 = vpow2.f32 %v2024_v4  ;;  %v2026_v15 = vmul.f32 1.442695, %v2011_v45 }
 0x83a   : > { %v8348_v19 = vpop.eup %7059  ;;  %7065 = vpow2.f32 %v2026_v15 }
 0x83b   : > { %v2040_v22 = vsel %vm648_vm2, %v8348_v19, 0.0 }
 0x83c   : > { %v8352_v29 = vpop.eup %7061  ;;  %2041 = vadd.xlane.f32.xlu1 %v2040_v22 }
 0x83d   : > { %v2043_v57 = vsel %vm648_vm2, %v8352_v29, 0.0 }
 0x83e   : > { %2044 = vadd.xlane.f32.xlu0 %v2043_v57  ;;  %v6979_v57 = vld [vmem:[#allocation8 + $0x10] sm:$0xff]  }
 0x842   : > { %v8356_v31 = vpop.eup %7063 }
 0x843   : > { %v2046_v61 = vsel %vm648_vm2, %v8356_v31, 0.0 }
 0x844   : > { %v8360_v32 = vpop.eup %7065  ;;  %2047 = vadd.xlane.f32.xlu1 %v2046_v61 }
 0x845   : > { %v2049_v33 = vsel %vm648_vm2, %v8360_v32, 0.0 }
 0x846   : > { %2050 = vadd.xlane.f32.xlu0 %v2049_v33 }
 0x855   : > { %2166 = vrot.lane.b32.xlu1 %v8074_v1, %s7626_s23 }
 0x859   : > { %2213 = vrot.lane.b32.xlu1 %v8052_v44, %s7626_s23 }
 0x85c   : > { %2119 = vrot.lane.b32.xlu0 %v8064_v54, %s7626_s23 }
 0x85d   : > { %2355 = vrot.lane.b32.xlu1 %v8046_v41, %s7627_s14 }
 0x860   : > { %2357 = vrot.lane.b32.xlu0 %v8046_v41, %s7628_s24 }
 0x861   : > { %2406 = vrot.lane.b32.xlu1 %v8062_v53, %s7627_s14 }
 0x864   : > { %v1455_v34 = vpop.f32.mrb[28].mxu0  ;;  %2408 = vrot.lane.b32.xlu0 %v8062_v53, %s7628_s24 }
 0x865   : > { %v6332_v35 = vpop.f32.mrb[29].mxu0  ;;  %2510 = vrot.lane.b32.xlu1 %v8048_v42, %s7628_s24 }
 0x866   : > { %v1458_v36 = vpop.f32.mrb[30].mxu0 }
 0x867   : > { %v1606_v37 = vpack.c.bf16 %v1458_v36, %v1455_v34  ;;  %v6333_v39 = vpop.f32.mrb[31].mxu0 }
 0x868   : > { %2459 = vrot.lane.b32.xlu0 %v8072_v63, %s7628_s24 }
 0x869   : > { %6354 = vmatprep.mubr.msk.bf16.mxu0 %vm648_vm2, %v1606_v37  ;;  %2508 = vrot.lane.b32.xlu1 %v8048_v42, %s7627_s14  ;;  %v2073_v42 = vpop.permute.xlu1 %2072 }
 0x86a   : > { %6355 = vmatmul.mubr.msk.bf16.vlgmr.msra.gmra.mrb[36].mxu0 %vm648_vm2, %v1607_v12 }
 0x86b   : > { %6363 = vmatpush3.bf16.msra.mxu0 %v8329_v7 }
 0x86c   : > { %v1551_v41 = vpop.f32.mrb[32].mxu0  ;;  %2457 = vrot.lane.b32.xlu0 %v8072_v63, %s7627_s14  ;;  %6396 = vmatprep.subr.bf16.mxu0 %v7620_v17 }
 0x86d   : > { %v6344_v53 = vpop.f32.mrb[33].mxu0 }
 0x86e   : > { %v1554_v20 = vpop.f32.mrb[34].mxu0 }
 0x86f   : > { %v1608_v13 = vpack.c.bf16 %v1554_v20, %v1551_v41  ;;  %v6345_v27 = vpop.f32.mrb[35].mxu0 }
 0x871   : > { %6358 = vmatprep.mubr.msk.bf16.mxu0 %vm648_vm2, %v1608_v13 }
 0x872   : > { %6359 = vmatmul.mubr.msk.bf16.gmra.mrb[40].mxu0 %vm648_vm2, %v1609_v59 }
 0x873   : > { %6364 = vmatprep.mubr.msk.bf16.mxu0 %vm648_vm2, %v1114_v11 }
 0x87a   : > { %6365 = vmatmul.mubr.msk.bf16.vlgmr.msra.gmra.mrb[36].mxu0 %vm648_vm2, %v1115_v55 }
 0x87b   : > { %6397 = vmatpush3.bf16.msra.mxu0 %v2073_v42  ;;  %6368 = vmatprep.mubr.msk.bf16.mxu0 %vm648_vm2, %v1116_v18 }
 0x87c   : > { %6408 = vmatprep.subr.bf16.mxu0 %v7620_v17 }
 0x882   : > { %6369 = vmatmul.mubr.msk.bf16.gmra.mrb[40].mxu0 %vm648_vm2, %v1117_v8 }
 0x883   : > { %6398 = vmatprep.mubr.msk.bf16.mxu0 %vm7621_vm1, %v7620_v17 }
 0x8b9   : > { %v2030_v63 = vpop.xlane.xlu1 %2029 }
 0x8ba   : > { %7067 = vrcp.f32 %v2030_v63 }
 0x8bb   : > { %v2033_v24 = vpop.xlane.xlu0 %2032 }
 0x8bc   : > { %7069 = vrcp.f32 %v2033_v24 }
 0x8c1   : > { %v2036_v55 = vpop.xlane.xlu1 %2035 }
 0x8c3   : > { %v2039_v5 = vpop.xlane.xlu0 %2038 }
 0x8c4   : > { %v7068_v52 = vpop.eup %7067  ;;  %7071 = vrcp.f32 %v2039_v5 }
 0x8c5   : > { %v2060_v11 = vmul.f32 %v7068_v52, %v8332_v40  ;;  %7073 = vrcp.f32 %v2036_v55 }
 0x8c6   : > { %v7070_v9 = vpop.eup %7069 }
 0x8c7   : > { %v2061_v14 = vmul.f32 %v7070_v9, %v8336_v10 }
 0x8c9   : > { %v2068_v16 = vpack.c.bf16 %v2061_v14, %v2060_v11  ;;  %v2042_v3 = vpop.xlane.xlu1 %2041 }
 0x8ca   : > { %7075 = vrcp.f32 %v2042_v3 }
 0x8cb   : > { %6399 = vmatmul.mubr.msk.bf16.vlgmr.msra.gmra.mrb[44].mxu0 %vm648_vm2, %v2068_v16  ;;  %v2045_v6 = vpop.xlane.xlu0 %2044 }
 0x8cc   : > { %7077 = vrcp.f32 %v2045_v6  ;;  %6410 = vmatprep.mubr.msk.bf16.mxu0 %vm7621_vm1, %v7620_v17 }
 0x8ce   : > { %v7072_v18 = vpop.eup %7071 }
 0x8cf   : > { %v7074_v30 = vpop.eup %7073  ;;  %v2063_v51 = vmul.f32 %v7072_v18, %v8344_v60 }
 0x8d0   : > { %v2062_v7 = vmul.f32 %v7074_v30, %v8340_v28 }
 0x8d1   : > { %v2048_v8 = vpop.xlane.xlu1 %2047 }
 0x8d2   : > { %7079 = vrcp.f32 %v2048_v8  ;;  %v2069_v38 = vpack.c.bf16 %v2063_v51, %v2062_v7 }
 0x8d3   : > { %v2051_v48 = vpop.xlane.xlu0 %2050 }
 0x8d4   : > { %v7076_v12 = vpop.eup %7075  ;;  %7081 = vrcp.f32 %v2051_v48 }
 0x8d5   : > { %v2167_v58 = vpop.permute.xlu1 %2166  ;;  %v2064_v40 = vmul.f32 %v7076_v12, %v8348_v19 }
 0x8d6   : > { %v7078_v59 = vpop.eup %7077  ;;  %6409 = vmatpush3.bf16.msra.mxu0 %v2167_v58 }
 0x8d7   : > { %v2065_v10 = vmul.f32 %v7078_v59, %v8352_v29  ;;  %v2120_v46 = vpop.permute.xlu0 %2119  ;;  %6420 = vmatprep.subr.bf16.mxu0 %v6979_v57 }
 0x8d8   : > { %6403 = vmatpush3.bf16.msra.mxu1 %v2120_v46 }
 0x8d9   : > { %v2070_v21 = vpack.c.bf16 %v2065_v10, %v2064_v40  ;;  %6414 = vmatprep.subr.bf16.mxu1 %v7620_v17  ;;  %v2214_v49 = vpop.permute.xlu1 %2213 }
 0x8db   : > { %6405 = vmatmul.mubr.msk.bf16.vlgmr.msra.gmra.mrb[60].mxu1 %vm648_vm2, %v2069_v38  ;;  %6411 = vmatmul.mubr.msk.bf16.vlgmr.msra.gmra.mrb[48].mxu0 %vm648_vm2, %v2070_v21  ;;  %v2358_v60 = vpop.permute.xlu0 %2357 }
 0x8dc   : > { %v7080_v26 = vpop.eup %7079  ;;  %6415 = vmatpush3.bf16.msra.mxu1 %v2214_v49  ;;  %6416 = vmatprep.mubr.msk.bf16.mxu1 %vm7621_vm1, %v7620_v17  ;;  %v2363_v62 = vsel %vm648_vm2, %v2358_v60, 0 }
 0x8dd   : > { %6430 = vmatprep.subr.bf16.mxu1 %v7620_v17  ;;  %v2066_v50 = vmul.f32 %v7080_v26, %v8356_v31  ;;  %v2356_v2 = vpop.permute.xlu1 %2355  ;;  %6421 = vmatpush3.bf16.msra.mxu0 %v6979_v57 }
 0x8de   : > { %v7082_v28 = vpop.eup %7081  ;;  %6442 = vmatprep.subr.bf16.mxu0 %v7620_v17 }
 0x8df   : > { %v2067_v56 = vmul.f32 %v7082_v28, %v8360_v32  ;;  %v2409_v4 = vpop.permute.xlu0 %2408 }
 0x8e0   : > { %v2414_v15 = vsel %vm648_vm2, %v2409_v4, 0 }
 0x8e1   : > { %v2071_v47 = vpack.c.bf16 %v2067_v56, %v2066_v50  ;;  %v2407_v45 = vpop.permute.xlu1 %2406 }
 0x8e3   : > { %6417 = vmatmul.mubr.msk.bf16.vlgmr.msra.gmra.mrb[64].mxu1 %vm648_vm2, %v2071_v47  ;;  %v2460_v35 = vpop.permute.xlu0 %2459 }
 0x8e4   : > { %6432 = vmatprep.mubr.msk.bf16.mxu1 %vm7621_vm1, %v7620_v17  ;;  %v2465_v24 = vsel %vm648_vm2, %v2460_v35, 0 }
 0x8e5   : > { %6431 = vmatpush3.bf16.xpose.msra.mxu1 %v2363_v62  ;;  %v2511_v19 = vpop.permute.xlu1 %2510 }
 0x8e6   : > { %6436 = vmatprep.subr.bf16.mxu1 %v7620_v17  ;;  %v2516_v22 = vsel %vm648_vm2, %v2511_v19, 0 }
 0x8e7   : > { %v2458_v8 = vpop.permute.xlu0 %2457 }
 0x8e9   : > { %v2509_v29 = vpop.permute.xlu1 %2508 }
 0x8ec   : > { %6433 = vmatmul.mubr.msk.bf16.vlgmr.msra.gmra.mrb[68].mxu1 %vm648_vm2, %v2356_v2 }
 0x8ed   : > { %6437 = vmatpush3.bf16.xpose.msra.mxu1 %v2414_v15  ;;  %6438 = vmatprep.mubr.msk.bf16.mxu1 %vm7621_vm1, %v7620_v17 }
 0x8ee   : > { %6448 = vmatprep.subr.bf16.mxu1 %v7620_v17 }
 0x8f4   : > { %6439 = vmatmul.mubr.msk.bf16.vlgmr.msra.gmra.mrb[72].mxu1 %vm648_vm2, %v2407_v45 }
 0x8f5   : > { %6449 = vmatpush3.bf16.xpose.msra.mxu1 %v2516_v22  ;;  %6450 = vmatprep.mubr.msk.bf16.mxu1 %vm7621_vm1, %v7620_v17 }
 0x8f6   : > { %6460 = vmatprep.subr.bf16.mxu1 %v7620_v17 }
 0x8fc   : > { %6451 = vmatmul.mubr.msk.bf16.vlgmr.msra.gmra.mrb[76].mxu1 %vm648_vm2, %v2509_v29 }
 0x8fd   : > { %6462 = vmatprep.mubr.msk.bf16.mxu1 %vm7621_vm1, %v7620_v17 }
 0x99e   : > { %v2112_v31 = vpop.f32.mrb[44].mxu0 }
 0x99f   : > { %v6400_v61 = vpop.f32.mrb[45].mxu0 }
 0x9a0   : > { %v2115_v32 = vpop.f32.mrb[46].mxu0 }
 0x9a1   : > { %v2260_v33 = vpack.c.bf16 %v2115_v32, %v2112_v31  ;;  %v6401_v34 = vpop.f32.mrb[47].mxu0 }
 0x9a3   : > { %6422 = vmatprep.mubr.msk.bf16.mxu0 %vm648_vm2, %v2260_v33 }
 0x9ae   : > { %v2159_v36 = vpop.f32.mrb[60].mxu1  ;;  %v2206_v37 = vpop.f32.mrb[48].mxu0 }
 0x9af   : > { %v6406_v39 = vpop.f32.mrb[61].mxu1  ;;  %v6412_v41 = vpop.f32.mrb[49].mxu0 }
 0x9b0   : > { %v2162_v53 = vpop.f32.mrb[62].mxu1  ;;  %v2209_v20 = vpop.f32.mrb[50].mxu0 }
 0x9b1   : > { %v2261_v13 = vpack.c.bf16 %v2162_v53, %v2159_v36  ;;  %v2262_v27 = vpack.c.bf16 %v2209_v20, %v2206_v37  ;;  %v6407_v42 = vpop.f32.mrb[63].mxu1  ;;  %v6413_v63 = vpop.f32.mrb[51].mxu0 }
 0x9b3   : > { %6423 = vmatmul.mubr.msk.bf16.vlgmr.msra.gmra.mrb[36].mxu0 %vm648_vm2, %v2261_v13 }
 0x9b4   : > { %6443 = vmatpush3.bf16.xpose.msra.mxu0 %v2465_v24  ;;  %6426 = vmatprep.mubr.msk.bf16.mxu0 %vm648_vm2, %v2262_v27 }
 0x9b5   : > { %6454 = vmatprep.subr.bf16.mxu0 %v7620_v17 }
 0x9b6   : > { %v2253_v52 = vpop.f32.mrb[64].mxu1 }
 0x9b7   : > { %v6418_v55 = vpop.f32.mrb[65].mxu1 }
 0x9b8   : > { %v2256_v5 = vpop.f32.mrb[66].mxu1 }
 0x9b9   : > { %v2263_v9 = vpack.c.bf16 %v2256_v5, %v2253_v52  ;;  %v6419_v11 = vpop.f32.mrb[67].mxu1 }
 0x9bb   : > { %6427 = vmatmul.mubr.msk.bf16.gmra.mrb[40].mxu0 %vm648_vm2, %v2263_v9 }
 0x9bc   : > { %6444 = vmatprep.mubr.msk.bf16.mxu0 %vm7621_vm1, %v7620_v17 }
 0x9bf   : > { %v2399_v14 = vpop.f32.mrb[68].mxu1 }
 0x9c0   : > { %v6434_v16 = vpop.f32.mrb[69].mxu1  ;;  %v2559_v3 = vsel %vm648_vm2, %v2399_v14, -inf }
 0x9c1   : > { %2560 = vmax.xlane.f32.xlu0 %v2559_v3  ;;  %v2402_v6 = vpop.f32.mrb[70].mxu1 }
 0x9c2   : > { %v6435_v18 = vpop.f32.mrb[71].mxu1  ;;  %v2562_v30 = vsel %vm648_vm2, %v2402_v6, -inf }
 0x9c3   : > { %6445 = vmatmul.mubr.msk.bf16.vlgmr.msra.gmra.mrb[52].mxu0 %vm648_vm2, %v2458_v8  ;;  %2563 = vmax.xlane.f32.xlu1 %v2562_v30 }
 0x9c4   : > { %6456 = vmatprep.mubr.msk.bf16.mxu0 %vm7621_vm1, %v7620_v17 }
 0x9c7   : > { %v2450_v48 = vpop.f32.mrb[72].mxu1 }
 0x9c8   : > { %v6440_v12 = vpop.f32.mrb[73].mxu1  ;;  %v2565_v51 = vsel %vm648_vm2, %v2450_v48, -inf }
 0x9c9   : > { %2566 = vmax.xlane.f32.xlu0 %v2565_v51  ;;  %v2453_v58 = vpop.f32.mrb[74].mxu1 }
 0x9ca   : > { %v6441_v59 = vpop.f32.mrb[75].mxu1  ;;  %v2568_v7 = vsel %vm648_vm2, %v2453_v58, -inf }
 0x9cd   : > { %2569 = vmax.xlane.f32.xlu0 %v2568_v7 }
 0x9cf   : > { %v2552_v40 = vpop.f32.mrb[76].mxu1 }
 0x9d0   : > { %v6452_v10 = vpop.f32.mrb[77].mxu1  ;;  %v2577_v61 = vsel %vm648_vm2, %v2552_v40, -inf }
 0x9d1   : > { %v2555_v46 = vpop.f32.mrb[78].mxu1 }
 0x9d2   : > { %v6453_v38 = vpop.f32.mrb[79].mxu1  ;;  %v2580_v33 = vsel %vm648_vm2, %v2555_v46, -inf }
 0xa4e   : > { %v2561_v21 = vpop.xlane.xlu0 %2560 }
 0xa4f   : > { %v2583_v28 = vsub.f32 %v2399_v14, %v2561_v21 }
 0xa50   : > { %v2564_v26 = vpop.xlane.xlu1 %2563 }
 0xa51   : > { %v2584_v50 = vsub.f32 %v2402_v6, %v2564_v26  ;;  %v2591_v60 = vmul.f32 1.442695, %v2583_v28 }
 0xa53   : > { %v2593_v62 = vmul.f32 1.442695, %v2584_v50  ;;  %7083 = vpow2.f32 %v2591_v60 }
 0xa55   : > { %7085 = vpow2.f32 %v2593_v62 }
 0xa56   : > { %v2567_v49 = vpop.xlane.xlu0 %2566 }
 0xa57   : > { %v2585_v47 = vsub.f32 %v2450_v48, %v2567_v49 }
 0xa59   : > { %v2595_v4 = vmul.f32 1.442695, %v2585_v47 }
 0xa5a   : > { %v2570_v56 = vpop.xlane.xlu0 %2569 }
 0xa5b   : > { %v2586_v2 = vsub.f32 %v2453_v58, %v2570_v56  ;;  %7087 = vpow2.f32 %v2595_v4 }
 0xa5d   : > { %v2597_v45 = vmul.f32 1.442695, %v2586_v2  ;;  %v7084_v32 = vpop.eup %7083 }
 0xa5e   : > { %v2607_v35 = vsel %vm648_vm2, %v7084_v32, 0.0 }
 0xa5f   : > { %7089 = vpow2.f32 %v2597_v45  ;;  %v7086_v34 = vpop.eup %7085 }
 0xa60   : > { %v2610_v37 = vsel %vm648_vm2, %v7086_v34, 0.0 }
 0xa65   : > { %v8473_v36 = vpop.eup %7087 }
 0xa66   : > { %v2613_v41 = vsel %vm648_vm2, %v8473_v36, 0.0 }
 0xa69   : > { %v7090_v39 = vpop.eup %7089 }
 0xa6a   : > { %v2616_v53 = vsel %vm648_vm2, %v7090_v39, 0.0 }
 0xa96   : > { %v2501_v15 = vpop.f32.mrb[52].mxu0 }
 0xa97   : > { %v6446_v19 = vpop.f32.mrb[53].mxu0  ;;  %v2571_v22 = vsel %vm648_vm2, %v2501_v15, -inf }
 0xa98   : > { %v2504_v29 = vpop.f32.mrb[54].mxu0  ;;  %2572 = vmax.xlane.f32.xlu1 %v2571_v22 }
 0xa99   : > { %v6447_v57 = vpop.f32.mrb[55].mxu0  ;;  %v2574_v31 = vsel %vm648_vm2, %v2504_v29, -inf }
 0xa9a   : > { %2575 = vmax.xlane.f32.xlu0 %v2574_v31 }
 0xa9c   : > { %2578 = vmax.xlane.f32.xlu1 %v2577_v61 }
 0xa9e   : > { %2581 = vmax.xlane.f32.xlu0 %v2580_v33  ;;  %v6980_v33 = vld [vmem:[#allocation8 + $0x18] sm:$0xff]  }
 0xaa0   : > { %2608 = vadd.xlane.f32.xlu1 %v2607_v35 }
 0xaa2   : > { %2611 = vadd.xlane.f32.xlu0 %v2610_v37 }
 0xaa4   : > { %2614 = vadd.xlane.f32.xlu1 %v2613_v41 }
 0xaa6   : > { %2617 = vadd.xlane.f32.xlu0 %v2616_v53 }
 0xb25   : > { %v2573_v20 = vpop.xlane.xlu1 %2572 }
 0xb26   : > { %v2587_v18 = vsub.f32 %v2501_v15, %v2573_v20 }
 0xb27   : > { %v2576_v13 = vpop.xlane.xlu0 %2575 }
 0xb28   : > { %v2588_v42 = vsub.f32 %v2504_v29, %v2576_v13  ;;  %v2599_v30 = vmul.f32 1.442695, %v2587_v18  ;;  %v6983_v18 = vld [vmem:[#allocation14] sm:$0xff]  }
 0xb29   : > { %v2579_v27 = vpop.xlane.xlu1 %2578 }
 0xb2a   : > { %v2589_v63 = vsub.f32 %v2552_v40, %v2579_v27  ;;  %v2601_v5 = vmul.f32 1.442695, %v2588_v42 }
 0xb2b   : > { %v2582_v24 = vpop.xlane.xlu0 %2581 }
 0xb2c   : > { %v2603_v52 = vmul.f32 1.442695, %v2589_v63  ;;  %v2590_v55 = vsub.f32 %v2555_v46, %v2582_v24 }
 0xb2d   : > { %v2609_v58 = vpop.xlane.xlu1 %2608 }
 0xb2e   : > { %7091 = vpow2.f32 %v2603_v52  ;;  %v2605_v9 = vmul.f32 1.442695, %v2590_v55 }
 0xb2f   : > { %v2612_v51 = vpop.xlane.xlu0 %2611 }
 0xb30   : > { %7093 = vpow2.f32 %v2605_v9 }
 0xb31   : > { %7095 = vpow2.f32 %v2601_v5  ;;  %v2615_v59 = vpop.xlane.xlu1 %2614 }
 0xb32   : > { %7097 = vpow2.f32 %v2599_v30  ;;  %v6984_v30 = vld [vmem:[#allocation14 + $0x8] sm:$0xff]  }
 0xb33   : > { %7099 = vrcp.f32 %v2612_v51  ;;  %v7244_v51 = vld [vmem:[%s7990_s27] sm:$0xff] }
 0xb34   : > { %7101 = vrcp.f32 %v2609_v58 }
 0xb38   : > { %v7092_v11 = vpop.eup %7091 }
 0xb39   : > { %v2625_v14 = vsel %vm648_vm2, %v7092_v11, 0.0 }
 0xb3a   : > { %v7094_v16 = vpop.eup %7093  ;;  %2626 = vadd.xlane.f32.xlu1 %v2625_v14 }
 0xb3b   : > { %v2628_v3 = vsel %vm648_vm2, %v7094_v16, 0.0  ;;  %v7096_v6 = vpop.eup %7095 }
 0xb3c   : > { %2629 = vadd.xlane.f32.xlu0 %v2628_v3  ;;  %v2622_v8 = vsel %vm648_vm2, %v7096_v6, 0.0  ;;  %v7098_v48 = vpop.eup %7097  ;;  %v6981_v3 = vld [vmem:[#allocation11] sm:$0xff]  }
 0xb3d   : > { %v2619_v12 = vsel %vm648_vm2, %v7098_v48, 0.0 }
 0xb40   : > { %2623 = vadd.xlane.f32.xlu0 %v2622_v8  ;;  %v7243_v8 = vld [vmem:[#allocation5 + $0x4] ss:$8 sps:$4 sm:$0xff]  }
 0xb4b   : > { %2651 = vrot.lane.b32.xlu1 %v8050_v43, %s7627_s14  ;;  %v2618_v43 = vpop.xlane.xlu0 %2617 }
 0xb4c   : > { %7103 = vrcp.f32 %v2618_v43 }
 0xb4d   : > { %7105 = vrcp.f32 %v2615_v59  ;;  %v5916_v59 = vld [vmem:[#allocation10] ss:$0 sm:$0xff] }
 0xb56   : > { %2698 = vrot.lane.b32.xlu0 %v8064_v54, %s7627_s14  ;;  %v7100_v54 = vpop.eup %7099 }
 0xb57   : > { %v7102_v40 = vpop.eup %7101  ;;  %v2640_v10 = vmul.f32 %v7100_v54, %v7086_v34  ;;  %v7245_v54 = vld [vmem:[%s7990_s27 + $0x10] sm:$0xff] }
 0xb58   : > { %v2639_v38 = vmul.f32 %v7102_v40, %v7084_v32  ;;  %v7104_v49 = vpop.eup %7103  ;;  %v7246_v40 = vld [vmem:[%s7990_s27 + $0x18] sm:$0xff] }
 0xb59   : > { %v2642_v28 = vmul.f32 %v7104_v49, %v7090_v39 }
 0xb5a   : > { %v2647_v26 = vpack.c.bf16 %v2640_v10, %v2639_v38  ;;  %v7247_v38 = vld [vmem:[%s7990_s27 + $0x8] sm:$0xff] }
 0xb6f   : > { %2620 = vadd.xlane.f32.xlu1 %v2619_v12 }
 0xb80   : > { %2745 = vrot.lane.b32.xlu1 %v8074_v1, %s7627_s14 }
 0xb84   : > { %2792 = vrot.lane.b32.xlu1 %v8052_v44, %s7627_s14  ;;  %v7106_v44 = vpop.eup %7105 }
 0xb85   : > { %v2641_v50 = vmul.f32 %v7106_v44, %v8473_v36 }
 0xb87   : > { %v2648_v60 = vpack.c.bf16 %v2642_v28, %v2641_v50 }
 0xbc7   : > { %v2627_v7 = vpop.xlane.xlu1 %2626 }
 0xbc9   : > { %v2630_v46 = vpop.xlane.xlu0 %2629 }
 0xbca   : > { %7107 = vrcp.f32 %v2630_v46 }
 0xbcb   : > { %v2652_v21 = vpop.permute.xlu1 %2651  ;;  %7109 = vrcp.f32 %v2627_v7 }
 0xbcc   : > { %6455 = vmatpush3.bf16.msra.mxu0 %v2652_v21 }
 0xbcd   : > { %v2624_v1 = vpop.xlane.xlu0 %2623  ;;  %6466 = vmatprep.subr.bf16.mxu0 %v7620_v17 }
 0xbce   : > { %7111 = vrcp.f32 %v2624_v1 }
 0xbcf   : > { %6457 = vmatmul.mubr.msk.bf16.vlgmr.msra.gmra.mrb[56].mxu0 %vm648_vm2, %v2647_v26 }
 0xbd0   : > { %6468 = vmatprep.mubr.msk.bf16.mxu0 %vm7621_vm1, %v7620_v17 }
 0xbd1   : > { %v2699_v56 = vpop.permute.xlu0 %2698 }
 0xbd2   : > { %6461 = vmatpush3.bf16.msra.mxu1 %v2699_v56  ;;  %v7248_v56 = vld [vmem:[#allocation5] ss:$8 sps:$4 sm:$0xff]  }
 0xbd3   : > { %6472 = vmatprep.subr.bf16.mxu1 %v7620_v17 }
 0xbd4   : > { %v7108_v62 = vpop.eup %7107 }
 0xbd5   : > { %6463 = vmatmul.mubr.msk.bf16.vlgmr.msra.gmra.mrb[80].mxu1 %vm648_vm2, %v2648_v60  ;;  %v7110_v4 = vpop.eup %7109  ;;  %v2646_v45 = vmul.f32 %v7108_v62, %v7094_v16  ;;  %v7249_v60 = vld [vmem:[#allocation5 + $0x14] ss:$8 sps:$4 sm:$0xff]  }
 0xbd6   : > { %6474 = vmatprep.mubr.msk.bf16.mxu1 %vm7621_vm1, %v7620_v17  ;;  %v2645_v15 = vmul.f32 %v7110_v4, %v7092_v11  ;;  %v7251_v4 = vld [vmem:[%s7990_s27 + $0x20] sm:$0xff] }
 0xbd8   : > { %v7112_v22 = vpop.eup %7111  ;;  %v2650_v29 = vpack.c.bf16 %v2646_v45, %v2645_v15 }
 0xbd9   : > { %v2644_v31 = vmul.f32 %v7112_v22, %v7096_v6  ;;  %v6982_v6 = vld [vmem:[#allocation11 + $0x8] sm:$0xff]  }
 0xbfc   : > { %v2621_v47 = vpop.xlane.xlu1 %2620 }
 0xbfd   : > { %7113 = vrcp.f32 %v2621_v47  ;;  %v7250_v47 = vld [vmem:[#allocation5 + $0x10] ss:$8 sps:$4 sm:$0xff]  }
 0xc00   : > { %v2746_v2 = vpop.permute.xlu1 %2745 }
 0xc01   : > { %6467 = vmatpush3.bf16.msra.mxu0 %v2746_v2 }
 0xc02   : > { %6478 = vmatprep.subr.bf16.mxu0 %v6980_v33 }
 0xc04   : > { %v2793_v19 = vpop.permute.xlu1 %2792 }
 0xc05   : > { %6473 = vmatpush3.bf16.msra.mxu1 %v2793_v19  ;;  %v7252_v19 = vld [vmem:[%s7990_s27 + $0x30] sm:$0xff] }
 0xc06   : > { %6488 = vmatprep.subr.bf16.mxu1 %v6981_v3 }
 0xc07   : > { %v7114_v57 = vpop.eup %7113 }
 0xc08   : > { %v2643_v61 = vmul.f32 %v7114_v57, %v7098_v48  ;;  %6475 = vmatmul.mubr.msk.bf16.vlgmr.msra.gmra.mrb[84].mxu1 %vm648_vm2, %v2650_v29  ;;  %v7253_v29 = vld [vmem:[%s7990_s27 + $0x38] sm:$0xff] }
 0xc09   : > { %6489 = vmatpush3.bf16.msra.mxu1 %v6981_v3 }
 0xc0a   : > { %v2649_v32 = vpack.c.bf16 %v2644_v31, %v2643_v61  ;;  %6490 = vmatprep.subr.bf16.mxu1 %v6982_v6  ;;  %v7254_v61 = vld [vmem:[%s7990_s27 + $0x28] sm:$0xff]  ;;  %s9203_s27 = sld [smem:[#allocation25_spill]] }
 0xc0c   : > { %6469 = vmatmul.mubr.msk.bf16.vlgmr.msra.gmra.mrb[60].mxu0 %vm648_vm2, %v2649_v32 }
 0xc0d   : > { %6479 = vmatpush3.bf16.msra.mxu0 %v6980_v33  ;;  %6491 = vmatpush3.bf16.msra.mxu1 %v6982_v6 }
 0xc0e   : > { %3181 = vmatprep.subr.bf16.mxu1 %v7243_v8  ;;  %6500 = vmatprep.subr.bf16.mxu0 %v6983_v18 }
 0xca2   : > { %v2691_v34 = vpop.f32.mrb[56].mxu0 }
 0xca3   : > { %v6458_v35 = vpop.f32.mrb[57].mxu0 }
 0xca4   : > { %v2694_v36 = vpop.f32.mrb[58].mxu0 }
 0xca5   : > { %v2839_v37 = vpack.c.bf16 %v2694_v36, %v2691_v34  ;;  %v6459_v39 = vpop.f32.mrb[59].mxu0 }
 0xca7   : > { %6480 = vmatprep.mubr.msk.bf16.mxu0 %vm648_vm2, %v2839_v37 }
 0xca8   : > { %v2738_v41 = vpop.f32.mrb[80].mxu1 }
 0xca9   : > { %v6464_v53 = vpop.f32.mrb[81].mxu1 }
 0xcaa   : > { %v2741_v20 = vpop.f32.mrb[82].mxu1  ;;  %v6986_v53 = vld [vmem:[#allocation14 + $0x18] sm:$0xff]  }
 0xcab   : > { %v2840_v13 = vpack.c.bf16 %v2741_v20, %v2738_v41  ;;  %v6465_v27 = vpop.f32.mrb[83].mxu1  ;;  %v6985_v41 = vld [vmem:[#allocation14 + $0x10] sm:$0xff]   ;;  %v5917_v20 = vld [vmem:[#allocation13] ss:$0 sm:$0xff] }
 0xcad   : > { %6481 = vmatmul.mubr.msk.bf16.vlgmr.msra.gmra.mrb[36].mxu0 %vm648_vm2, %v2840_v13 }
 0xcae   : > { %6501 = vmatpush3.bf16.msra.mxu0 %v6983_v18 }
 0xcaf   : > { %6502 = vmatprep.subr.bf16.mxu0 %v6984_v30 }
 0xcb2   : > { %6503 = vmatpush3.bf16.msra.mxu0 %v6984_v30 }
 0xcb3   : > { %6504 = vmatprep.subr.bf16.mxu0 %v6985_v41 }
 0xcb6   : > { %6505 = vmatpush3.bf16.msra.mxu0 %v6985_v41 }
 0xcb7   : > { %6506 = vmatprep.subr.bf16.mxu0 %v6986_v53 }
 0xcba   : > { %6507 = vmatpush3.bf16.msra.mxu0 %v6986_v53 }
 0xcbb   : > { %6516 = vmatprep.subr.bf16.mxu0 %v7620_v17 }
 0xcdb   : > { %v2832_v42 = vpop.f32.mrb[84].mxu1 }
 0xcdc   : > { %v6476_v63 = vpop.f32.mrb[85].mxu1 }
 0xcdd   : > { %v2835_v24 = vpop.f32.mrb[86].mxu1 }
 0xcde   : > { %v2842_v52 = vpack.c.bf16 %v2835_v24, %v2832_v42  ;;  %v6477_v55 = vpop.f32.mrb[87].mxu1 }
 0xcdf   : > { %v2785_v5 = vpop.f32.mrb[60].mxu0 }
 0xce0   : > { %v6470_v9 = vpop.f32.mrb[61].mxu0 }
 0xce1   : > { %v2788_v11 = vpop.f32.mrb[62].mxu0 }
 0xce2   : > { %v2841_v14 = vpack.c.bf16 %v2788_v11, %v2785_v5  ;;  %v6471_v16 = vpop.f32.mrb[63].mxu0 }
 0xce4   : > { %6484 = vmatprep.mubr.msk.bf16.mxu0 %vm648_vm2, %v2841_v14 }
 0xce5   : > { %6485 = vmatmul.mubr.msk.bf16.gmra.mrb[40].mxu0 %vm648_vm2, %v2842_v52 }
 0xd80   : > { %v6482_v48 = vpop.f32.mrb[36].mxu0 }
 0xd81   : > { %v2895_v12 = vpop.f32.mrb[37].mxu0  ;;  %v2936_v7 = vadd.f32 %v7245_v54, %v6482_v48 }
 0xd82   : > { %v2934_v58 = vadd.f32 %v7244_v51, %v2895_v12  ;;  %v6483_v43 = vpop.f32.mrb[38].mxu0 }
 0xd83   : > { %v2937_v10 = vadd.f32 %v7246_v40, %v6483_v43  ;;  %v2898_v46 = vpop.f32.mrb[39].mxu0  ;;  %v8516_v44 = vadd.f32 %v5916_v59, %v2936_v7 }
 0xd84   : > { %v2935_v21 = vadd.f32 %v7247_v38, %v2898_v46  ;;  %v8512_v1 = vadd.f32 %v5916_v59, %v2934_v58  ;;  %v5918_v38 = vld [vmem:[#allocation16] ss:$0 sm:$0xff] }
 0xd85   : > { %v8510_v49 = vadd.f32 %v5916_v59, %v2937_v10 }
 0xd86   : > { %v8514_v26 = vadd.f32 %v5916_v59, %v2935_v21 }
 0xd87   : > { %v2951_v50 = vpack.c.bf16 %v8510_v49, %v8516_v44 }
 0xd88   : > { %v2950_v28 = vpack.c.bf16 %v8514_v26, %v8512_v1 }
 0xd8a   : > { %6492 = vmatprep.mubr.msk.bf16.mxu1 %vm551_vm0, %v2950_v28 }
 0xd8b   : > { %6493 = vmatmul.mubr.msk.bf16.vlgmr.msra.gmra.mrb[88].mxu1 %vm551_vm0, %v2951_v50 }
 0xd8c   : > { %3182 = vmatpush1.bf16.msra.mxu1 %v7248_v56 }
 0xd8d   : > { %3183 = vmatprep.subr.bf16.mxu1 %v7249_v60 }
 0xd90   : > { %3184 = vmatpush1.bf16.msra.mxu1 %v7250_v47 }
 0xd91   : > { %6534 = vmatprep.subr.bf16.mxu1 %v7620_v17 }
 0xdb8   : > { %v6486_v62 = vpop.f32.mrb[40].mxu0 }
 0xdb9   : > { %v2911_v2 = vpop.f32.mrb[41].mxu0  ;;  %v2940_v22 = vadd.f32 %v7252_v19, %v6486_v62 }
 0xdba   : > { %v2938_v45 = vadd.f32 %v7251_v4, %v2911_v2  ;;  %v6487_v15 = vpop.f32.mrb[42].mxu0 }
 0xdbb   : > { %v2941_v57 = vadd.f32 %v7253_v29, %v6487_v15  ;;  %v2914_v31 = vpop.f32.mrb[43].mxu0  ;;  %v8535_v36 = vadd.f32 %v5916_v59, %v2940_v22 }
 0xdbc   : > { %v2939_v32 = vadd.f32 %v7254_v61, %v2914_v31  ;;  %v8531_v34 = vadd.f32 %v5916_v59, %v2938_v45 }
 0xdbd   : > { %v8529_v33 = vadd.f32 %v5916_v59, %v2941_v57 }
 0xdbe   : > { %v8533_v35 = vadd.f32 %v5916_v59, %v2939_v32 }
 0xdbf   : > { %v2953_v39 = vpack.c.bf16 %v8529_v33, %v8535_v36 }
 0xdc0   : > { %v2952_v37 = vpack.c.bf16 %v8533_v35, %v8531_v34 }
 0xdc2   : > { %6496 = vmatprep.mubr.msk.bf16.mxu1 %vm551_vm0, %v2952_v37 }
 0xdc3   : > { %6497 = vmatmul.mubr.msk.bf16.gmra.mrb[92].mxu1 %vm551_vm0, %v2953_v39 }
 0xdc4   : > { %3213 = vmatprep.mubr.bf16.mxu1 %v7619_v0 }
 0xe5e   : > { %v6494_v13 = vpop.f32.mrb[88].mxu1 }
 0xe5f   : > { %v3021_v27 = vadd.f32 %v6494_v13, %v5917_v20  ;;  %v3012_v42 = vpop.f32.mrb[89].mxu1 }
 0xe60   : > { %v3013_v63 = vadd.f32 %v5917_v20, %v3012_v42  ;;  %v6495_v24 = vpop.f32.mrb[90].mxu1 }
 0xe61   : > { %v3024_v52 = vadd.f32 %v6495_v24, %v5917_v20  ;;  %v3015_v55 = vpop.f32.mrb[91].mxu1  ;;  %v3045_v9 = vmax.f32 %v3021_v27, 0.0 }
 0xe62   : > { %v3016_v5 = vadd.f32 %v5917_v20, %v3015_v55  ;;  %v3043_v14 = vmax.f32 %v3013_v63, 0.0 }
 0xe63   : > { %v3046_v11 = vmax.f32 %v3024_v52, 0.0 }
 0xe64   : > { %v3044_v16 = vmax.f32 %v3016_v5, 0.0 }
 0xe65   : > { %v3052_v3 = vpack.c.bf16 %v3046_v11, %v3045_v9 }
 0xe66   : > { %v3051_v6 = vpack.c.bf16 %v3044_v16, %v3043_v14 }
 0xe68   : > { %6508 = vmatprep.mubr.msk.bf16.mxu0 %vm3079_vm3, %v3051_v6 }
 0xe69   : > { %6509 = vmatmul.mubr.msk.bf16.vlgmr.msra.gmra.mrb[64].mxu0 %vm3079_vm3, %v3052_v3 }
 0xe96   : > { %v6498_v8 = vpop.f32.mrb[92].mxu1 }
 0xe97   : > { %v3037_v18 = vadd.f32 %v6498_v8, %v5917_v20  ;;  %v3028_v30 = vpop.f32.mrb[93].mxu1 }
 0xe98   : > { %v3029_v48 = vadd.f32 %v5917_v20, %v3028_v30  ;;  %v6499_v12 = vpop.f32.mrb[94].mxu1 }
 0xe99   : > { %v3040_v51 = vadd.f32 %v6499_v12, %v5917_v20  ;;  %v3031_v58 = vpop.f32.mrb[95].mxu1  ;;  %v3049_v59 = vmax.f32 %v3037_v18, 0.0 }
 0xe9a   : > { %v3032_v43 = vadd.f32 %v5917_v20, %v3031_v58  ;;  %v3047_v7 = vmax.f32 %v3029_v48, 0.0 }
 0xe9b   : > { %v3050_v54 = vmax.f32 %v3040_v51, 0.0 }
 0xe9c   : > { %v3048_v40 = vmax.f32 %v3032_v43, 0.0 }
 0xe9d   : > { %v3054_v10 = vpack.c.bf16 %v3050_v54, %v3049_v59 }
 0xe9e   : > { %v3053_v46 = vpack.c.bf16 %v3048_v40, %v3047_v7 }
 0xea0   : > { %6512 = vmatprep.mubr.msk.bf16.mxu0 %vm3079_vm3, %v3053_v46 }
 0xea1   : > { %6513 = vmatmul.mubr.msk.bf16.gmra.mrb[68].mxu0 %vm3079_vm3, %v3054_v10 }
 0xea2   : > { %6518 = vmatprep.mubr.msk.bf16.mxu0 %vm7621_vm1, %v7620_v17 }
 0xf3c   : > { %v6510_v21 = vpop.f32.mrb[64].mxu0 }
 0xf3d   : > { %v3126_v28 = vpop.f32.mrb[65].mxu0  ;;  %v3135_v15 = vadd.f32 %v6510_v21, %v5918_v38 }
 0xf3e   : > { %v3127_v50 = vadd.f32 %v5918_v38, %v3126_v28  ;;  %v6511_v56 = vpop.f32.mrb[66].mxu0 }
 0xf3f   : > { %v3129_v60 = vpop.f32.mrb[67].mxu0  ;;  %v3138_v4 = vadd.f32 %v6511_v56, %v5918_v38  ;;  %v8565_v22 = vadd.f32 %v3135_v15, %v8516_v44 }
 0xf40   : > { %v3130_v47 = vadd.f32 %v5918_v38, %v3129_v60  ;;  %v8552_v62 = vadd.f32 %v3127_v50, %v8512_v1 }
 0xf41   : > { %v8562_v19 = vadd.f32 %v3138_v4, %v8510_v49 }
 0xf42   : > { %v8555_v2 = vadd.f32 %v3130_v47, %v8514_v26 }
 0xf43   : > { %v3166_v1 = vpack.c.bf16 %v8562_v19, %v8565_v22 }
 0xf44   : > { %v3165_v45 = vpack.c.bf16 %v8555_v2, %v8552_v62 }
 0xf46   : > { %5993 = vmatmul.mubr.msk.bf16.vlgmr.msra.gmra.mrb[96].mxu1 %vm551_vm0, %v3165_v45 }
 0xf47   : > { %3223 = vmatprep.mubr.bf16.mxu1 %v7619_v0 }
 0xf4e   : > { %5994 = vmatmul.mubr.msk.bf16.gmra.mrb[100].mxu1 %vm551_vm0, %v3166_v1 }
 0xf4f   : > { %3233 = vmatprep.mubr.bf16.mxu1 %v7619_v0 }
 0xf74   : > { %v6514_v26 = vpop.f32.mrb[68].mxu0 }
 0xf75   : > { %v3142_v29 = vpop.f32.mrb[69].mxu0  ;;  %v3151_v41 = vadd.f32 %v6514_v26, %v5918_v38 }
 0xf76   : > { %v3143_v57 = vadd.f32 %v5918_v38, %v3142_v29  ;;  %v6515_v31 = vpop.f32.mrb[70].mxu0 }
 0xf77   : > { %v3145_v61 = vpop.f32.mrb[71].mxu0  ;;  %v3154_v44 = vadd.f32 %v6515_v31, %v5918_v38  ;;  %v8585_v20 = vadd.f32 %v3151_v41, %v8535_v36 }
 0xf78   : > { %v3146_v32 = vadd.f32 %v5918_v38, %v3145_v61  ;;  %v8572_v37 = vadd.f32 %v3143_v57, %v8531_v34 }
 0xf79   : > { %v8582_v53 = vadd.f32 %v3154_v44, %v8529_v33 }
 0xf7a   : > { %v8575_v49 = vadd.f32 %v3146_v32, %v8533_v35 }
 0xf7b   : > { %v3168_v34 = vpack.c.bf16 %v8582_v53, %v8585_v20 }
 0xf7c   : > { %v3167_v39 = vpack.c.bf16 %v8575_v49, %v8572_v37 }
 0xf7e   : > { %5995 = vmatmul.mubr.msk.bf16.gmra.mrb[104].mxu1 %vm551_vm0, %v3167_v39 }
 0xf7f   : > { %3243 = vmatprep.mubr.bf16.mxu1 %v7619_v0 }
 0xf86   : > { %5996 = vmatmul.mubr.msk.bf16.gmra.mrb[108].mxu1 %vm551_vm0, %v3168_v34 }
 0xf87   : > { %6536 = vmatprep.mubr.msk.bf16.mxu1 %vm7621_vm1, %v7620_v17 }
0x1019   : > { %v3215_v35 = vpop.f32.mrb[96].mxu1 }
0x101a   : > { %v3217_v13 = vpop.f32.mrb[97].mxu1  ;;  %v3216_v42 = vadd.f32 %v3215_v35, %v8034_v23 }
0x101b   : > { %v3219_v27 = vpop.f32.mrb[98].mxu1  ;;  %v3218_v63 = vadd.f32 %v3217_v13, %v8036_v25 }
0x101c   : > { %v3220_v0 = vadd.f32 %v3219_v27, %v8034_v23  ;;  %v3221_v33 = vpop.f32.mrb[99].mxu1 }
0x101d   : > { %v3222_v36 = vadd.f32 %v3221_v33, %v8036_v25 }
0x101e   : > { %v8596_v24 = vpack.c.bf16 %v3220_v0, %v3216_v42 }
0x101f   : > { %v8598_v52 = vpack.c.bf16 %v3222_v36, %v3218_v63 }
0x1020   : > { %3263 = vrot.lane.b32.xlu0 %v8596_v24, %s7622_s16 }
0x1021   : > { %v3225_v55 = vpop.f32.mrb[100].mxu1 }
0x1022   : > { %v3227_v5 = vpop.f32.mrb[101].mxu1  ;;  %v3226_v11 = vadd.f32 %v3225_v55, %v8034_v23 }
0x1023   : > { %v3229_v9 = vpop.f32.mrb[102].mxu1  ;;  %v3228_v3 = vadd.f32 %v3227_v5, %v8036_v25 }
0x1024   : > { %v3230_v14 = vadd.f32 %v3229_v9, %v8034_v23  ;;  %v3231_v16 = vpop.f32.mrb[103].mxu1 }
0x1025   : > { %v3232_v6 = vadd.f32 %v3231_v16, %v8036_v25 }
0x1026   : > { %v8606_v8 = vpack.c.bf16 %v3230_v14, %v3226_v11 }
0x1027   : > { %v8608_v18 = vpack.c.bf16 %v3232_v6, %v3228_v3 }
0x1028   : > { %3313 = vrot.lane.b32.xlu1 %v8606_v8, %s7622_s16 }
0x1051   : > { %v3235_v30 = vpop.f32.mrb[104].mxu1 }
0x1052   : > { %v3237_v48 = vpop.f32.mrb[105].mxu1  ;;  %v3236_v51 = vadd.f32 %v3235_v30, %v8034_v23 }
0x1053   : > { %v3239_v12 = vpop.f32.mrb[106].mxu1  ;;  %v3238_v59 = vadd.f32 %v3237_v48, %v8036_v25 }
0x1054   : > { %v3240_v58 = vadd.f32 %v3239_v12, %v8034_v23  ;;  %v3241_v43 = vpop.f32.mrb[107].mxu1 }
0x1055   : > { %v3242_v54 = vadd.f32 %v3241_v43, %v8036_v25 }
0x1056   : > { %v8616_v7 = vpack.c.bf16 %v3240_v58, %v3236_v51 }
0x1057   : > { %v8618_v40 = vpack.c.bf16 %v3242_v54, %v3238_v59 }
0x1058   : > { %3363 = vrot.lane.b32.xlu1 %v8616_v7, %s7622_s16 }
0x1059   : > { %v3245_v10 = vpop.f32.mrb[108].mxu1 }
0x105a   : > { %v3247_v46 = vpop.f32.mrb[109].mxu1  ;;  %v3246_v21 = vadd.f32 %v3245_v10, %v8034_v23 }
0x105b   : > { %v3249_v38 = vpop.f32.mrb[110].mxu1  ;;  %v3248_v56 = vadd.f32 %v3247_v46, %v8036_v25 }
0x105c   : > { %v3250_v28 = vadd.f32 %v3249_v38, %v8034_v23  ;;  %v3251_v50 = vpop.f32.mrb[111].mxu1 }
0x105d   : > { %v3252_v60 = vadd.f32 %v3251_v50, %v8036_v25 }
0x105e   : > { %v8626_v47 = vpack.c.bf16 %v3250_v28, %v3246_v21 }
0x105f   : > { %v8628_v4 = vpack.c.bf16 %v3252_v60, %v3248_v56 }
0x1060   : > { %3413 = vrot.lane.b32.xlu0 %v8626_v47, %s7622_s16  ;;  %s9114_s16 = scalar_lea.hbm %s9203_s27, %s6059_s28 }
0x1092   : > { %v3264_v45 = vpop.permute.xlu0 %3263 }
0x1093   : > { %v3269_v15 = vsel %vm648_vm2, %v3264_v45, 0 }
0x1094   : > { %6517 = vmatpush3.bf16.xpose.msra.mxu0 %v3269_v15 }
0x1095   : > { %6522 = vmatprep.subr.bf16.mxu0 %v7620_v17 }
0x109a   : > { %v3314_v1 = vpop.permute.xlu1 %3313 }
0x109b   : > { %v3319_v23 = vsel %vm648_vm2, %v3314_v1, 0  ;;  %6519 = vmatmul.mubr.msk.bf16.vlgmr.msra.gmra.mrb[72].mxu0 %vm648_vm2, %v8596_v24 }
0x109c   : > { %6523 = vmatpush3.bf16.xpose.msra.mxu0 %v3319_v23  ;;  %6524 = vmatprep.mubr.msk.bf16.mxu0 %vm7621_vm1, %v7620_v17 }
0x109d   : > { %6528 = vmatprep.subr.bf16.mxu0 %v7620_v17 }
0x10a3   : > { %6525 = vmatmul.mubr.msk.bf16.vlgmr.msra.gmra.mrb[76].mxu0 %vm648_vm2, %v8606_v8 }
0x10a4   : > { %6530 = vmatprep.mubr.msk.bf16.mxu0 %vm7621_vm1, %v7620_v17 }
0x10ca   : > { %v3364_v25 = vpop.permute.xlu1 %3363 }
0x10cb   : > { %v3369_v26 = vsel %vm648_vm2, %v3364_v25, 0 }
0x10cc   : > { %6529 = vmatpush3.bf16.xpose.msra.mxu0 %v3369_v26 }
0x10cd   : > { %6540 = vmatprep.subr.bf16.mxu0 %v7620_v17 }
0x10d2   : > { %v3414_v29 = vpop.permute.xlu0 %3413 }
0x10d3   : > { %v3419_v57 = vsel %vm648_vm2, %v3414_v29, 0  ;;  %6531 = vmatmul.mubr.msk.bf16.vlgmr.msra.gmra.mrb[80].mxu0 %vm648_vm2, %v8616_v7 }
0x10d4   : > { %6535 = vmatpush3.bf16.xpose.msra.mxu1 %v3419_v57  ;;  %6541 = vmatpush3.bf16.msra.mxu0 %v8598_v52 }
0x10d5   : > { %6546 = vmatprep.subr.bf16.mxu1 %v7620_v17  ;;  %6542 = vmatprep.mubr.msk.bf16.mxu0 %vm7621_vm1, %v7620_v17 }
0x10d6   : > { %6552 = vmatprep.subr.bf16.mxu0 %v7620_v17 }
0x10db   : > { %6537 = vmatmul.mubr.msk.bf16.vlgmr.msra.gmra.mrb[112].mxu1 %vm648_vm2, %v8626_v47 }
0x10dc   : > { %6547 = vmatpush3.bf16.msra.mxu1 %v8608_v18  ;;  %6548 = vmatprep.mubr.msk.bf16.mxu1 %vm7621_vm1, %v7620_v17 }
0x10dd   : > { %6558 = vmatprep.subr.bf16.mxu1 %v7620_v17 }
0x116e   : > { %v8660_v31 = vpop.f32.mrb[72].mxu0 }
0x116f   : > { %v6520_v61 = vpop.f32.mrb[73].mxu0  ;;  %v3462_v15 = vsel %vm648_vm2, %v8660_v31, -inf }
0x1170   : > { %v8662_v32 = vpop.f32.mrb[74].mxu0 }
0x1171   : > { %v6521_v44 = vpop.f32.mrb[75].mxu0  ;;  %v3465_v1 = vsel %vm648_vm2, %v8662_v32, -inf }
0x1176   : > { %v3355_v39 = vpop.f32.mrb[76].mxu0 }
0x1177   : > { %v6526_v41 = vpop.f32.mrb[77].mxu0  ;;  %v3468_v34 = vsel %vm648_vm2, %v3355_v39, -inf }
0x1178   : > { %3469 = vmax.xlane.f32.xlu0 %v3468_v34  ;;  %v3358_v35 = vpop.f32.mrb[78].mxu0 }
0x1179   : > { %v6527_v13 = vpop.f32.mrb[79].mxu0  ;;  %v3471_v27 = vsel %vm648_vm2, %v3358_v35, -inf }
0x117a   : > { %3472 = vmax.xlane.f32.xlu1 %v3471_v27 }
0x11a6   : > { %v8666_v42 = vpop.f32.mrb[80].mxu0 }
0x11a7   : > { %v6532_v0 = vpop.f32.mrb[81].mxu0  ;;  %v3474_v23 = vsel %vm648_vm2, %v8666_v42, -inf }
0x11a8   : > { %v8668_v33 = vpop.f32.mrb[82].mxu0 }
0x11a9   : > { %v6533_v63 = vpop.f32.mrb[83].mxu0  ;;  %v3477_v25 = vsel %vm648_vm2, %v8668_v33, -inf }
0x11ae   : > { %v3455_v36 = vpop.f32.mrb[112].mxu1 }
0x11af   : > { %v6538_v55 = vpop.f32.mrb[113].mxu1  ;;  %v3480_v5 = vsel %vm648_vm2, %v3455_v36, -inf }
0x11b0   : > { %3481 = vmax.xlane.f32.xlu0 %v3480_v5  ;;  %v3458_v9 = vpop.f32.mrb[114].mxu1 }
0x11b1   : > { %v6539_v11 = vpop.f32.mrb[115].mxu1  ;;  %v3483_v14 = vsel %vm648_vm2, %v3458_v9, -inf }
0x11b4   : > { %3484 = vmax.xlane.f32.xlu0 %v3483_v14 }
0x1205   : > { %v3470_v16 = vpop.xlane.xlu0 %3469 }
0x1206   : > { %v3488_v3 = vsub.f32 %v3355_v39, %v3470_v16 }
0x1207   : > { %v3473_v6 = vpop.xlane.xlu1 %3472 }
0x1208   : > { %v3498_v30 = vmul.f32 1.442695, %v3488_v3  ;;  %v3489_v48 = vsub.f32 %v3358_v35, %v3473_v6 }
0x120a   : > { %7115 = vpow2.f32 %v3498_v30  ;;  %v3500_v12 = vmul.f32 1.442695, %v3489_v48 }
0x120c   : > { %7117 = vpow2.f32 %v3500_v12 }
0x1214   : > { %v7116_v51 = vpop.eup %7115 }
0x1215   : > { %v3516_v58 = vsel %vm648_vm2, %v7116_v51, 0.0 }
0x1216   : > { %v7118_v43 = vpop.eup %7117  ;;  %3517 = vadd.xlane.f32.xlu1 %v3516_v58 }
0x1217   : > { %v3519_v59 = vsel %vm648_vm2, %v7118_v43, 0.0 }
0x1218   : > { %3520 = vadd.xlane.f32.xlu0 %v3519_v59 }
0x123d   : > { %v3482_v54 = vpop.xlane.xlu0 %3481 }
0x123e   : > { %v3492_v10 = vsub.f32 %v3455_v36, %v3482_v54 }
0x1240   : > { %v3506_v46 = vmul.f32 1.442695, %v3492_v10 }
0x1241   : > { %v3485_v38 = vpop.xlane.xlu0 %3484 }
0x1242   : > { %7119 = vpow2.f32 %v3506_v46  ;;  %v3493_v21 = vsub.f32 %v3458_v9, %v3485_v38 }
0x1244   : > { %v3508_v28 = vmul.f32 1.442695, %v3493_v21 }
0x1246   : > { %7121 = vpow2.f32 %v3508_v28 }
0x124c   : > { %v7120_v50 = vpop.eup %7119 }
0x124d   : > { %v3528_v56 = vsel %vm648_vm2, %v7120_v50, 0.0 }
0x124e   : > { %3529 = vadd.xlane.f32.xlu1 %v3528_v56 }
0x1250   : > { %v7122_v60 = vpop.eup %7121 }
0x1251   : > { %v3531_v45 = vsel %vm648_vm2, %v7122_v60, 0.0 }
0x1252   : > { %3532 = vadd.xlane.f32.xlu0 %v3531_v45 }
0x125f   : > { %3787 = vrot.lane.b32.xlu1 %v8606_v8, %s7623_s22 }
0x1263   : > { %3889 = vrot.lane.b32.xlu1 %v8626_v47, %s7623_s22 }
0x1267   : > { %3887 = vrot.lane.b32.xlu1 %v8626_v47, %s7624_s13 }
0x1268   : > { %3785 = vrot.lane.b32.xlu0 %v8606_v8, %s7624_s13 }
0x1287   : > { %3463 = vmax.xlane.f32.xlu0 %v3462_v15 }
0x128b   : > { %3466 = vmax.xlane.f32.xlu1 %v3465_v1  ;;  %3475 = vmax.xlane.f32.xlu0 %v3474_v23 }
0x128f   : > { %3478 = vmax.xlane.f32.xlu0 %v3477_v25 }
0x12a3   : > { %v3518_v26 = vpop.xlane.xlu1 %3517 }
0x12a4   : > { %7123 = vrcp.f32 %v3518_v26 }
0x12a5   : > { %v3521_v29 = vpop.xlane.xlu0 %3520 }
0x12a6   : > { %7125 = vrcp.f32 %v3521_v29 }
0x12ae   : > { %v7124_v57 = vpop.eup %7123 }
0x12af   : > { %v3544_v44 = vmul.f32 %v7124_v57, %v7116_v51 }
0x12b0   : > { %v7126_v61 = vpop.eup %7125 }
0x12b1   : > { %v3545_v39 = vmul.f32 %v7126_v61, %v7118_v43 }
0x12b3   : > { %v3551_v41 = vpack.c.bf16 %v3545_v39, %v3544_v44 }
0x12b5   : > { %6549 = vmatmul.mubr.msk.bf16.vlgmr.msra.gmra.mrb[116].mxu1 %vm648_vm2, %v3551_v41 }
0x12b6   : > { %6559 = vmatpush3.bf16.msra.mxu1 %v8628_v4  ;;  %6560 = vmatprep.mubr.msk.bf16.mxu1 %vm7621_vm1, %v7620_v17 }
0x12b7   : > { %6570 = vmatprep.subr.bf16.mxu1 %v7620_v17 }
0x12db   : > { %v3530_v34 = vpop.xlane.xlu1 %3529 }
0x12dc   : > { %7127 = vrcp.f32 %v3530_v34 }
0x12df   : > { %v3533_v35 = vpop.xlane.xlu0 %3532  ;;  %v3788_v36 = vpop.permute.xlu1 %3787 }
0x12e0   : > { %7129 = vrcp.f32 %v3533_v35  ;;  %v3793_v5 = vsel %vm648_vm2, %v3788_v36, 0 }
0x12e3   : > { %v3890_v9 = vpop.permute.xlu1 %3889  ;;  %v3786_v11 = vpop.permute.xlu0 %3785 }
0x12e4   : > { %v3895_v14 = vsel %vm648_vm2, %v3890_v9, 0 }
0x12e6   : > { %v7128_v13 = vpop.eup %7127 }
0x12e7   : > { %v3548_v0 = vmul.f32 %v7128_v13, %v7120_v50  ;;  %v3888_v16 = vpop.permute.xlu1 %3887 }
0x12ea   : > { %v7130_v27 = vpop.eup %7129 }
0x12eb   : > { %v3549_v63 = vmul.f32 %v7130_v27, %v7122_v60 }
0x12ed   : > { %v3553_v55 = vpack.c.bf16 %v3549_v63, %v3548_v0 }
0x12ef   : > { %6561 = vmatmul.mubr.msk.bf16.vlgmr.msra.gmra.mrb[120].mxu1 %vm648_vm2, %v3553_v55 }
0x12f0   : > { %6571 = vmatpush3.bf16.xpose.msra.mxu1 %v3793_v5  ;;  %6572 = vmatprep.mubr.msk.bf16.mxu1 %vm7621_vm1, %v7620_v17 }
0x12f1   : > { %6582 = vmatprep.subr.bf16.mxu1 %v7620_v17 }
0x12f7   : > { %6573 = vmatmul.mubr.msk.bf16.vlgmr.msra.gmra.mrb[124].mxu1 %vm648_vm2, %v3786_v11 }
0x12f8   : > { %6583 = vmatpush3.bf16.xpose.msra.mxu1 %v3895_v14  ;;  %6584 = vmatprep.mubr.msk.bf16.mxu1 %vm7621_vm1, %v7620_v17 }
0x12f9   : > { %6594 = vmatprep.subr.bf16.mxu1 %v7620_v17 }
0x12ff   : > { %6585 = vmatmul.mubr.msk.bf16.vlgmr.msra.gmra.mrb[128].mxu1 %vm648_vm2, %v3888_v16 }
0x1300   : > { %6596 = vmatprep.mubr.msk.bf16.mxu1 %vm7621_vm1, %v7620_v17 }
0x1314   : > { %v3464_v3 = vpop.xlane.xlu0 %3463 }
0x1315   : > { %v3486_v6 = vsub.f32 %v8660_v31, %v3464_v3 }
0x1317   : > { %v3494_v30 = vmul.f32 1.442695, %v3486_v6 }
0x1318   : > { %v3467_v48 = vpop.xlane.xlu1 %3466  ;;  %v3476_v12 = vpop.xlane.xlu0 %3475 }
0x1319   : > { %7131 = vpow2.f32 %v3494_v30  ;;  %v3487_v51 = vsub.f32 %v8662_v32, %v3467_v48  ;;  %v3490_v58 = vsub.f32 %v8666_v42, %v3476_v12 }
0x131b   : > { %v3496_v43 = vmul.f32 1.442695, %v3487_v51  ;;  %v3502_v59 = vmul.f32 1.442695, %v3490_v58 }
0x131c   : > { %v3479_v54 = vpop.xlane.xlu0 %3478 }
0x131d   : > { %7133 = vpow2.f32 %v3496_v43  ;;  %v3491_v10 = vsub.f32 %v8668_v33, %v3479_v54 }
0x131e   : > { %7135 = vpow2.f32 %v3502_v59 }
0x131f   : > { %v3504_v46 = vmul.f32 1.442695, %v3491_v10 }
0x1321   : > { %7137 = vpow2.f32 %v3504_v46 }
0x1323   : > { %v7132_v38 = vpop.eup %7131 }
0x1324   : > { %v3510_v31 = vsel %vm648_vm2, %v7132_v38, 0.0 }
0x1325   : > { %3511 = vadd.xlane.f32.xlu1 %v3510_v31 }
0x1327   : > { %v7134_v21 = vpop.eup %7133 }
0x1328   : > { %v7136_v28 = vpop.eup %7135  ;;  %v3513_v50 = vsel %vm648_vm2, %v7134_v21, 0.0 }
0x1329   : > { %3514 = vadd.xlane.f32.xlu0 %v3513_v50  ;;  %v3522_v32 = vsel %vm648_vm2, %v7136_v28, 0.0 }
0x132a   : > { %3523 = vadd.xlane.f32.xlu1 %v3522_v32 }
0x132b   : > { %v7138_v42 = vpop.eup %7137 }
0x132c   : > { %v3525_v56 = vsel %vm648_vm2, %v7138_v42, 0.0 }
0x132d   : > { %3526 = vadd.xlane.f32.xlu0 %v3525_v56 }
0x133b   : > { %3736 = vrot.lane.b32.xlu1 %v8596_v24, %s7623_s22 }
0x133f   : > { %3838 = vrot.lane.b32.xlu1 %v8616_v7, %s7623_s22  ;;  %s7522_s22 = scalar_lea.vmem %s9116_s9, 1024 }
0x1340   : > { %p7523_p10 = scmp.ne.s32.totalorder %s9116_s9, %s7522_s22 }
0x1342   : > { %p7524_p11 = pnand %p7523_p10, %p9204_p1 }
0x1343   : > { %3836 = vrot.lane.b32.xlu1 %v8616_v7, %s7624_s13  ;;  %3734 = vrot.lane.b32.xlu0 %v8596_v24, %s7624_s13 }
0x1344   : > { %p7525_p12 = pneg %p7524_p11 }
0x1388   : > { %v8726_v33 = vpop.f32.mrb[116].mxu1 }
0x1389   : > { %v6550_v60 = vpop.f32.mrb[117].mxu1 }
0x138a   : > { %v8728_v45 = vpop.f32.mrb[118].mxu1 }
0x138b   : > { %v3731_v15 = vpack.c.bf16 %v8728_v45, %v8726_v33  ;;  %v6551_v1 = vpop.f32.mrb[119].mxu1 }
0x13b2   : > { %v3512_v23 = vpop.xlane.xlu1 %3511 }
0x13b3   : > { %7139 = vrcp.f32 %v3512_v23 }
0x13b6   : > { %v3515_v25 = vpop.xlane.xlu0 %3514 }
0x13b7   : > { %7141 = vrcp.f32 %v3515_v25  ;;  %v3524_v26 = vpop.xlane.xlu1 %3523 }
0x13ba   : > { %v3527_v29 = vpop.xlane.xlu0 %3526 }
0x13bb   : > { %7143 = vrcp.f32 %v3527_v29  ;;  %v3737_v16 = vpop.permute.xlu1 %3736 }
0x13bc   : > { %7145 = vrcp.f32 %v3524_v26  ;;  %v3742_v12 = vsel %vm648_vm2, %v3737_v16, 0 }
0x13bd   : > { %v7140_v57 = vpop.eup %7139 }
0x13be   : > { %v3542_v44 = vmul.f32 %v7140_v57, %v7132_v38  ;;  %v3735_v46 = vpop.permute.xlu0 %3734 }
0x13bf   : > { %v3839_v59 = vpop.permute.xlu1 %3838 }
0x13c0   : > { %v3844_v38 = vsel %vm648_vm2, %v3839_v59, 0 }
0x13c1   : > { %v7142_v61 = vpop.eup %7141 }
0x13c2   : > { %v3543_v39 = vmul.f32 %v7142_v61, %v7134_v21  ;;  %v8732_v41 = vpop.f32.mrb[120].mxu1 }
0x13c3   : > { %v6562_v34 = vpop.f32.mrb[121].mxu1  ;;  %v3837_v21 = vpop.permute.xlu1 %3836 }
0x13c4   : > { %v8734_v35 = vpop.f32.mrb[122].mxu1  ;;  %v3550_v13 = vpack.c.bf16 %v3543_v39, %v3542_v44 }
0x13c5   : > { %v7144_v27 = vpop.eup %7143  ;;  %v3733_v0 = vpack.c.bf16 %v8734_v35, %v8732_v41  ;;  %v6563_v63 = vpop.f32.mrb[123].mxu1 }
0x13c6   : > { %6543 = vmatmul.mubr.msk.bf16.vlgmr.msra.gmra.mrb[84].mxu0 %vm648_vm2, %v3550_v13  ;;  %v7146_v36 = vpop.eup %7145  ;;  %v3547_v55 = vmul.f32 %v7144_v27, %v7138_v42 }
0x13c7   : > { %6553 = vmatpush3.bf16.msra.mxu0 %v8618_v40  ;;  %6554 = vmatprep.mubr.msk.bf16.mxu0 %vm7621_vm1, %v7620_v17  ;;  %v3546_v5 = vmul.f32 %v7146_v36, %v7136_v28 }
0x13c8   : > { %6564 = vmatprep.subr.bf16.mxu0 %v7620_v17 }
0x13c9   : > { %v3552_v6 = vpack.c.bf16 %v3547_v55, %v3546_v5 }
0x13ca   : > { %v3829_v9 = vpop.f32.mrb[124].mxu1 }
0x13cb   : > { %v6574_v11 = vpop.f32.mrb[125].mxu1  ;;  %v3944_v14 = vsel %vm648_vm2, %v3829_v9, -inf }
0x13cc   : > { %v3832_v3 = vpop.f32.mrb[126].mxu1  ;;  %3945 = vmax.xlane.f32.xlu0 %v3944_v14 }
0x13cd   : > { %v6575_v30 = vpop.f32.mrb[127].mxu1  ;;  %v3947_v48 = vsel %vm648_vm2, %v3832_v3, -inf }
0x13ce   : > { %3948 = vmax.xlane.f32.xlu1 %v3947_v48  ;;  %6555 = vmatmul.mubr.msk.bf16.vlgmr.msra.gmra.mrb[88].mxu0 %vm648_vm2, %v3552_v6 }
0x13cf   : > { %6566 = vmatprep.mubr.msk.bf16.mxu0 %vm7621_vm1, %v7620_v17 }
0x13d0   : > { %6565 = vmatpush3.bf16.xpose.msra.mxu0 %v3742_v12 }
0x13d1   : > { %6576 = vmatprep.subr.bf16.mxu0 %v7620_v17 }
0x13d2   : > { %v3931_v51 = vpop.f32.mrb[128].mxu1 }
0x13d3   : > { %v6586_v58 = vpop.f32.mrb[129].mxu1  ;;  %v3956_v43 = vsel %vm648_vm2, %v3931_v51, -inf }
0x13d4   : > { %v3934_v54 = vpop.f32.mrb[130].mxu1  ;;  %3957 = vmax.xlane.f32.xlu0 %v3956_v43 }
0x13d5   : > { %v6587_v10 = vpop.f32.mrb[131].mxu1  ;;  %v3959_v31 = vsel %vm648_vm2, %v3934_v54, -inf }
0x13d7   : > { %6567 = vmatmul.mubr.msk.bf16.vlgmr.msra.gmra.mrb[92].mxu0 %vm648_vm2, %v3735_v46 }
0x13d8   : > { %6577 = vmatpush3.bf16.xpose.msra.mxu0 %v3844_v38  ;;  %3960 = vmax.xlane.f32.xlu0 %v3959_v31 }
0x13d9   : > { %6578 = vmatprep.mubr.msk.bf16.mxu0 %vm7621_vm1, %v7620_v17  ;;  %6588 = vmatprep.subr.bf16.mxu0 %v7620_v17 }
0x13df   : > { %6579 = vmatmul.mubr.msk.bf16.vlgmr.msra.gmra.mrb[96].mxu0 %vm648_vm2, %v3837_v21  ;;  %4079 = vrot.lane.b32.xlu1 %v8608_v18, %s7624_s13 }
0x13e0   : > { %6590 = vmatprep.mubr.msk.bf16.mxu0 %vm7621_vm1, %v7620_v17 }
0x1459   : > { %v3946_v28 = vpop.xlane.xlu0 %3945 }
0x145a   : > { %v3964_v50 = vsub.f32 %v3829_v9, %v3946_v28 }
0x145b   : > { %v3949_v32 = vpop.xlane.xlu1 %3948 }
0x145c   : > { %v3974_v42 = vmul.f32 1.442695, %v3964_v50  ;;  %v3965_v56 = vsub.f32 %v3832_v3, %v3949_v32 }
0x145e   : > { %7147 = vpow2.f32 %v3974_v42  ;;  %v3976_v60 = vmul.f32 1.442695, %v3965_v56 }
0x145f   : > { %v4080_v1 = vpop.permute.xlu1 %4079 }
0x1460   : > { %7149 = vpow2.f32 %v3976_v60  ;;  %6595 = vmatpush3.bf16.msra.mxu1 %v4080_v1 }
0x1461   : > { %v3958_v23 = vpop.xlane.xlu0 %3957  ;;  %6606 = vmatprep.subr.bf16.mxu1 %v7620_v17 }
0x1462   : > { %v3968_v25 = vsub.f32 %v3931_v51, %v3958_v23 }
0x1464   : > { %v3982_v26 = vmul.f32 1.442695, %v3968_v25 }
0x1465   : > { %v3961_v29 = vpop.xlane.xlu0 %3960 }
0x1466   : > { %7151 = vpow2.f32 %v3982_v26  ;;  %v3969_v57 = vsub.f32 %v3934_v54, %v3961_v29 }
0x1468   : > { %v7148_v61 = vpop.eup %7147  ;;  %v3984_v44 = vmul.f32 1.442695, %v3969_v57 }
0x1469   : > { %v3992_v39 = vsel %vm648_vm2, %v7148_v61, 0.0 }
0x146a   : > { %v7150_v34 = vpop.eup %7149  ;;  %7153 = vpow2.f32 %v3984_v44  ;;  %3993 = vadd.xlane.f32.xlu1 %v3992_v39 }
0x146b   : > { %v3995_v13 = vsel %vm648_vm2, %v7150_v34, 0.0 }
0x146c   : > { %3996 = vadd.xlane.f32.xlu0 %v3995_v13 }
0x1470   : > { %v7152_v27 = vpop.eup %7151 }
0x1471   : > { %v4004_v63 = vsel %vm648_vm2, %v7152_v27, 0.0 }
0x1472   : > { %4005 = vadd.xlane.f32.xlu1 %v4004_v63 }
0x1474   : > { %v7154_v36 = vpop.eup %7153 }
0x1475   : > { %v4007_v55 = vsel %vm648_vm2, %v7154_v36, 0.0 }
0x1476   : > { %4008 = vadd.xlane.f32.xlu0 %v4007_v55 }
0x1483   : > { %4382 = vrot.lane.b32.xlu1 %v8596_v24, %s7625_s21 }
0x1487   : > { %4380 = vrot.lane.b32.xlu1 %v8596_v24, %s7626_s23 }
0x148b   : > { %4431 = vrot.lane.b32.xlu1 %v8606_v8, %s7626_s23 }
0x148c   : > { %4175 = vrot.lane.b32.xlu0 %v8628_v4, %s7624_s13 }
0x148f   : > { %4482 = vrot.lane.b32.xlu1 %v8616_v7, %s7626_s23 }
0x1490   : > { %4433 = vrot.lane.b32.xlu0 %v8606_v8, %s7625_s21 }
0x1493   : > { %4533 = vrot.lane.b32.xlu1 %v8626_v47, %s7626_s23 }
0x1494   : > { %4484 = vrot.lane.b32.xlu0 %v8616_v7, %s7625_s21 }
0x1498   : > { %4535 = vrot.lane.b32.xlu0 %v8626_v47, %s7625_s21 }
0x1499   : > { %v8785_v5 = vpop.f32.mrb[84].mxu0 }
0x149a   : > { %v6544_v9 = vpop.f32.mrb[85].mxu0 }
0x149b   : > { %v8787_v11 = vpop.f32.mrb[86].mxu0 }
0x149c   : > { %v3730_v14 = vpack.c.bf16 %v8787_v11, %v8785_v5  ;;  %v6545_v16 = vpop.f32.mrb[87].mxu0 }
0x14a1   : > { %v8791_v3 = vpop.f32.mrb[88].mxu0 }
0x14a2   : > { %v6556_v6 = vpop.f32.mrb[89].mxu0 }
0x14a3   : > { %v8793_v30 = vpop.f32.mrb[90].mxu0 }
0x14a4   : > { %v3732_v48 = vpack.c.bf16 %v8793_v30, %v8791_v3  ;;  %v6557_v12 = vpop.f32.mrb[91].mxu0 }
0x14aa   : > { %v8797_v51 = vpop.f32.mrb[92].mxu0 }
0x14ab   : > { %v6568_v58 = vpop.f32.mrb[93].mxu0  ;;  %v3938_v21 = vsel %vm648_vm2, %v8797_v51, -inf }
0x14ac   : > { %v8799_v43 = vpop.f32.mrb[94].mxu0 }
0x14ad   : > { %v6569_v59 = vpop.f32.mrb[95].mxu0  ;;  %v3941_v31 = vsel %vm648_vm2, %v8799_v43, -inf }
0x14b2   : > { %v8801_v54 = vpop.f32.mrb[96].mxu0 }
0x14b3   : > { %v6580_v10 = vpop.f32.mrb[97].mxu0  ;;  %v3950_v28 = vsel %vm648_vm2, %v8801_v54, -inf }
0x14b4   : > { %v8803_v46 = vpop.f32.mrb[98].mxu0 }
0x14b5   : > { %v6581_v38 = vpop.f32.mrb[99].mxu0  ;;  %v3953_v50 = vsel %vm648_vm2, %v8803_v46, -inf }
0x14b7   : > { %3942 = vmax.xlane.f32.xlu1 %v3941_v31  ;;  %3939 = vmax.xlane.f32.xlu0 %v3938_v21 }
0x14bb   : > { %3951 = vmax.xlane.f32.xlu0 %v3950_v28 }
0x14bf   : > { %3954 = vmax.xlane.f32.xlu0 %v3953_v50 }
0x14f7   : > { %v3994_v32 = vpop.xlane.xlu1 %3993 }
0x14f8   : > { %7155 = vrcp.f32 %v3994_v32 }
0x14f9   : > { %v3997_v42 = vpop.xlane.xlu0 %3996 }
0x14fa   : > { %7157 = vrcp.f32 %v3997_v42 }
0x14ff   : > { %v4006_v56 = vpop.xlane.xlu1 %4005 }
0x1500   : > { %7159 = vrcp.f32 %v4006_v56 }
0x1502   : > { %v7156_v60 = vpop.eup %7155 }
0x1503   : > { %v4009_v1 = vpop.xlane.xlu0 %4008  ;;  %v4020_v25 = vmul.f32 %v7156_v60, %v7148_v61  ;;  %v4383_v55 = vpop.permute.xlu1 %4382 }
0x1504   : > { %v7158_v23 = vpop.eup %7157  ;;  %7161 = vrcp.f32 %v4009_v1  ;;  %v4388_v16 = vsel %vm648_vm2, %v4383_v55, 0 }
0x1505   : > { %v4021_v26 = vmul.f32 %v7158_v23, %v7150_v34 }
0x1507   : > { %v4176_v29 = vpop.permute.xlu0 %4175  ;;  %v4027_v57 = vpack.c.bf16 %v4021_v26, %v4020_v25  ;;  %v4381_v34 = vpop.permute.xlu1 %4380 }
0x1509   : > { %6597 = vmatmul.mubr.msk.bf16.vlgmr.msra.gmra.mrb[132].mxu1 %vm648_vm2, %v4027_v57 }
0x150a   : > { %6607 = vmatpush3.bf16.msra.mxu1 %v4176_v29  ;;  %6608 = vmatprep.mubr.msk.bf16.mxu1 %vm7621_vm1, %v7620_v17  ;;  %v7160_v44 = vpop.eup %7159 }
0x150b   : > { %6632 = vmatprep.subr.bf16.mxu1 %v7620_v17  ;;  %v4024_v13 = vmul.f32 %v7160_v44, %v7152_v27  ;;  %v4434_v61 = vpop.permute.xlu0 %4433 }
0x150c   : > { %v4439_v6 = vsel %vm648_vm2, %v4434_v61, 0 }
0x150e   : > { %v7162_v39 = vpop.eup %7161 }
0x150f   : > { %v4025_v63 = vmul.f32 %v7162_v39, %v7154_v36  ;;  %v4485_v27 = vpop.permute.xlu0 %4484  ;;  %v4432_v36 = vpop.permute.xlu1 %4431 }
0x1510   : > { %v4490_v12 = vsel %vm648_vm2, %v4485_v27, 0 }
0x1511   : > { %v4029_v9 = vpack.c.bf16 %v4025_v63, %v4024_v13 }
0x1513   : > { %6609 = vmatmul.mubr.msk.bf16.vlgmr.msra.gmra.mrb[136].mxu1 %vm648_vm2, %v4029_v9  ;;  %v4536_v58 = vpop.permute.xlu0 %4535  ;;  %v4483_v59 = vpop.permute.xlu1 %4482 }
0x1514   : > { %6633 = vmatpush3.bf16.xpose.msra.mxu1 %v4388_v16  ;;  %6634 = vmatprep.mubr.msk.bf16.mxu1 %vm7621_vm1, %v7620_v17  ;;  %v4541_v10 = vsel %vm648_vm2, %v4536_v58, 0 }
0x1515   : > { %6638 = vmatprep.subr.bf16.mxu1 %v7620_v17 }
0x1517   : > { %v4534_v38 = vpop.permute.xlu1 %4533 }
0x151b   : > { %6635 = vmatmul.mubr.msk.bf16.vlgmr.msra.gmra.mrb[140].mxu1 %vm648_vm2, %v4381_v34 }
0x151c   : > { %6639 = vmatpush3.bf16.xpose.msra.mxu1 %v4439_v6  ;;  %6640 = vmatprep.mubr.msk.bf16.mxu1 %vm7621_vm1, %v7620_v17 }
0x151d   : > { %6644 = vmatprep.subr.bf16.mxu1 %v7620_v17 }
0x1523   : > { %6641 = vmatmul.mubr.msk.bf16.vlgmr.msra.gmra.mrb[144].mxu1 %vm648_vm2, %v4432_v36 }
0x1524   : > { %6645 = vmatpush3.bf16.xpose.msra.mxu1 %v4490_v12  ;;  %6646 = vmatprep.mubr.msk.bf16.mxu1 %vm7621_vm1, %v7620_v17 }
0x1525   : > { %6650 = vmatprep.subr.bf16.mxu1 %v7620_v17 }
0x152b   : > { %6647 = vmatmul.mubr.msk.bf16.vlgmr.msra.gmra.mrb[148].mxu1 %vm648_vm2, %v4483_v59 }
0x152c   : > { %6651 = vmatpush3.bf16.xpose.msra.mxu1 %v4541_v10  ;;  %6652 = vmatprep.mubr.msk.bf16.mxu1 %vm7621_vm1, %v7620_v17 }
0x152d   : > { %6662 = vmatprep.subr.bf16.mxu1 %v7620_v17 }
0x1533   : > { %6653 = vmatmul.mubr.msk.bf16.vlgmr.msra.gmra.mrb[152].mxu1 %vm648_vm2, %v4534_v38 }
0x1534   : > { %6664 = vmatprep.mubr.msk.bf16.mxu1 %vm7621_vm1, %v7620_v17 }
0x1544   : > { %v3943_v31 = vpop.xlane.xlu1 %3942  ;;  %v3940_v21 = vpop.xlane.xlu0 %3939 }
0x1545   : > { %v3963_v28 = vsub.f32 %v8799_v43, %v3943_v31  ;;  %v3962_v50 = vsub.f32 %v8797_v51, %v3940_v21 }
0x1547   : > { %v3972_v32 = vmul.f32 1.442695, %v3963_v28  ;;  %v3970_v42 = vmul.f32 1.442695, %v3962_v50 }
0x1548   : > { %v3952_v56 = vpop.xlane.xlu0 %3951 }
0x1549   : > { %7163 = vpow2.f32 %v3972_v32  ;;  %v3966_v60 = vsub.f32 %v8801_v54, %v3952_v56 }
0x154a   : > { %7165 = vpow2.f32 %v3970_v42 }
0x154b   : > { %v3978_v1 = vmul.f32 1.442695, %v3966_v60 }
0x154c   : > { %v3955_v23 = vpop.xlane.xlu0 %3954 }
0x154d   : > { %7167 = vpow2.f32 %v3978_v1  ;;  %v3967_v25 = vsub.f32 %v8803_v46, %v3955_v23 }
0x154f   : > { %v3980_v26 = vmul.f32 1.442695, %v3967_v25 }
0x1551   : > { %7169 = vpow2.f32 %v3980_v26 }
0x1553   : > { %v7164_v29 = vpop.eup %7163 }
0x1554   : > { %v7166_v57 = vpop.eup %7165  ;;  %v3989_v43 = vsel %vm648_vm2, %v7164_v29, 0.0 }
0x1555   : > { %3990 = vadd.xlane.f32.xlu0 %v3989_v43  ;;  %v3986_v51 = vsel %vm648_vm2, %v7166_v57, 0.0 }
0x1556   : > { %3987 = vadd.xlane.f32.xlu1 %v3986_v51 }
0x1557   : > { %v7168_v44 = vpop.eup %7167 }
0x1558   : > { %v3998_v39 = vsel %vm648_vm2, %v7168_v44, 0.0 }
0x155a   : > { %3999 = vadd.xlane.f32.xlu1 %v3998_v39 }
0x155b   : > { %v7170_v54 = vpop.eup %7169 }
0x155c   : > { %v4001_v13 = vsel %vm648_vm2, %v7170_v54, 0.0 }
0x155d   : > { %4002 = vadd.xlane.f32.xlu0 %v4001_v13 }
0x156b   : > { %4031 = vrot.lane.b32.xlu1 %v8598_v52, %s7624_s13 }
0x1573   : > { %4127 = vrot.lane.b32.xlu0 %v8618_v40, %s7624_s13  ;;  %s7629_s13 = smov [#allocation17]  }
0x1574   : > { %s7526_s21 = sshll.u32 %s7629_s13, 4  ;;  %s7527_s21 = int_to_ptr.vmem [resolvable:$false] %s7526_s21 }
0x1575   : > { %p7529_p13 = scmp.lt.s32.totalorder %s9116_s9, %s7527_s21 }
0x15dc   : > { %v8852_v46 = vpop.f32.mrb[132].mxu1 }
0x15dd   : > { %v6598_v63 = vpop.f32.mrb[133].mxu1 }
0x15de   : > { %v8854_v55 = vpop.f32.mrb[134].mxu1 }
0x15df   : > { %v4223_v9 = vpack.c.bf16 %v8854_v55, %v8852_v46  ;;  %v6599_v16 = vpop.f32.mrb[135].mxu1 }
0x15e2   : > { %v3991_v61 = vpop.xlane.xlu0 %3990 }
0x15e3   : > { %v3988_v34 = vpop.xlane.xlu1 %3987  ;;  %7171 = vrcp.f32 %v3991_v61 }
0x15e4   : > { %7173 = vrcp.f32 %v3988_v34 }
0x15e6   : > { %v8858_v6 = vpop.f32.mrb[136].mxu1 }
0x15e7   : > { %v4000_v27 = vpop.xlane.xlu1 %3999  ;;  %v6610_v36 = vpop.f32.mrb[137].mxu1 }
0x15e8   : > { %v8860_v12 = vpop.f32.mrb[138].mxu1  ;;  %7175 = vrcp.f32 %v4000_v27 }
0x15e9   : > { %v4225_v58 = vpack.c.bf16 %v8860_v12, %v8858_v6  ;;  %v6611_v59 = vpop.f32.mrb[139].mxu1 }
0x15ea   : > { %v4003_v10 = vpop.xlane.xlu0 %4002  ;;  %v8873_v59 = vld [vmem:[#allocation8] sm:$0xff]  }
0x15eb   : > { %v4032_v38 = vpop.permute.xlu1 %4031  ;;  %7177 = vrcp.f32 %v4003_v10 }
0x15ec   : > { %6589 = vmatpush3.bf16.msra.mxu0 %v4032_v38 }
0x15ed   : > { %v7172_v31 = vpop.eup %7171  ;;  %6600 = vmatprep.subr.bf16.mxu0 %v7620_v17 }
0x15ee   : > { %v7174_v21 = vpop.eup %7173  ;;  %v4019_v28 = vmul.f32 %v7172_v31, %v7164_v29  ;;  %v4424_v50 = vpop.f32.mrb[140].mxu1 }
0x15ef   : > { %v4018_v32 = vmul.f32 %v7174_v21, %v7166_v57  ;;  %v6636_v42 = vpop.f32.mrb[141].mxu1  ;;  %v4584_v56 = vsel %vm648_vm2, %v4424_v50, -inf  ;;  %v4128_v43 = vpop.permute.xlu0 %4127  ;;  %v7255_v57 = vld [vmem:[#allocation8 + $0x8] sm:$0xff]  }
0x15f0   : > { %v4427_v60 = vpop.f32.mrb[142].mxu1  ;;  %4585 = vmax.xlane.f32.xlu1 %v4584_v56 }
0x15f1   : > { %v6637_v1 = vpop.f32.mrb[143].mxu1  ;;  %v4587_v23 = vsel %vm648_vm2, %v4427_v60, -inf  ;;  %v4026_v25 = vpack.c.bf16 %v4019_v28, %v4018_v32 }
0x15f2   : > { %4588 = vmax.xlane.f32.xlu0 %v4587_v23  ;;  %v7176_v26 = vpop.eup %7175 }
0x15f3   : > { %6591 = vmatmul.mubr.msk.bf16.vlgmr.msra.gmra.mrb[100].mxu0 %vm648_vm2, %v4026_v25  ;;  %v4022_v51 = vmul.f32 %v7176_v26, %v7168_v44 }
0x15f4   : > { %6601 = vmatpush3.bf16.msra.mxu0 %v4128_v43  ;;  %6602 = vmatprep.mubr.msk.bf16.mxu0 %vm7621_vm1, %v7620_v17 }
0x15f5   : > { %v7178_v29 = vpop.eup %7177  ;;  %6612 = vmatprep.subr.bf16.mxu0 %v7255_v57 }
0x15f6   : > { %v4023_v39 = vmul.f32 %v7178_v29, %v7170_v54  ;;  %v4475_v13 = vpop.f32.mrb[144].mxu1 }
0x15f7   : > { %v6642_v63 = vpop.f32.mrb[145].mxu1  ;;  %v4590_v16 = vsel %vm648_vm2, %v4475_v13, -inf }
0x15f8   : > { %v4478_v61 = vpop.f32.mrb[146].mxu1  ;;  %4591 = vmax.xlane.f32.xlu1 %v4590_v16  ;;  %v4028_v34 = vpack.c.bf16 %v4023_v39, %v4022_v51 }
0x15f9   : > { %v6643_v27 = vpop.f32.mrb[147].mxu1  ;;  %v4593_v36 = vsel %vm648_vm2, %v4478_v61, -inf }
0x15fa   : > { %4594 = vmax.xlane.f32.xlu0 %v4593_v36 }
0x15fb   : > { %6603 = vmatmul.mubr.msk.bf16.vlgmr.msra.gmra.mrb[104].mxu0 %vm648_vm2, %v4028_v34 }
0x15fc   : > { %6613 = vmatpush3.bf16.msra.mxu0 %v7255_v57 }
0x15fd   : > { %6622 = vmatprep.subr.bf16.mxu0 %v8873_v59 }
0x15fe   : > { %v4526_v44 = vpop.f32.mrb[148].mxu1 }
0x15ff   : > { %v6648_v54 = vpop.f32.mrb[149].mxu1  ;;  %v4596_v10 = vsel %vm648_vm2, %v4526_v44, -inf }
0x1600   : > { %v4529_v38 = vpop.f32.mrb[150].mxu1  ;;  %4597 = vmax.xlane.f32.xlu1 %v4596_v10 }
0x1601   : > { %v6649_v31 = vpop.f32.mrb[151].mxu1  ;;  %v4599_v21 = vsel %vm648_vm2, %v4529_v38, -inf }
0x1602   : > { %4600 = vmax.xlane.f32.xlu0 %v4599_v21 }
0x1606   : > { %v4577_v28 = vpop.f32.mrb[152].mxu1 }
0x1607   : > { %v6654_v32 = vpop.f32.mrb[153].mxu1  ;;  %v4602_v42 = vsel %vm648_vm2, %v4577_v28, -inf }
0x1608   : > { %v4580_v56 = vpop.f32.mrb[154].mxu1  ;;  %4603 = vmax.xlane.f32.xlu1 %v4602_v42 }
0x1609   : > { %v6655_v1 = vpop.f32.mrb[155].mxu1  ;;  %v4605_v23 = vsel %vm648_vm2, %v4580_v56, -inf }
0x160a   : > { %4606 = vmax.xlane.f32.xlu0 %v4605_v23 }
0x1619   : > { %4676 = vrot.lane.b32.xlu1 %v8598_v52, %s7626_s23 }
0x167d   : > { %v4586_v25 = vpop.xlane.xlu1 %4585 }
0x167e   : > { %v4608_v26 = vsub.f32 %v4424_v50, %v4586_v25 }
0x167f   : > { %v4589_v43 = vpop.xlane.xlu0 %4588 }
0x1680   : > { %v4616_v29 = vmul.f32 1.442695, %v4608_v26  ;;  %v4609_v57 = vsub.f32 %v4427_v60, %v4589_v43 }
0x1682   : > { %7179 = vpow2.f32 %v4616_v29  ;;  %v4618_v51 = vmul.f32 1.442695, %v4609_v57 }
0x1684   : > { %7181 = vpow2.f32 %v4618_v51 }
0x1685   : > { %v4592_v39 = vpop.xlane.xlu1 %4591 }
0x1686   : > { %v4610_v63 = vsub.f32 %v4475_v13, %v4592_v39 }
0x1687   : > { %v4595_v16 = vpop.xlane.xlu0 %4594 }
0x1688   : > { %v4620_v34 = vmul.f32 1.442695, %v4610_v63  ;;  %v4611_v27 = vsub.f32 %v4478_v61, %v4595_v16 }
0x168a   : > { %7183 = vpow2.f32 %v4620_v34  ;;  %v4622_v36 = vmul.f32 1.442695, %v4611_v27 }
0x168c   : > { %v8882_v54 = vpop.eup %7179  ;;  %7185 = vpow2.f32 %v4622_v36 }
0x168d   : > { %v4598_v10 = vpop.xlane.xlu1 %4597  ;;  %v4632_v50 = vsel %vm648_vm2, %v8882_v54, 0.0 }
0x168e   : > { %v8886_v31 = vpop.eup %7181  ;;  %v4612_v60 = vsub.f32 %v4526_v44, %v4598_v10  ;;  %4633 = vadd.xlane.f32.xlu1 %v4632_v50 }
0x168f   : > { %v4601_v21 = vpop.xlane.xlu0 %4600  ;;  %v4635_v13 = vsel %vm648_vm2, %v8886_v31, 0.0 }
0x1690   : > { %v4624_v32 = vmul.f32 1.442695, %v4612_v60  ;;  %v4613_v42 = vsub.f32 %v4529_v38, %v4601_v21  ;;  %4636 = vadd.xlane.f32.xlu0 %v4635_v13 }
0x1692   : > { %7187 = vpow2.f32 %v4624_v32  ;;  %v4626_v61 = vmul.f32 1.442695, %v4613_v42 }
0x1694   : > { %v8890_v1 = vpop.eup %7183  ;;  %7189 = vpow2.f32 %v4626_v61 }
0x1695   : > { %v4604_v23 = vpop.xlane.xlu1 %4603  ;;  %v4638_v25 = vsel %vm648_vm2, %v8890_v1, 0.0 }
0x1696   : > { %v8894_v26 = vpop.eup %7185  ;;  %v4614_v44 = vsub.f32 %v4577_v28, %v4604_v23  ;;  %4639 = vadd.xlane.f32.xlu1 %v4638_v25  ;;  %v7257_v25 = vld [vmem:[#allocation8 + $0x10] sm:$0xff]  }
0x1697   : > { %v4607_v43 = vpop.xlane.xlu0 %4606  ;;  %v4641_v29 = vsel %vm648_vm2, %v8894_v26, 0.0 }
0x1698   : > { %v4628_v57 = vmul.f32 1.442695, %v4614_v44  ;;  %v4615_v38 = vsub.f32 %v4580_v56, %v4607_v43  ;;  %4642 = vadd.xlane.f32.xlu0 %v4641_v29 }
0x169a   : > { %7191 = vpow2.f32 %v4628_v57  ;;  %v4630_v51 = vmul.f32 1.442695, %v4615_v38 }
0x169c   : > { %v8898_v39 = vpop.eup %7187  ;;  %7193 = vpow2.f32 %v4630_v51 }
0x169d   : > { %v4644_v63 = vsel %vm648_vm2, %v8898_v39, 0.0 }
0x169e   : > { %v8902_v16 = vpop.eup %7189  ;;  %4645 = vadd.xlane.f32.xlu1 %v4644_v63 }
0x169f   : > { %v4647_v28 = vsel %vm648_vm2, %v8902_v16, 0.0 }
0x16a0   : > { %4648 = vadd.xlane.f32.xlu0 %v4647_v28 }
0x16a4   : > { %v8906_v34 = vpop.eup %7191 }
0x16a5   : > { %v4650_v56 = vsel %vm648_vm2, %v8906_v34, 0.0 }
0x16a6   : > { %v8910_v27 = vpop.eup %7193  ;;  %4651 = vadd.xlane.f32.xlu1 %v4650_v56 }
0x16a7   : > { %v4653_v36 = vsel %vm648_vm2, %v8910_v27, 0.0 }
0x16a8   : > { %4654 = vadd.xlane.f32.xlu0 %v4653_v36 }
0x16b7   : > { %4770 = vrot.lane.b32.xlu1 %v8618_v40, %s7626_s23 }
0x16bb   : > { %4817 = vrot.lane.b32.xlu1 %v8628_v4, %s7626_s23 }
0x16be   : > { %4723 = vrot.lane.b32.xlu0 %v8608_v18, %s7626_s23  ;;  %s7528_s23 = scalar_lea.vmem %s7527_s21, 2048 }
0x16bf   : > { %4953 = vrot.lane.b32.xlu1 %v8596_v24, %s7627_s14  ;;  %p7530_p8 = scmp.lt.s32.totalorder %s7528_s23, %s7522_s22 }
0x16c1   : > { %p7531_p7 = por %p7530_p8, %p7529_p13 }
0x16c2   : > { %4955 = vrot.lane.b32.xlu0 %v8596_v24, %s7628_s24 }
0x16c3   : > { %5057 = vrot.lane.b32.xlu1 %v8616_v7, %s7628_s24  ;;  %p7532_p9 = pnand %p7531_p7, %p7525_p12 }
0x16c6   : > { %v4071_v10 = vpop.f32.mrb[100].mxu0  ;;  %5006 = vrot.lane.b32.xlu0 %v8606_v8, %s7628_s24 }
0x16c7   : > { %v6592_v50 = vpop.f32.mrb[101].mxu0  ;;  %5108 = vrot.lane.b32.xlu1 %v8626_v47, %s7628_s24 }
0x16c8   : > { %v4074_v60 = vpop.f32.mrb[102].mxu0 }
0x16c9   : > { %v4222_v21 = vpack.c.bf16 %v4074_v60, %v4071_v10  ;;  %v6593_v13 = vpop.f32.mrb[103].mxu0 }
0x16ca   : > { %5004 = vrot.lane.b32.xlu0 %v8606_v8, %s7627_s14 }
0x16cb   : > { %6614 = vmatprep.mubr.msk.bf16.mxu0 %vm648_vm2, %v4222_v21  ;;  %5106 = vrot.lane.b32.xlu1 %v8626_v47, %s7627_s14  ;;  %v4677_v47 = vpop.permute.xlu1 %4676 }
0x16cc   : > { %6615 = vmatmul.mubr.msk.bf16.vlgmr.msra.gmra.mrb[108].mxu0 %vm648_vm2, %v4223_v9 }
0x16cd   : > { %6623 = vmatpush3.bf16.msra.mxu0 %v8873_v59 }
0x16ce   : > { %v4167_v24 = vpop.f32.mrb[104].mxu0  ;;  %5055 = vrot.lane.b32.xlu0 %v8616_v7, %s7627_s14  ;;  %6656 = vmatprep.subr.bf16.mxu0 %v7620_v17 }
0x16cf   : > { %v6604_v32 = vpop.f32.mrb[105].mxu0 }
0x16d0   : > { %v4170_v8 = vpop.f32.mrb[106].mxu0 }
0x16d1   : > { %v4224_v42 = vpack.c.bf16 %v4170_v8, %v4167_v24  ;;  %v6605_v61 = vpop.f32.mrb[107].mxu0 }
0x16d3   : > { %6618 = vmatprep.mubr.msk.bf16.mxu0 %vm648_vm2, %v4224_v42 }
0x16d4   : > { %6619 = vmatmul.mubr.msk.bf16.gmra.mrb[112].mxu0 %vm648_vm2, %v4225_v58 }
0x16d5   : > { %6624 = vmatprep.mubr.msk.bf16.mxu0 %vm648_vm2, %v3730_v14 }
0x16dc   : > { %6625 = vmatmul.mubr.msk.bf16.vlgmr.msra.gmra.mrb[108].mxu0 %vm648_vm2, %v3731_v15 }
0x16dd   : > { %6657 = vmatpush3.bf16.msra.mxu0 %v4677_v47  ;;  %6628 = vmatprep.mubr.msk.bf16.mxu0 %vm648_vm2, %v3732_v48 }
0x16de   : > { %6668 = vmatprep.subr.bf16.mxu0 %v7620_v17 }
0x16e4   : > { %6629 = vmatmul.mubr.msk.bf16.gmra.mrb[112].mxu0 %vm648_vm2, %v3733_v0 }
0x16e5   : > { %6658 = vmatprep.mubr.msk.bf16.mxu0 %vm7621_vm1, %v7620_v17 }
0x171b   : > { %v4634_v7 = vpop.xlane.xlu1 %4633 }
0x171c   : > { %7195 = vrcp.f32 %v4634_v7 }
0x171d   : > { %v4637_v33 = vpop.xlane.xlu0 %4636 }
0x171e   : > { %7197 = vrcp.f32 %v4637_v33 }
0x1723   : > { %v4640_v15 = vpop.xlane.xlu1 %4639 }
0x1725   : > { %v4643_v5 = vpop.xlane.xlu0 %4642 }
0x1726   : > { %v7196_v45 = vpop.eup %7195  ;;  %7199 = vrcp.f32 %v4643_v5 }
0x1727   : > { %v4664_v14 = vmul.f32 %v7196_v45, %v8882_v54  ;;  %7201 = vrcp.f32 %v4640_v15 }
0x1728   : > { %v7198_v11 = vpop.eup %7197 }
0x1729   : > { %v4665_v3 = vmul.f32 %v7198_v11, %v8886_v31 }
0x172b   : > { %v4672_v30 = vpack.c.bf16 %v4665_v3, %v4664_v14  ;;  %v4646_v41 = vpop.xlane.xlu1 %4645 }
0x172c   : > { %7203 = vrcp.f32 %v4646_v41 }
0x172d   : > { %6659 = vmatmul.mubr.msk.bf16.vlgmr.msra.gmra.mrb[116].mxu0 %vm648_vm2, %v4672_v30  ;;  %v4649_v35 = vpop.xlane.xlu0 %4648 }
0x172e   : > { %7205 = vrcp.f32 %v4649_v35  ;;  %6670 = vmatprep.mubr.msk.bf16.mxu0 %vm7621_vm1, %v7620_v17 }
0x1730   : > { %v7200_v48 = vpop.eup %7199 }
0x1731   : > { %v7202_v46 = vpop.eup %7201  ;;  %v4667_v6 = vmul.f32 %v7200_v48, %v8894_v26 }
0x1732   : > { %v4666_v59 = vmul.f32 %v7202_v46, %v8890_v1 }
0x1733   : > { %v4652_v0 = vpop.xlane.xlu1 %4651 }
0x1734   : > { %7207 = vrcp.f32 %v4652_v0  ;;  %v4673_v44 = vpack.c.bf16 %v4667_v6, %v4666_v59 }
0x1735   : > { %v4655_v55 = vpop.xlane.xlu0 %4654 }
0x1736   : > { %v7204_v9 = vpop.eup %7203  ;;  %7209 = vrcp.f32 %v4655_v55 }
0x1737   : > { %v4771_v12 = vpop.permute.xlu1 %4770  ;;  %v4668_v54 = vmul.f32 %v7204_v9, %v8898_v39 }
0x1738   : > { %v7206_v58 = vpop.eup %7205  ;;  %6669 = vmatpush3.bf16.msra.mxu0 %v4771_v12 }
0x1739   : > { %v4669_v31 = vmul.f32 %v7206_v58, %v8902_v16  ;;  %v4724_v23 = vpop.permute.xlu0 %4723  ;;  %6680 = vmatprep.subr.bf16.mxu0 %v7257_v25 }
0x173a   : > { %6663 = vmatpush3.bf16.msra.mxu1 %v4724_v23 }
0x173b   : > { %v4674_v43 = vpack.c.bf16 %v4669_v31, %v4668_v54  ;;  %6674 = vmatprep.subr.bf16.mxu1 %v7620_v17  ;;  %v4818_v29 = vpop.permute.xlu1 %4817 }
0x173d   : > { %6665 = vmatmul.mubr.msk.bf16.vlgmr.msra.gmra.mrb[156].mxu1 %vm648_vm2, %v4673_v44  ;;  %6671 = vmatmul.mubr.msk.bf16.vlgmr.msra.gmra.mrb[120].mxu0 %vm648_vm2, %v4674_v43  ;;  %v4956_v51 = vpop.permute.xlu0 %4955 }
0x173e   : > { %v7208_v26 = vpop.eup %7207  ;;  %6675 = vmatpush3.bf16.msra.mxu1 %v4818_v29  ;;  %6676 = vmatprep.mubr.msk.bf16.mxu1 %vm7621_vm1, %v7620_v17  ;;  %v4961_v63 = vsel %vm648_vm2, %v4956_v51, 0 }
0x173f   : > { %6690 = vmatprep.subr.bf16.mxu1 %v7620_v17  ;;  %6681 = vmatpush3.bf16.msra.mxu0 %v7257_v25  ;;  %v4670_v57 = vmul.f32 %v7208_v26, %v8906_v34  ;;  %v4954_v16 = vpop.permute.xlu1 %4953 }
0x1740   : > { %v7210_v1 = vpop.eup %7209  ;;  %6702 = vmatprep.subr.bf16.mxu0 %v7620_v17 }
0x1741   : > { %v4671_v38 = vmul.f32 %v7210_v1, %v8910_v27  ;;  %v5007_v28 = vpop.permute.xlu0 %5006 }
0x1742   : > { %v5012_v36 = vsel %vm648_vm2, %v5007_v28, 0 }
0x1743   : > { %v4675_v39 = vpack.c.bf16 %v4671_v38, %v4670_v57  ;;  %v5058_v56 = vpop.permute.xlu1 %5057 }
0x1744   : > { %v5063_v14 = vsel %vm648_vm2, %v5058_v56, 0 }
0x1745   : > { %6677 = vmatmul.mubr.msk.bf16.vlgmr.msra.gmra.mrb[160].mxu1 %vm648_vm2, %v4675_v39  ;;  %v5005_v27 = vpop.permute.xlu0 %5004 }
0x1746   : > { %6692 = vmatprep.mubr.msk.bf16.mxu1 %vm7621_vm1, %v7620_v17 }
0x1747   : > { %6691 = vmatpush3.bf16.xpose.msra.mxu1 %v4961_v63  ;;  %v5109_v34 = vpop.permute.xlu1 %5108 }
0x1748   : > { %6696 = vmatprep.subr.bf16.mxu1 %v7620_v17  ;;  %v5114_v10 = vsel %vm648_vm2, %v5109_v34, 0 }
0x1749   : > { %v5056_v6 = vpop.permute.xlu0 %5055 }
0x174b   : > { %v5107_v50 = vpop.permute.xlu1 %5106 }
0x174e   : > { %6693 = vmatmul.mubr.msk.bf16.vlgmr.msra.gmra.mrb[164].mxu1 %vm648_vm2, %v4954_v16 }
0x174f   : > { %6697 = vmatpush3.bf16.xpose.msra.mxu1 %v5012_v36  ;;  %6698 = vmatprep.mubr.msk.bf16.mxu1 %vm7621_vm1, %v7620_v17 }
0x1750   : > { %6708 = vmatprep.subr.bf16.mxu1 %v7620_v17 }
0x1756   : > { %6699 = vmatmul.mubr.msk.bf16.vlgmr.msra.gmra.mrb[168].mxu1 %vm648_vm2, %v5005_v27 }
0x1757   : > { %6709 = vmatpush3.bf16.xpose.msra.mxu1 %v5114_v10  ;;  %6710 = vmatprep.mubr.msk.bf16.mxu1 %vm7621_vm1, %v7620_v17 }
0x1758   : > { %6720 = vmatprep.subr.bf16.mxu1 %v7620_v17 }
0x175e   : > { %6711 = vmatmul.mubr.msk.bf16.vlgmr.msra.gmra.mrb[172].mxu1 %vm648_vm2, %v5107_v50 }
0x175f   : > { %6722 = vmatprep.mubr.msk.bf16.mxu1 %vm7621_vm1, %v7620_v17 }
0x1800   : > { %v4716_v60 = vpop.f32.mrb[116].mxu0 }
0x1801   : > { %v6660_v21 = vpop.f32.mrb[117].mxu0 }
0x1802   : > { %v4719_v13 = vpop.f32.mrb[118].mxu0 }
0x1803   : > { %v4864_v24 = vpack.c.bf16 %v4719_v13, %v4716_v60  ;;  %v6661_v32 = vpop.f32.mrb[119].mxu0 }
0x1805   : > { %6682 = vmatprep.mubr.msk.bf16.mxu0 %vm648_vm2, %v4864_v24 }
0x1810   : > { %v4763_v8 = vpop.f32.mrb[156].mxu1  ;;  %v4810_v42 = vpop.f32.mrb[120].mxu0 }
0x1811   : > { %v6666_v61 = vpop.f32.mrb[157].mxu1  ;;  %v6672_v47 = vpop.f32.mrb[121].mxu0 }
0x1812   : > { %v4766_v7 = vpop.f32.mrb[158].mxu1  ;;  %v4813_v33 = vpop.f32.mrb[122].mxu0 }
0x1813   : > { %v4865_v45 = vpack.c.bf16 %v4766_v7, %v4763_v8  ;;  %v4866_v15 = vpack.c.bf16 %v4813_v33, %v4810_v42  ;;  %v6667_v5 = vpop.f32.mrb[159].mxu1  ;;  %v6673_v11 = vpop.f32.mrb[123].mxu0 }
0x1815   : > { %6683 = vmatmul.mubr.msk.bf16.vlgmr.msra.gmra.mrb[108].mxu0 %vm648_vm2, %v4865_v45 }
0x1816   : > { %6703 = vmatpush3.bf16.xpose.msra.mxu0 %v5063_v14  ;;  %6686 = vmatprep.mubr.msk.bf16.mxu0 %vm648_vm2, %v4866_v15 }
0x1817   : > { %6714 = vmatprep.subr.bf16.mxu0 %v7620_v17 }
0x1818   : > { %v4857_v3 = vpop.f32.mrb[160].mxu1 }
0x1819   : > { %v6678_v30 = vpop.f32.mrb[161].mxu1 }
0x181a   : > { %v4860_v41 = vpop.f32.mrb[162].mxu1 }
0x181b   : > { %v4867_v35 = vpack.c.bf16 %v4860_v41, %v4857_v3  ;;  %v6679_v0 = vpop.f32.mrb[163].mxu1 }
0x181d   : > { %6687 = vmatmul.mubr.msk.bf16.gmra.mrb[112].mxu0 %vm648_vm2, %v4867_v35 }
0x181e   : > { %6704 = vmatprep.mubr.msk.bf16.mxu0 %vm7621_vm1, %v7620_v17 }
0x1821   : > { %v4997_v48 = vpop.f32.mrb[164].mxu1 }
0x1822   : > { %v6694_v46 = vpop.f32.mrb[165].mxu1  ;;  %v5157_v55 = vsel %vm648_vm2, %v4997_v48, -inf }
0x1823   : > { %5158 = vmax.xlane.f32.xlu0 %v5157_v55  ;;  %v5000_v9 = vpop.f32.mrb[166].mxu1 }
0x1824   : > { %v6695_v12 = vpop.f32.mrb[167].mxu1  ;;  %v5160_v58 = vsel %vm648_vm2, %v5000_v9, -inf }
0x1825   : > { %5161 = vmax.xlane.f32.xlu1 %v5160_v58  ;;  %6705 = vmatmul.mubr.msk.bf16.vlgmr.msra.gmra.mrb[124].mxu0 %vm648_vm2, %v5056_v6 }
0x1826   : > { %6716 = vmatprep.mubr.msk.bf16.mxu0 %vm7621_vm1, %v7620_v17 }
0x1829   : > { %v5048_v59 = vpop.f32.mrb[168].mxu1 }
0x182a   : > { %v6700_v54 = vpop.f32.mrb[169].mxu1  ;;  %v5163_v31 = vsel %vm648_vm2, %v5048_v59, -inf }
0x182b   : > { %5164 = vmax.xlane.f32.xlu0 %v5163_v31  ;;  %v5051_v23 = vpop.f32.mrb[170].mxu1 }
0x182c   : > { %v6701_v25 = vpop.f32.mrb[171].mxu1  ;;  %v5166_v44 = vsel %vm648_vm2, %v5051_v23, -inf }
0x182f   : > { %5167 = vmax.xlane.f32.xlu0 %v5166_v44 }
0x1831   : > { %v5150_v43 = vpop.f32.mrb[172].mxu1 }
0x1832   : > { %v6712_v29 = vpop.f32.mrb[173].mxu1  ;;  %v5175_v8 = vsel %vm648_vm2, %v5150_v43, -inf }
0x1833   : > { %v5153_v26 = vpop.f32.mrb[174].mxu1 }
0x1834   : > { %v6713_v1 = vpop.f32.mrb[175].mxu1  ;;  %v5178_v61 = vsel %vm648_vm2, %v5153_v26, -inf }
0x18b0   : > { %v5159_v57 = vpop.xlane.xlu0 %5158 }
0x18b1   : > { %v5181_v39 = vsub.f32 %v4997_v48, %v5159_v57 }
0x18b2   : > { %v5162_v51 = vpop.xlane.xlu1 %5161 }
0x18b3   : > { %v5182_v63 = vsub.f32 %v5000_v9, %v5162_v51  ;;  %v5189_v28 = vmul.f32 1.442695, %v5181_v39 }
0x18b5   : > { %v5191_v36 = vmul.f32 1.442695, %v5182_v63  ;;  %7211 = vpow2.f32 %v5189_v28 }
0x18b7   : > { %7213 = vpow2.f32 %v5191_v36 }
0x18b8   : > { %v5165_v38 = vpop.xlane.xlu0 %5164 }
0x18b9   : > { %v5183_v56 = vsub.f32 %v5048_v59, %v5165_v38 }
0x18bb   : > { %v5193_v27 = vmul.f32 1.442695, %v5183_v56 }
0x18bc   : > { %v5168_v16 = vpop.xlane.xlu0 %5167 }
0x18bd   : > { %v5184_v34 = vsub.f32 %v5051_v23, %v5168_v16  ;;  %7215 = vpow2.f32 %v5193_v27 }
0x18bf   : > { %v5195_v10 = vmul.f32 1.442695, %v5184_v34  ;;  %v7212_v42 = vpop.eup %7211 }
0x18c0   : > { %v5205_v7 = vsel %vm648_vm2, %v7212_v42, 0.0 }
0x18c1   : > { %7217 = vpow2.f32 %v5195_v10  ;;  %v7214_v47 = vpop.eup %7213 }
0x18c2   : > { %v5208_v45 = vsel %vm648_vm2, %v7214_v47, 0.0 }
0x18c7   : > { %v9023_v33 = vpop.eup %7215 }
0x18c8   : > { %v5211_v5 = vsel %vm648_vm2, %v9023_v33, 0.0 }
0x18cb   : > { %v7218_v15 = vpop.eup %7217 }
0x18cc   : > { %v5214_v11 = vsel %vm648_vm2, %v7218_v15, 0.0 }
0x18f8   : > { %v5099_v50 = vpop.f32.mrb[124].mxu0 }
0x18f9   : > { %v6706_v60 = vpop.f32.mrb[125].mxu0  ;;  %v5169_v21 = vsel %vm648_vm2, %v5099_v50, -inf }
0x18fa   : > { %5170 = vmax.xlane.f32.xlu1 %v5169_v21  ;;  %v5102_v13 = vpop.f32.mrb[126].mxu0 }
0x18fb   : > { %v6707_v24 = vpop.f32.mrb[127].mxu0  ;;  %v5172_v32 = vsel %vm648_vm2, %v5102_v13, -inf }
0x18fc   : > { %5173 = vmax.xlane.f32.xlu0 %v5172_v32  ;;  %v7258_v32 = vld [vmem:[#allocation8 + $0x18] sm:$0xff]  }
0x18fe   : > { %5176 = vmax.xlane.f32.xlu1 %v5175_v8 }
0x1900   : > { %5179 = vmax.xlane.f32.xlu0 %v5178_v61 }
0x1902   : > { %5206 = vadd.xlane.f32.xlu1 %v5205_v7  ;;  %v7259_v7 = vld [vmem:[#allocation11] sm:$0xff]  }
0x1904   : > { %5209 = vadd.xlane.f32.xlu0 %v5208_v45 }
0x1906   : > { %5212 = vadd.xlane.f32.xlu1 %v5211_v5  ;;  %v7260_v5 = vld [vmem:[#allocation11 + $0x8] sm:$0xff]  }
0x1908   : > { %5215 = vadd.xlane.f32.xlu0 %v5214_v11  ;;  %v7261_v11 = vld [vmem:[#allocation14] sm:$0xff]  }
0x1987   : > { %v5171_v14 = vpop.xlane.xlu1 %5170 }
0x1988   : > { %v5185_v23 = vsub.f32 %v5099_v50, %v5171_v14 }
0x1989   : > { %v5174_v3 = vpop.xlane.xlu0 %5173 }
0x198a   : > { %v5186_v41 = vsub.f32 %v5102_v13, %v5174_v3  ;;  %v5197_v25 = vmul.f32 1.442695, %v5185_v23 }
0x198b   : > { %v5177_v30 = vpop.xlane.xlu1 %5176 }
0x198c   : > { %v5187_v35 = vsub.f32 %v5150_v43, %v5177_v30  ;;  %v5199_v55 = vmul.f32 1.442695, %v5186_v41 }
0x198d   : > { %v5180_v0 = vpop.xlane.xlu0 %5179 }
0x198e   : > { %v5201_v48 = vmul.f32 1.442695, %v5187_v35  ;;  %v5188_v46 = vsub.f32 %v5153_v26, %v5180_v0 }
0x198f   : > { %v5207_v26 = vpop.xlane.xlu1 %5206 }
0x1990   : > { %7219 = vpow2.f32 %v5201_v48  ;;  %v5203_v9 = vmul.f32 1.442695, %v5188_v46 }
0x1991   : > { %v5210_v29 = vpop.xlane.xlu0 %5209 }
0x1992   : > { %7221 = vpow2.f32 %v5203_v9 }
0x1993   : > { %7223 = vpow2.f32 %v5199_v55  ;;  %v5213_v1 = vpop.xlane.xlu1 %5212 }
0x1994   : > { %7225 = vpow2.f32 %v5197_v25 }
0x1995   : > { %7227 = vrcp.f32 %v5210_v29 }
0x1996   : > { %7229 = vrcp.f32 %v5207_v26 }
0x199a   : > { %v7220_v6 = vpop.eup %7219 }
0x199b   : > { %v5223_v12 = vsel %vm648_vm2, %v7220_v6, 0.0 }
0x199c   : > { %v7222_v58 = vpop.eup %7221  ;;  %5224 = vadd.xlane.f32.xlu1 %v5223_v12  ;;  %v7263_v12 = vld [vmem:[#allocation14 + $0x10] sm:$0xff]  }
0x199d   : > { %v5226_v59 = vsel %vm648_vm2, %v7222_v58, 0.0  ;;  %v9031_v54 = vpop.eup %7223 }
0x199e   : > { %5227 = vadd.xlane.f32.xlu0 %v5226_v59  ;;  %v5220_v31 = vsel %vm648_vm2, %v9031_v54, 0.0  ;;  %v7226_v44 = vpop.eup %7225 }
0x199f   : > { %v5217_v43 = vsel %vm648_vm2, %v7226_v44, 0.0 }
0x19a2   : > { %5221 = vadd.xlane.f32.xlu0 %v5220_v31 }
0x19ad   : > { %5249 = vrot.lane.b32.xlu1 %v8598_v52, %s7627_s14  ;;  %v5216_v52 = vpop.xlane.xlu0 %5215 }
0x19ae   : > { %7231 = vrcp.f32 %v5216_v52 }
0x19af   : > { %7233 = vrcp.f32 %v5213_v1 }
0x19b8   : > { %5296 = vrot.lane.b32.xlu0 %v8608_v18, %s7627_s14  ;;  %v7228_v18 = vpop.eup %7227 }
0x19b9   : > { %v7230_v38 = vpop.eup %7229  ;;  %v5238_v51 = vmul.f32 %v7228_v18, %v7214_v47 }
0x19ba   : > { %v5237_v63 = vmul.f32 %v7230_v38, %v7212_v42  ;;  %v7232_v28 = vpop.eup %7231 }
0x19bb   : > { %v5240_v36 = vmul.f32 %v7232_v28, %v7218_v15  ;;  %v7265_v28 = vld [vmem:[#allocation10] ss:$0 sm:$0xff] }
0x19bc   : > { %v5245_v56 = vpack.c.bf16 %v5238_v51, %v5237_v63 }
0x19d1   : > { %5218 = vadd.xlane.f32.xlu1 %v5217_v43 }
0x19e2   : > { %5343 = vrot.lane.b32.xlu1 %v8618_v40, %s7627_s14 }
0x19e6   : > { %5390 = vrot.lane.b32.xlu1 %v8628_v4, %s7627_s14  ;;  %v7234_v4 = vpop.eup %7233 }
0x19e7   : > { %v5239_v34 = vmul.f32 %v7234_v4, %v9023_v33 }
0x19e9   : > { %v5246_v10 = vpack.c.bf16 %v5240_v36, %v5239_v34 }
0x1a29   : > { %v5225_v57 = vpop.xlane.xlu1 %5224 }
0x1a2b   : > { %v5228_v39 = vpop.xlane.xlu0 %5227 }
0x1a2c   : > { %7235 = vrcp.f32 %v5228_v39 }
0x1a2d   : > { %v5250_v16 = vpop.permute.xlu1 %5249  ;;  %7237 = vrcp.f32 %v5225_v57 }
0x1a2e   : > { %6715 = vmatpush3.bf16.msra.mxu0 %v5250_v16 }
0x1a2f   : > { %v5222_v40 = vpop.xlane.xlu0 %5221  ;;  %6726 = vmatprep.subr.bf16.mxu0 %v7620_v17 }
0x1a30   : > { %7239 = vrcp.f32 %v5222_v40 }
0x1a31   : > { %6717 = vmatmul.mubr.msk.bf16.vlgmr.msra.gmra.mrb[128].mxu0 %vm648_vm2, %v5245_v56 }
0x1a32   : > { %6728 = vmatprep.mubr.msk.bf16.mxu0 %vm7621_vm1, %v7620_v17 }
0x1a33   : > { %v5297_v27 = vpop.permute.xlu0 %5296 }
0x1a34   : > { %6721 = vmatpush3.bf16.msra.mxu1 %v5297_v27 }
0x1a35   : > { %6732 = vmatprep.subr.bf16.mxu1 %v7620_v17 }
0x1a36   : > { %v7236_v60 = vpop.eup %7235 }
0x1a37   : > { %6723 = vmatmul.mubr.msk.bf16.vlgmr.msra.gmra.mrb[176].mxu1 %vm648_vm2, %v5246_v10  ;;  %v7238_v13 = vpop.eup %7237  ;;  %v5244_v24 = vmul.f32 %v7236_v60, %v7222_v58  ;;  %v7264_v58 = vld [vmem:[#allocation14 + $0x18] sm:$0xff]  }
0x1a38   : > { %6734 = vmatprep.mubr.msk.bf16.mxu1 %vm7621_vm1, %v7620_v17  ;;  %v5243_v8 = vmul.f32 %v7238_v13, %v7220_v6  ;;  %v7262_v6 = vld [vmem:[#allocation14 + $0x8] sm:$0xff]  }
0x1a3a   : > { %v7240_v61 = vpop.eup %7239  ;;  %v5248_v47 = vpack.c.bf16 %v5244_v24, %v5243_v8 }
0x1a3b   : > { %v5242_v33 = vmul.f32 %v7240_v61, %v9031_v54 }
0x1a5e   : > { %v5219_v50 = vpop.xlane.xlu1 %5218 }
0x1a5f   : > { %7241 = vrcp.f32 %v5219_v50 }
0x1a62   : > { %v5344_v21 = vpop.permute.xlu1 %5343 }
0x1a63   : > { %6727 = vmatpush3.bf16.msra.mxu0 %v5344_v21 }
0x1a64   : > { %6738 = vmatprep.subr.bf16.mxu0 %v7258_v32 }
0x1a66   : > { %v5391_v42 = vpop.permute.xlu1 %5390 }
0x1a67   : > { %6733 = vmatpush3.bf16.msra.mxu1 %v5391_v42 }
0x1a68   : > { %6748 = vmatprep.subr.bf16.mxu1 %v7259_v7 }
0x1a69   : > { %v7242_v17 = vpop.eup %7241 }
0x1a6a   : > { %v5241_v45 = vmul.f32 %v7242_v17, %v7226_v44  ;;  %6735 = vmatmul.mubr.msk.bf16.vlgmr.msra.gmra.mrb[180].mxu1 %vm648_vm2, %v5248_v47 }
0x1a6b   : > { %6749 = vmatpush3.bf16.msra.mxu1 %v7259_v7 }
0x1a6c   : > { %v5247_v15 = vpack.c.bf16 %v5242_v33, %v5241_v45  ;;  %6750 = vmatprep.subr.bf16.mxu1 %v7260_v5 }
0x1a6e   : > { %6729 = vmatmul.mubr.msk.bf16.vlgmr.msra.gmra.mrb[132].mxu0 %vm648_vm2, %v5247_v15 }
0x1a6f   : > { %6739 = vmatpush3.bf16.msra.mxu0 %v7258_v32  ;;  %6751 = vmatpush3.bf16.msra.mxu1 %v7260_v5 }
0x1a70   : > { %6760 = vmatprep.subr.bf16.mxu0 %v7261_v11 }
0x1b04   : > { %v5289_v14 = vpop.f32.mrb[128].mxu0 }
0x1b05   : > { %v6718_v3 = vpop.f32.mrb[129].mxu0 }
0x1b06   : > { %v5292_v30 = vpop.f32.mrb[130].mxu0 }
0x1b07   : > { %v5437_v41 = vpack.c.bf16 %v5292_v30, %v5289_v14  ;;  %v6719_v35 = vpop.f32.mrb[131].mxu0 }
0x1b09   : > { %6740 = vmatprep.mubr.msk.bf16.mxu0 %vm648_vm2, %v5437_v41 }
0x1b0a   : > { %v5336_v0 = vpop.f32.mrb[176].mxu1 }
0x1b0b   : > { %v6724_v48 = vpop.f32.mrb[177].mxu1 }
0x1b0c   : > { %v5339_v46 = vpop.f32.mrb[178].mxu1 }
0x1b0d   : > { %v5438_v55 = vpack.c.bf16 %v5339_v46, %v5336_v0  ;;  %v6725_v9 = vpop.f32.mrb[179].mxu1 }
0x1b0f   : > { %6741 = vmatmul.mubr.msk.bf16.vlgmr.msra.gmra.mrb[108].mxu0 %vm648_vm2, %v5438_v55 }
0x1b10   : > { %6761 = vmatpush3.bf16.msra.mxu0 %v7261_v11 }
0x1b11   : > { %6762 = vmatprep.subr.bf16.mxu0 %v7262_v6 }
0x1b14   : > { %6763 = vmatpush3.bf16.msra.mxu0 %v7262_v6 }
0x1b15   : > { %6764 = vmatprep.subr.bf16.mxu0 %v7263_v12 }
0x1b18   : > { %6765 = vmatpush3.bf16.msra.mxu0 %v7263_v12 }
0x1b19   : > { %6766 = vmatprep.subr.bf16.mxu0 %v7264_v58 }
0x1b1c   : > { %6767 = vmatpush3.bf16.msra.mxu0 %v7264_v58 }
0x1b3d   : > { %v5430_v59 = vpop.f32.mrb[180].mxu1 }
0x1b3e   : > { %v6736_v54 = vpop.f32.mrb[181].mxu1 }
0x1b3f   : > { %v5433_v31 = vpop.f32.mrb[182].mxu1 }
0x1b40   : > { %v5440_v23 = vpack.c.bf16 %v5433_v31, %v5430_v59  ;;  %v6737_v25 = vpop.f32.mrb[183].mxu1 }
0x1b41   : > { %v5383_v44 = vpop.f32.mrb[132].mxu0 }
0x1b42   : > { %v6730_v43 = vpop.f32.mrb[133].mxu0 }
0x1b43   : > { %v5386_v29 = vpop.f32.mrb[134].mxu0 }
0x1b44   : > { %v5439_v26 = vpack.c.bf16 %v5386_v29, %v5383_v44  ;;  %v6731_v52 = vpop.f32.mrb[135].mxu0  ;;  %v7267_v44 = vld [vmem:[#allocation16] ss:$0 sm:$0xff] }
0x1b46   : > { %6744 = vmatprep.mubr.msk.bf16.mxu0 %vm648_vm2, %v5439_v26 }
0x1b47   : > { %6745 = vmatmul.mubr.msk.bf16.gmra.mrb[112].mxu0 %vm648_vm2, %v5440_v23 }
0x1be2   : > { %v6742_v1 = vpop.f32.mrb[108].mxu0 }
0x1be3   : > { %v5487_v18 = vpop.f32.mrb[109].mxu0  ;;  %v5528_v51 = vadd.f32 %v6742_v1, %v8565_v22 }
0x1be4   : > { %v5526_v57 = vadd.f32 %v5487_v18, %v8552_v62  ;;  %v6743_v38 = vpop.f32.mrb[110].mxu0 }
0x1be5   : > { %v5529_v39 = vadd.f32 %v6743_v38, %v8562_v19  ;;  %v5490_v63 = vpop.f32.mrb[111].mxu0  ;;  %v5536_v36 = vadd.f32 %v7265_v28, %v5528_v51 }
0x1be6   : > { %v5527_v16 = vadd.f32 %v5490_v63, %v8555_v2  ;;  %v9066_v56 = vadd.f32 %v7265_v28, %v5526_v57 }
0x1be7   : > { %v9064_v40 = vadd.f32 %v7265_v28, %v5529_v39 }
0x1be8   : > { %v9068_v4 = vadd.f32 %v7265_v28, %v5527_v16 }
0x1be9   : > { %v5543_v62 = vpack.c.bf16 %v9064_v40, %v5536_v36 }
0x1bea   : > { %v5542_v34 = vpack.c.bf16 %v9068_v4, %v9066_v56 }
0x1bec   : > { %6752 = vmatprep.mubr.msk.bf16.mxu1 %vm551_vm0, %v5542_v34 }
0x1bed   : > { %6753 = vmatmul.mubr.msk.bf16.vlgmr.msra.gmra.mrb[184].mxu1 %vm551_vm0, %v5543_v62 }
0x1c1a   : > { %v6746_v19 = vpop.f32.mrb[112].mxu0 }
0x1c1b   : > { %v5503_v22 = vpop.f32.mrb[113].mxu0  ;;  %v5532_v10 = vadd.f32 %v6746_v19, %v8585_v20 }
0x1c1c   : > { %v5530_v2 = vadd.f32 %v5503_v22, %v8572_v37  ;;  %v6747_v27 = vpop.f32.mrb[114].mxu0 }
0x1c1d   : > { %v5533_v50 = vadd.f32 %v6747_v27, %v8582_v53  ;;  %v5506_v60 = vpop.f32.mrb[115].mxu0  ;;  %v9085_v8 = vadd.f32 %v7265_v28, %v5532_v10 }
0x1c1e   : > { %v5531_v21 = vadd.f32 %v5506_v60, %v8575_v49  ;;  %v9081_v24 = vadd.f32 %v7265_v28, %v5530_v2  ;;  %v7266_v49 = vld [vmem:[#allocation13] ss:$0 sm:$0xff] }
0x1c1f   : > { %v9079_v13 = vadd.f32 %v7265_v28, %v5533_v50 }
0x1c20   : > { %v9083_v32 = vadd.f32 %v7265_v28, %v5531_v21 }
0x1c21   : > { %v5545_v37 = vpack.c.bf16 %v9079_v13, %v9085_v8 }
0x1c22   : > { %v5544_v42 = vpack.c.bf16 %v9083_v32, %v9081_v24 }
0x1c24   : > { %6756 = vmatprep.mubr.msk.bf16.mxu1 %vm551_vm0, %v5544_v42 }
0x1c25   : > { %6757 = vmatmul.mubr.msk.bf16.gmra.mrb[188].mxu1 %vm551_vm0, %v5545_v37 }
0x1cc0   : > { %v6754_v53 = vpop.f32.mrb[184].mxu1 }
0x1cc1   : > { %v5601_v20 = vadd.f32 %v7266_v49, %v6754_v53  ;;  %v5592_v61 = vpop.f32.mrb[185].mxu1 }
0x1cc2   : > { %v5593_v47 = vadd.f32 %v7266_v49, %v5592_v61  ;;  %v6755_v7 = vpop.f32.mrb[186].mxu1 }
0x1cc3   : > { %v5604_v17 = vadd.f32 %v7266_v49, %v6755_v7  ;;  %v5595_v33 = vpop.f32.mrb[187].mxu1  ;;  %v5625_v15 = vmax.f32 %v5601_v20, 0.0 }
0x1cc4   : > { %v5596_v45 = vadd.f32 %v7266_v49, %v5595_v33  ;;  %v5623_v11 = vmax.f32 %v5593_v47, 0.0 }
0x1cc5   : > { %v5626_v5 = vmax.f32 %v5604_v17, 0.0 }
0x1cc6   : > { %v5624_v14 = vmax.f32 %v5596_v45, 0.0 }
0x1cc7   : > { %v5632_v3 = vpack.c.bf16 %v5626_v5, %v5625_v15 }
0x1cc8   : > { %v5631_v30 = vpack.c.bf16 %v5624_v14, %v5623_v11 }
0x1cca   : > { %6768 = vmatprep.mubr.msk.bf16.mxu0 %vm3079_vm3, %v5631_v30 }
0x1ccb   : > { %6769 = vmatmul.mubr.msk.bf16.vlgmr.msra.gmra.mrb[136].mxu0 %vm3079_vm3, %v5632_v3 }
0x1cf8   : > { %v6758_v41 = vpop.f32.mrb[188].mxu1 }
0x1cf9   : > { %v5617_v35 = vadd.f32 %v7266_v49, %v6758_v41  ;;  %v5608_v0 = vpop.f32.mrb[189].mxu1 }
0x1cfa   : > { %v5609_v48 = vadd.f32 %v7266_v49, %v5608_v0  ;;  %v6759_v46 = vpop.f32.mrb[190].mxu1 }
0x1cfb   : > { %v5620_v55 = vadd.f32 %v7266_v49, %v6759_v46  ;;  %v5611_v9 = vpop.f32.mrb[191].mxu1  ;;  %v5629_v12 = vmax.f32 %v5617_v35, 0.0 }
0x1cfc   : > { %v5612_v6 = vadd.f32 %v7266_v49, %v5611_v9  ;;  %v5627_v59 = vmax.f32 %v5609_v48, 0.0 }
0x1cfd   : > { %v5630_v58 = vmax.f32 %v5620_v55, 0.0 }
0x1cfe   : > { %v5628_v54 = vmax.f32 %v5612_v6, 0.0 }
0x1cff   : > { %v5634_v31 = vpack.c.bf16 %v5630_v58, %v5629_v12 }
0x1d00   : > { %v5633_v23 = vpack.c.bf16 %v5628_v54, %v5627_v59 }
0x1d02   : > { %6772 = vmatprep.mubr.msk.bf16.mxu0 %vm3079_vm3, %v5633_v23 }
0x1d03   : > { %6773 = vmatmul.mubr.msk.bf16.gmra.mrb[140].mxu0 %vm3079_vm3, %v5634_v31 }
0x1d9e   : > { %v6770_v25 = vpop.f32.mrb[136].mxu0 }
0x1d9f   : > { %v5690_v43 = vadd.f32 %v7267_v44, %v6770_v25  ;;  %v5681_v29 = vpop.f32.mrb[137].mxu0 }
0x1da0   : > { %v5682_v26 = vadd.f32 %v7267_v44, %v5681_v29  ;;  %v6771_v52 = vpop.f32.mrb[138].mxu0 }
0x1da1   : > { %v5714_v1 = vadd.f32 %v5690_v43, %v5536_v36  ;;  %v5693_v18 = vadd.f32 %v7267_v44, %v6771_v52  ;;  %v5684_v57 = vpop.f32.mrb[139].mxu0 }
0x1da2   : > { %v5712_v38 = vadd.f32 %v5682_v26, %v9066_v56  ;;  %v5685_v51 = vadd.f32 %v7267_v44, %v5684_v57 }
0x1da3   : > { %5722 = vst.msk [vmem:[%s458_s26 + $0x10] sm:$0xff] %vm551_vm0, %v5714_v1  ;;  %v5715_v39 = vadd.f32 %v5693_v18, %v9064_v40 }
0x1da4   : > { %5720 = vst.msk [vmem:[%s458_s26] sm:$0xff] %vm551_vm0, %v5712_v38  ;;  %v5713_v63 = vadd.f32 %v5685_v51, %v9068_v4 }
0x1da5   : > { %5723 = vst.msk [vmem:[%s458_s26 + $0x18] sm:$0xff] %vm551_vm0, %v5715_v39 }
0x1da6   : > { %5721 = vst.msk [vmem:[%s458_s26 + $0x8] sm:$0xff] %vm551_vm0, %v5713_v63 }
0x1dd6   : > { %v6774_v16 = vpop.f32.mrb[140].mxu0 }
0x1dd7   : > { %v5706_v28 = vadd.f32 %v7267_v44, %v6774_v16  ;;  %v5697_v36 = vpop.f32.mrb[141].mxu0 }
0x1dd8   : > { %v5698_v34 = vadd.f32 %v7267_v44, %v5697_v36  ;;  %v6775_v56 = vpop.f32.mrb[142].mxu0 }
0x1dd9   : > { %v5718_v62 = vadd.f32 %v5706_v28, %v9085_v8  ;;  %v5709_v40 = vadd.f32 %v7267_v44, %v6775_v56  ;;  %v5700_v19 = vpop.f32.mrb[143].mxu0 }
0x1dda   : > { %v5716_v22 = vadd.f32 %v5698_v34, %v9081_v24  ;;  %v5701_v4 = vadd.f32 %v7267_v44, %v5700_v19 }
0x1ddb   : > { %5726 = vst.msk [vmem:[%s458_s26 + $0x30] sm:$0xff] %vm551_vm0, %v5718_v62  ;;  %v5719_v2 = vadd.f32 %v5709_v40, %v9079_v13 }
0x1ddc   : > { %5724 = vst.msk [vmem:[%s458_s26 + $0x20] sm:$0xff] %vm551_vm0, %v5716_v22  ;;  %v5717_v27 = vadd.f32 %v5701_v4, %v9083_v32 }
0x1ddd   : > { %5727 = vst.msk [vmem:[%s458_s26 + $0x38] sm:$0xff] %vm551_vm0, %v5719_v2 }
0x1dde   : > { %5725 = vst.msk [vmem:[%s458_s26 + $0x28] sm:$0xff] %vm551_vm0, %v5717_v27 }
0x1ddf   : > { %7535 = shalt.err (!%p7532_p9)
}
0x1de0   : > { %s7536_s14 = scalar_lea.hbm %s9114_s16, 1024  ;;  %s7540_s28 = scalar_lea.hbm %s9203_s27, 2048 }
0x1de1   : > { %p7537_p4 = scmp.ne.s32.totalorder %s9114_s16, %s7536_s14  ;;  %p7541_p2 = scmp.lt.u32.totalorder %s9114_s16, %s9203_s27 }
0x1de2   : > { %p7542_p6 = scmp.lt.u32.totalorder %s7540_s28, %s7536_s14  ;;  %p7544_p10 = scmp.lt.u32.totalorder %s7536_s14, %s9114_s16 }
0x1de3   : > { %p7538_p3 = pnand %p7537_p4, %p9204_p1 }
0x1de4   : > { %p7543_p5 = por %p7542_p6, %p7541_p2 }
0x1de5   : > { %p7539_p0 = pneg %p7538_p3 }
0x1de6   : > { %p7545_p11 = por %p7544_p10, %p7543_p5 }
0x1de8   : > { %p7546_p12 = pnand %p7545_p11, %p7539_p0 }
0x1dea   : > { %7549 = shalt.err (!%p7546_p12)
}
0x1deb   : > { %s7630_s22 = smov 128   ;;  %s7631_s13 = smov 8  }
0x1dec   : > { %6862 = dma.vmem_to_hbm [thread:$0]  (%p9204_p1), %s9116_s9, 1024, %s9114_s16, %s5729_s15, %s7630_s22, %s7630_s22, %s7631_s13  }
0x1ded PF: > { %s5757_s21 = sand.u32 1, %s7592_s30   ;;  %p9205_p13 = scmp.ne.s32.totalorder %s9190_s17, 0 }
0x1dee   : > { %p9206_p8 = scmp.ge.s32.totalorder %s7604_s12, 2  ;;  %s5758_s23 = scalar_lea.sflag [#allocation4], %s5757_s21 }
0x1df0   : > { %p6894_p7 = pnand %p9206_p8, %p9205_p13 }
0x1df2   : > { %7587 = dma.done.wait (!%p6894_p7), %s5758_s23, 1024  }
0x1df3   : > { %7589 = vsyncadd (!%p6894_p7), %s5758_s23, 4294966272  ;;  %p26_p9 = scmp.ge.s32.totalorder %s7902_s19, 4   ;;  %s9207_s30 = smov %s7596_s10 }
0x1df4   : > { %s9208_s10 = smov %s7600_s11  ;;  %s9209_s11 = smov %s7913_s18 }
0x1df5   : > { %s9210_s12 = smov %s7902_s19  ;;  %28 = sbr.rel (!%p26_p9) target bundleno = 12 (0xc), region = 133 }
0x1dfc   :  { %5763 = vsyncpa [#allocation3], 1 }
0x1dfd   :  { %5765 = vsyncpa [#allocation3 + $0x1], 1 }
0x1dfe   :  { %5766 = vsyncpa [#allocation6], 1 }
0x1dff   :  { %5767 = vsyncpa [#allocation9], 1 }
0x1e00   :  { %5768 = vsyncpa [#allocation12], 1 }
0x1e01   :  { %5769 = vsyncpa [#allocation15], 1 }
0x1e02   :  { %5770 = vsyncpa [#allocation4], 1 }
0x1e03   :  { %5772 = vsyncpa [#allocation4 + $0x1], 1 }

</bundles_post_ra>
